<compile_context>
chip_gen: v7x
topology: tpu7x:2x2x1
jax: 0.10.0
libtpu: 0.0.40
codegen_flags: <defaults>
</compile_context>

<pallas_src>
import functools

import jax
import jax.numpy as jnp
from jax.experimental import pallas as pl
from jax.experimental.pallas import tpu as pltpu

LN_EPS = 1e-5  # nn.LayerNorm default
INV_SQRT2 = 0.7071067811865476


def _vmem_limit_bytes():
    # Re-derive per generation (v7x: 64 MiB physical -> ~48 MiB; v5e/v6e:
    # 128 MiB -> capped at 96 MiB).  Falls back conservatively if the query
    # is unavailable.
    try:
        cap = pltpu.get_tpu_info().vmem_capacity_bytes
    except Exception:  # pragma: no cover - defensive fallback
        cap = 64 * 1024 * 1024
    return min(int(cap * 3 // 4), 96 * 1024 * 1024)


def mlp_block_kernel(x_ref, g_ref, beta_ref, w1_ref, b1_ref, w2_ref, b2_ref,
                     o_ref, xn_ref, acc_ref):
    k = pl.program_id(1)

    @pl.when(k == 0)
    def _():
        # ---- LayerNorm over the embedding dim, f32 math, fused stats ----
        x = x_ref[...].astype(jnp.float32)                     # (tm, E)
        e_inv = 1.0 / x.shape[-1]
        s1 = jnp.sum(x, axis=-1, keepdims=True)
        s2 = jnp.sum(x * x, axis=-1, keepdims=True)
        mean = s1 * e_inv
        var = jnp.maximum(s2 * e_inv - mean * mean, 0.0)
        xn = (x - mean) * jax.lax.rsqrt(var + LN_EPS)
        xn = xn * g_ref[...] + beta_ref[...]                    # (tm, E)
        xn_ref[...] = xn.astype(jnp.bfloat16)   # resident MXU LHS, reused per k
        acc_ref[...] = jnp.zeros_like(acc_ref)

    # ---- Linear1 slice (E -> tk): bf16 operands on MXU, f32 accumulation ----
    h = jnp.dot(xn_ref[...], w1_ref[...], preferred_element_type=jnp.float32)
    h = h + b1_ref[...]                                         # (tm, tk), f32

    # ---- exact GELU (nn.GELU default = erf form), f32 ----
    # TODO(synk): optional bf16 / tanh-approx GELU for extra v6e/v7x headroom.
    h = 0.5 * h * (1.0 + jax.lax.erf(h * INV_SQRT2))

    # ---- Dropout(p) -> identity in eval mode ----
    # TODO(synk): training-mode dropout (stateful PRNG masking) not implemented.

    # ---- Linear2 slice (tk -> E), accumulated over the hidden dim ----
    acc_ref[...] += jnp.dot(h.astype(jnp.bfloat16), w2_ref[...],
                            preferred_element_type=jnp.float32)

    @pl.when(k == pl.num_programs(1) - 1)
    def _():
        o_ref[...] = (acc_ref[...] + b2_ref[...]).astype(o_ref.dtype)


@functools.partial(jax.jit, static_argnames=("tm", "tk"))
def mlp_block(x, gamma, beta, w1, b1, w2, b2, *, tm=256, tk=512):
    """x: [B, S, E]. Returns [B, S, E] with the same dtype as x.

    Pass w1/w2 already stored in bf16 to avoid a per-call cast.
    """
    B, S, E = x.shape
    M = w1.shape[1]
    rows = B * S

    # --- row-tile selection (megacore-aware, padding-aware) ---
    while tm > 128 and pl.cdiv(rows, tm) < 2:   # give both v7x TCs work
        tm //= 2
    while tm > 8 and rows <= tm // 2:           # don't pad tiny inputs hugely
        tm //= 2
    rows_p = pl.cdiv(rows, tm) * tm

    # --- hidden-dim tile: largest multiple of 128 (<= tk) dividing M ---
    tk_eff = None
    c = min(tk, M)
    c -= c % 128
    while c >= 128:
        if M % c == 0:
            tk_eff = c
            break
        c -= 128
    if tk_eff is None:
        tk_eff = M  # M not a multiple of 128: keep the hidden dim whole

    x2 = x.reshape(rows, E)
    if rows_p != rows:
        x2 = jnp.pad(x2, ((0, rows_p - rows), (0, 0)))

    # LN affine / biases stay f32; matmul weights go to the MXU in bf16
    # (no-op casts if the caller already stores them in bf16).
    g2 = gamma.reshape(1, E).astype(jnp.float32)
    be2 = beta.reshape(1, E).astype(jnp.float32)
    b1_2 = b1.reshape(1, M).astype(jnp.float32)
    b2_2 = b2.reshape(1, E).astype(jnp.float32)
    w1_b = w1.astype(jnp.bfloat16)
    w2_b = w2.astype(jnp.bfloat16)

    out = pl.pallas_call(
        mlp_block_kernel,
        out_shape=jax.ShapeDtypeStruct((rows_p, E), x.dtype),
        grid_spec=pltpu.PrefetchScalarGridSpec(
            num_scalar_prefetch=0,
            grid=(rows_p // tm, M // tk_eff),
            in_specs=[
                pl.BlockSpec((tm, E), lambda i, k: (i, 0)),        # x rows
                pl.BlockSpec((1, E), lambda i, k: (0, 0),
                             pipeline_mode=pl.Buffered(1)),        # gamma
                pl.BlockSpec((1, E), lambda i, k: (0, 0),
                             pipeline_mode=pl.Buffered(1)),        # beta
                pl.BlockSpec((E, tk_eff), lambda i, k: (0, k)),    # W1 slice
                pl.BlockSpec((1, tk_eff), lambda i, k: (0, k)),    # b1 slice
                pl.BlockSpec((tk_eff, E), lambda i, k: (k, 0)),    # W2 slice
                pl.BlockSpec((1, E), lambda i, k: (0, 0),
                             pipeline_mode=pl.Buffered(1)),        # b2
            ],
            out_specs=pl.BlockSpec((tm, E), lambda i, k: (i, 0)),
            scratch_shapes=[
                pltpu.VMEM((tm, E), jnp.bfloat16),   # LayerNorm output (LHS)
                pltpu.VMEM((tm, E), jnp.float32),    # output accumulator
            ],
        ),
        compiler_params=pltpu.CompilerParams(
            dimension_semantics=("parallel", "arbitrary"),
            vmem_limit_bytes=_vmem_limit_bytes(),
        ),
    )(x2, g2, be2, w1_b, b1_2, w2_b, b2_2)

    return out[:rows].reshape(B, S, E)


if __name__ == "__main__":
    # Small shapes consistent with the module: [batch, seq, embedding_dim],
    # hidden = mlp_size.  S=197 (ViT-style token count) exercises the
    # ragged-rows padding path; M=1024 with tk=512 exercises the M-tiling.
    B, S, E, M = 2, 197, 256, 1024

    key = jax.random.PRNGKey(0)
    kx, kg, kb, kw1, kb1, kw2, kb2 = jax.random.split(key, 7)

    x = jax.random.normal(kx, (B, S, E), dtype=jnp.float32)

    # Deterministic synthetic parameters (no checkpoint loading).
    gamma = 1.0 + 0.1 * jax.random.normal(kg, (E,), jnp.float32)  # LN weight
    beta = 0.05 * jax.random.normal(kb, (E,), jnp.float32)        # LN bias
    w1 = jax.random.normal(kw1, (E, M), jnp.float32) * 0.02
    b1 = jax.random.normal(kb1, (M,), jnp.float32) * 0.02
    w2 = jax.random.normal(kw2, (M, E), jnp.float32) * 0.02
    b2 = jax.random.normal(kb2, (E,), jnp.float32) * 0.02

    # Store matmul weights in bf16 ONCE, outside the jitted call (avoids a
    # per-invocation f32->bf16 cast and its extra HBM traffic).
    w1_b = w1.astype(jnp.bfloat16)
    w2_b = w2.astype(jnp.bfloat16)

    y = mlp_block(x, gamma, beta, w1_b, b1, w2_b, b2)
    jax.block_until_ready(y)

    # Pure-JAX f32 reference (eval-mode dropout = identity).
    def ref(x):
        mu = jnp.mean(x, -1, keepdims=True)
        va = jnp.mean((x - mu) ** 2, -1, keepdims=True)
        xn = (x - mu) / jnp.sqrt(va + LN_EPS) * gamma + beta
        h = xn @ w1 + b1
        h = 0.5 * h * (1.0 + jax.lax.erf(h * INV_SQRT2))
        return h @ w2 + b2

    r = ref(x)
    assert y.shape == r.shape and y.dtype == r.dtype
    # bf16 matmul operands (intentional inference-precision choice) =>
    # loosened tolerance vs. the f32 reference.
    max_err = float(jnp.max(jnp.abs(y - r)))
    assert jnp.allclose(y, r, atol=2e-2, rtol=2e-2), max_err
    print("KERNEL_OK")
</pallas_src>

<mosaic_0001>
module attributes {stable_mosaic.version = 11 : i64} {
  func.func @mlp_block_kernel(%arg0: i32, %arg1: i32, %arg2: memref<256x256xf32, #tpu.memory_space<vmem>>, %arg3: memref<1x256xf32, #tpu.memory_space<vmem>>, %arg4: memref<1x256xf32, #tpu.memory_space<vmem>>, %arg5: memref<256x512xbf16, #tpu.memory_space<vmem>>, %arg6: memref<1x512xf32, #tpu.memory_space<vmem>>, %arg7: memref<512x256xbf16, #tpu.memory_space<vmem>>, %arg8: memref<1x256xf32, #tpu.memory_space<vmem>>, %arg9: memref<256x256xf32, #tpu.memory_space<vmem>>, %arg10: memref<256x256xbf16, #tpu.memory_space<vmem>>, %arg11: memref<256x256xf32, #tpu.memory_space<vmem>>) attributes {dimension_semantics = [#tpu.dimension_semantics<parallel>, #tpu.dimension_semantics<arbitrary>], iteration_bounds = array<i64: 2, 2>, scalar_prefetch = 0 : i64, scratch_operands = 2 : i64, tpu.core_type = #tpu.core_type<tc>, window_params = [{transform_indices = @transform_0, window_bounds = array<i64: 256, 256>}, {pipeline_mode = #tpu.pipeline_mode<synchronous>, transform_indices = @transform_1, window_bounds = array<i64: 1, 256>}, {pipeline_mode = #tpu.pipeline_mode<synchronous>, transform_indices = @transform_2, window_bounds = array<i64: 1, 256>}, {transform_indices = @transform_3, window_bounds = array<i64: 256, 512>}, {transform_indices = @transform_4, window_bounds = array<i64: 1, 512>}, {transform_indices = @transform_5, window_bounds = array<i64: 512, 256>}, {pipeline_mode = #tpu.pipeline_mode<synchronous>, transform_indices = @transform_6, window_bounds = array<i64: 1, 256>}, {transform_indices = @transform_7, window_bounds = array<i64: 256, 256>}]} {
    %c0_i32 = arith.constant 0 : i32
    %0 = arith.cmpi eq, %arg1, %c0_i32 : i32
    %1 = arith.extui %0 : i1 to i32
    %c0_i32_0 = arith.constant 0 : i32
    %2 = arith.cmpi ne, %1, %c0_i32_0 : i32
    scf.if %2 {
      %c0_17 = arith.constant 0 : index
      %c0_18 = arith.constant 0 : index
      %26 = vector.load %arg2[%c0_17, %c0_18] : memref<256x256xf32, #tpu.memory_space<vmem>>, vector<256x256xf32>
      %cst_19 = arith.constant dense<0.000000e+00> : vector<256xf32>
      %27 = vector.multi_reduction <add>, %26, %cst_19 [1] : vector<256x256xf32> to vector<256xf32>
      %28 = vector.shape_cast %27 : vector<256xf32> to vector<256x1xf32>
      %29 = arith.mulf %26, %26 : vector<256x256xf32>
      %cst_20 = arith.constant dense<0.000000e+00> : vector<256xf32>
      %30 = vector.multi_reduction <add>, %29, %cst_20 [1] : vector<256x256xf32> to vector<256xf32>
      %31 = vector.shape_cast %30 : vector<256xf32> to vector<256x1xf32>
      %cst_21 = arith.constant 3.906250e-03 : f32
      %32 = vector.broadcast %cst_21 : f32 to vector<256x1xf32>
      %33 = arith.mulf %28, %32 : vector<256x1xf32>
      %cst_22 = arith.constant 3.906250e-03 : f32
      %34 = vector.broadcast %cst_22 : f32 to vector<256x1xf32>
      %35 = arith.mulf %31, %34 : vector<256x1xf32>
      %36 = arith.mulf %33, %33 : vector<256x1xf32>
      %37 = arith.subf %35, %36 : vector<256x1xf32>
      %cst_23 = arith.constant 0.000000e+00 : f32
      %38 = vector.broadcast %cst_23 : f32 to vector<256x1xf32>
      %39 = arith.maximumf %37, %38 : vector<256x1xf32>
      %40 = vector.broadcast %33 : vector<256x1xf32> to vector<256x256xf32>
      %41 = arith.subf %26, %40 : vector<256x256xf32>
      %cst_24 = arith.constant 9.99999974E-6 : f32
      %42 = vector.broadcast %cst_24 : f32 to vector<256x1xf32>
      %43 = arith.addf %39, %42 : vector<256x1xf32>
      %44 = math.rsqrt %43 : vector<256x1xf32>
      %45 = vector.broadcast %44 : vector<256x1xf32> to vector<256x256xf32>
      %46 = arith.mulf %41, %45 : vector<256x256xf32>
      %c0_25 = arith.constant 0 : index
      %c0_26 = arith.constant 0 : index
      %47 = vector.load %arg3[%c0_25, %c0_26] : memref<1x256xf32, #tpu.memory_space<vmem>>, vector<1x256xf32>
      %48 = vector.broadcast %47 : vector<1x256xf32> to vector<256x256xf32>
      %49 = arith.mulf %46, %48 : vector<256x256xf32>
      %c0_27 = arith.constant 0 : index
      %c0_28 = arith.constant 0 : index
      %50 = vector.load %arg4[%c0_27, %c0_28] : memref<1x256xf32, #tpu.memory_space<vmem>>, vector<1x256xf32>
      %51 = vector.broadcast %50 : vector<1x256xf32> to vector<256x256xf32>
      %52 = arith.addf %49, %51 : vector<256x256xf32>
      %53 = arith.truncf %52 : vector<256x256xf32> to vector<256x256xbf16>
      %c0_29 = arith.constant 0 : index
      %c0_30 = arith.constant 0 : index
      %54 = vector.load %arg10[%c0_29, %c0_30] : memref<256x256xbf16, #tpu.memory_space<vmem>>, vector<256x256xbf16>
      tpu.vector_store %arg10[%c0_29, %c0_30], %53 {strides = array<i32>} : memref<256x256xbf16, #tpu.memory_space<vmem>>, vector<256x256xbf16>,
      %cst_31 = arith.constant 0.000000e+00 : f32
      %55 = vector.broadcast %cst_31 : f32 to vector<256x256xf32>
      %c0_32 = arith.constant 0 : index
      %c0_33 = arith.constant 0 : index
      %56 = vector.load %arg11[%c0_32, %c0_33] : memref<256x256xf32, #tpu.memory_space<vmem>>, vector<256x256xf32>
      tpu.vector_store %arg11[%c0_32, %c0_33], %55 {strides = array<i32>} : memref<256x256xf32, #tpu.memory_space<vmem>>, vector<256x256xf32>,
    } else {
    }
    %c0 = arith.constant 0 : index
    %c0_1 = arith.constant 0 : index
    %3 = vector.load %arg10[%c0, %c0_1] : memref<256x256xbf16, #tpu.memory_space<vmem>>, vector<256x256xbf16>
    %c0_2 = arith.constant 0 : index
    %c0_3 = arith.constant 0 : index
    %4 = vector.load %arg5[%c0_2, %c0_3] : memref<256x512xbf16, #tpu.memory_space<vmem>>, vector<256x512xbf16>
    %cst = arith.constant dense<0.000000e+00> : vector<256x512xf32>
    %5 = tpu.matmul %3, %4, %cst {dimension_numbers = #tpu.dot_dimension_numbers<[1], [0], [0], [1], [0, 0, 1, 1], [], []>} : vector<256x256xbf16>, vector<256x512xbf16>, vector<256x512xf32> -> vector<256x512xf32>
    %c0_4 = arith.constant 0 : index
    %c0_5 = arith.constant 0 : index
    %6 = vector.load %arg6[%c0_4, %c0_5] : memref<1x512xf32, #tpu.memory_space<vmem>>, vector<1x512xf32>
    %7 = vector.broadcast %6 : vector<1x512xf32> to vector<256x512xf32>
    %8 = arith.addf %5, %7 : vector<256x512xf32>
    %cst_6 = arith.constant 5.000000e-01 : f32
    %9 = vector.broadcast %cst_6 : f32 to vector<256x512xf32>
    %10 = arith.mulf %9, %8 : vector<256x512xf32>
    %cst_7 = arith.constant 0.707106769 : f32
    %11 = vector.broadcast %cst_7 : f32 to vector<256x512xf32>
    %12 = arith.mulf %8, %11 : vector<256x512xf32>
    %13 = math.erf %12 : vector<256x512xf32>
    %cst_8 = arith.constant 1.000000e+00 : f32
    %14 = vector.broadcast %cst_8 : f32 to vector<256x512xf32>
    %15 = arith.addf %14, %13 : vector<256x512xf32>
    %16 = arith.mulf %10, %15 : vector<256x512xf32>
    %c0_9 = arith.constant 0 : index
    %c0_10 = arith.constant 0 : index
    %17 = vector.load %arg11[%c0_9, %c0_10] : memref<256x256xf32, #tpu.memory_space<vmem>>, vector<256x256xf32>
    %18 = arith.truncf %16 : vector<256x512xf32> to vector<256x512xbf16>
    %c0_11 = arith.constant 0 : index
    %c0_12 = arith.constant 0 : index
    %19 = vector.load %arg7[%c0_11, %c0_12] : memref<512x256xbf16, #tpu.memory_space<vmem>>, vector<512x256xbf16>
    %cst_13 = arith.constant dense<0.000000e+00> : vector<256x256xf32>
    %20 = tpu.matmul %18, %19, %cst_13 {dimension_numbers = #tpu.dot_dimension_numbers<[1], [0], [0], [1], [0, 0, 1, 1], [], []>} : vector<256x512xbf16>, vector<512x256xbf16>, vector<256x256xf32> -> vector<256x256xf32>
    %21 = arith.addf %17, %20 : vector<256x256xf32>
    %c0_14 = arith.constant 0 : index
    %c0_15 = arith.constant 0 : index
    %22 = vector.load %arg11[%c0_14, %c0_15] : memref<256x256xf32, #tpu.memory_space<vmem>>, vector<256x256xf32>
    tpu.vector_store %arg11[%c0_14, %c0_15], %21 {strides = array<i32>} : memref<256x256xf32, #tpu.memory_space<vmem>>, vector<256x256xf32>,
    %c1_i32 = arith.constant 1 : i32
    %23 = arith.cmpi eq, %arg1, %c1_i32 : i32
    %24 = arith.extui %23 : i1 to i32
    %c0_i32_16 = arith.constant 0 : i32
    %25 = arith.cmpi ne, %24, %c0_i32_16 : i32
    scf.if %25 {
      %c0_17 = arith.constant 0 : index
      %c0_18 = arith.constant 0 : index
      %26 = vector.load %arg11[%c0_17, %c0_18] : memref<256x256xf32, #tpu.memory_space<vmem>>, vector<256x256xf32>
      %c0_19 = arith.constant 0 : index
      %c0_20 = arith.constant 0 : index
      %27 = vector.load %arg8[%c0_19, %c0_20] : memref<1x256xf32, #tpu.memory_space<vmem>>, vector<1x256xf32>
      %28 = vector.broadcast %27 : vector<1x256xf32> to vector<256x256xf32>
      %29 = arith.addf %26, %28 : vector<256x256xf32>
      %c0_21 = arith.constant 0 : index
      %c0_22 = arith.constant 0 : index
      %30 = vector.load %arg9[%c0_21, %c0_22] : memref<256x256xf32, #tpu.memory_space<vmem>>, vector<256x256xf32>
      tpu.vector_store %arg9[%c0_21, %c0_22], %29 {strides = array<i32>} : memref<256x256xf32, #tpu.memory_space<vmem>>, vector<256x256xf32>,
    } else {
    }
    return
  }
  func.func @transform_0(%arg0: i32, %arg1: i32) -> (i32, i32) {
    %c0_i32 = arith.constant 0 : i32
    %c0_i32_0 = arith.constant 0 : i32
    return %arg0, %c0_i32 : i32, i32
  }
  func.func @transform_1(%arg0: i32, %arg1: i32) -> (i32, i32) {
    %c0_i32 = arith.constant 0 : i32
    %c0_i32_0 = arith.constant 0 : i32
    %c0_i32_1 = arith.constant 0 : i32
    return %c0_i32, %c0_i32_0 : i32, i32
  }
  func.func @transform_2(%arg0: i32, %arg1: i32) -> (i32, i32) {
    %c0_i32 = arith.constant 0 : i32
    %c0_i32_0 = arith.constant 0 : i32
    %c0_i32_1 = arith.constant 0 : i32
    return %c0_i32, %c0_i32_0 : i32, i32
  }
  func.func @transform_3(%arg0: i32, %arg1: i32) -> (i32, i32) {
    %c0_i32 = arith.constant 0 : i32
    %c0_i32_0 = arith.constant 0 : i32
    return %c0_i32, %arg1 : i32, i32
  }
  func.func @transform_4(%arg0: i32, %arg1: i32) -> (i32, i32) {
    %c0_i32 = arith.constant 0 : i32
    %c0_i32_0 = arith.constant 0 : i32
    return %c0_i32, %arg1 : i32, i32
  }
  func.func @transform_5(%arg0: i32, %arg1: i32) -> (i32, i32) {
    %c0_i32 = arith.constant 0 : i32
    %c0_i32_0 = arith.constant 0 : i32
    return %arg1, %c0_i32 : i32, i32
  }
  func.func @transform_6(%arg0: i32, %arg1: i32) -> (i32, i32) {
    %c0_i32 = arith.constant 0 : i32
    %c0_i32_0 = arith.constant 0 : i32
    %c0_i32_1 = arith.constant 0 : i32
    return %c0_i32, %c0_i32_0 : i32, i32
  }
  func.func @transform_7(%arg0: i32, %arg1: i32) -> (i32, i32) {
    %c0_i32 = arith.constant 0 : i32
    %c0_i32_0 = arith.constant 0 : i32
    return %arg0, %c0_i32 : i32, i32
  }
}

</mosaic_0001>

<bundles_post_ra>
// kernel: mlp_block.1
= control target key start
LH: loop header
LB: loop body
LE: loop exit
PB: predicated region body
PF: predicated region fallthrough
CT: control target
= control target key end

     0   :  { %s7621_s0 = inlined_call_operand.vmem [shape: f32[512,256], index: 0, kind: input, shape index: {}]   ;;  %s7622_s1 = inlined_call_operand.vmem [shape: f32[1,256], index: 1, kind: input, shape index: {}]   ;;  %s7623_s2 = inlined_call_operand.vmem [shape: f32[1,256], index: 2, kind: input, shape index: {}]   ;;  %s7624_s3 = inlined_call_operand.vmem [shape: bf16[256,1024], index: 3, kind: input, shape index: {}]   ;;  %s7625_s4 = inlined_call_operand.vmem [shape: f32[1,1024], index: 4, kind: input, shape index: {}]   ;;  %s7626_s5 = inlined_call_operand.vmem [shape: bf16[1024,256], index: 5, kind: input, shape index: {}]   ;;  %s7627_s6 = inlined_call_operand.vmem [shape: f32[1,256], index: 6, kind: input, shape index: {}]   ;;  %s7628_s7 = inlined_call_operand.vmem [shape: f32[512,256], index: 7, kind: output, shape index: {}]  }
   0x1   :  { %7746 = sst [smem:[#allocation72_spill]] %s7624_s3 }
   0x2   :  { %s5171_s24 = smov 0   ;;  %s5173_s25 = smov 0  }
   0x3   :  { %s5175_s26 = smov 0   ;;  %s5177_s27 = smov 0  }
   0x4   :  { %s5179_s28 = smov 0   ;;  %s5181_s29 = smov 0  }
   0x5   :  { %s5183_s30 = smov 0  }
   0x6 LB: > { %s26_s8 = sadd.s32 1, %s5120_s28  ;;  %s29_s9 = sadd.s32 1, %s5124_s29  ;;  %s5128_s30 = sphi %s5183_s30, %s17_s30   ;;  %s5124_s29 = sphi %s5181_s29, %s7989_s29   ;;  %s5120_s28 = sphi %s5179_s28, %s7988_s28   ;;  %s5116_s27 = sphi %s5177_s27, %s7987_s27   ;;  %s5112_s26 = sphi %s5175_s26, %s7986_s26   ;;  %s5108_s25 = sphi %s5173_s25, %s7985_s25   ;;  %s5104_s24 = sphi %s5171_s24, %s7984_s24  }
   0x7   : > { %p27_p0 = scmp.ge.s32.totalorder %s26_s8, 2  ;;  %s104_s10 = sadd.s32 1, %s5108_s25 }
   0x8   : > { %p111_p1 = scmp.ne.s32.totalorder %s5108_s25, %s5104_s24  ;;  %p112_p2 = scmp.eq.s32.totalorder %s5128_s30, 0 }
   0x9   : > { %s7991_s8 = smov (%p27_p0, %s26_s8), 0  ;;  %s7993_s9 = smov (!%p27_p0, %s29_s9), %s5124_s29 }
   0xa   : > { %s101_s11 = ssub.s32 %s5120_s28, %s7991_s8  ;;  %p113_p3 = por %p112_p2, %p111_p1 }
   0xb   : > { %p31_p4 = scmp.ge.s32.totalorder %s7993_s9, 2  ;;  %p102_p5 = scmp.eq.s32.totalorder %s101_s11, 0 }
   0xc   : > { %p4276_p6 = scmp.ge.s32.totalorder %s5128_s30, 4 }
   0xd   : > { %s7995_s9 = smov (%p31_p4, %s7993_s9), 0 }
   0xe   : > { %7747 = sst [smem:[#allocation5_spill]] %s7995_s9  ;;  %245 = sbr.rel (%p4276_p6) target bundleno = 63 (0x3f), region = 28 }
   0xf   : > { %s5220_s12 = scalar_select %p102_p5, %s5108_s25, %s104_s10  }
  0x15   : > { %258 = sbr.rel (!%p113_p3) target bundleno = 63 (0x3f), region = 36  ;;  %s260_s13 = sand.u32 (%p113_p3), 1, %s5108_s25  }
  0x16   : > { %s4424_s14 = sshll.u32 (%p113_p3), %s5120_s28, 4  ;;  %s4277_s15 = sshll.u32 (%p113_p3), %s260_s13, 9 }
  0x17   : > { %s7748_s3 = sld [smem:[#allocation72_spill]] (%p113_p3)  ;;  %s5233_s19 = scalar_lea.vmem (%p113_p3), [#allocation4], %s4277_s15 }
  0x1d   : > { %s5228_s18 = scalar_lea.vmem %s7748_s3, %s4424_s14 }
  0x1e   : > { %v278_v0 = vld [vmem:[%s5228_s18] sm:$0xff]  ;;  %v280_v1 = vld [vmem:[%s5228_s18 + $0x8] sm:$0xff] }
  0x1f   : > { %v282_v2 = vld [vmem:[%s5228_s18 + $0x20] sm:$0xff]  ;;  %279 = vst [vmem:[%s5233_s19] sm:$0xff] %v278_v0  ;;  %281 = vst [vmem:[%s5233_s19 + $0x8] sm:$0xff] %v280_v1  ;;  %v284_v3 = vld [vmem:[%s5228_s18 + $0x28] sm:$0xff] }
  0x20   : > { %283 = vst [vmem:[%s5233_s19 + $0x10] sm:$0xff] %v282_v2  ;;  %v286_v4 = vld [vmem:[%s5228_s18 + $0x40] sm:$0xff]  ;;  %v288_v5 = vld [vmem:[%s5228_s18 + $0x48] sm:$0xff]  ;;  %285 = vst [vmem:[%s5233_s19 + $0x18] sm:$0xff] %v284_v3 }
  0x21   : > { %287 = vst [vmem:[%s5233_s19 + $0x20] sm:$0xff] %v286_v4  ;;  %289 = vst [vmem:[%s5233_s19 + $0x28] sm:$0xff] %v288_v5  ;;  %v290_v6 = vld [vmem:[%s5228_s18 + $0x60] sm:$0xff]  ;;  %v292_v7 = vld [vmem:[%s5228_s18 + $0x68] sm:$0xff] }
  0x22   : > { %v294_v8 = vld [vmem:[%s5228_s18 + $0x80] sm:$0xff]  ;;  %291 = vst [vmem:[%s5233_s19 + $0x30] sm:$0xff] %v290_v6  ;;  %293 = vst [vmem:[%s5233_s19 + $0x38] sm:$0xff] %v292_v7  ;;  %v296_v9 = vld [vmem:[%s5228_s18 + $0x88] sm:$0xff] }
  0x23   : > { %295 = vst [vmem:[%s5233_s19 + $0x40] sm:$0xff] %v294_v8  ;;  %v298_v10 = vld [vmem:[%s5228_s18 + $0xa0] sm:$0xff]  ;;  %v300_v11 = vld [vmem:[%s5228_s18 + $0xa8] sm:$0xff]  ;;  %297 = vst [vmem:[%s5233_s19 + $0x48] sm:$0xff] %v296_v9 }
  0x24   : > { %299 = vst [vmem:[%s5233_s19 + $0x50] sm:$0xff] %v298_v10  ;;  %301 = vst [vmem:[%s5233_s19 + $0x58] sm:$0xff] %v300_v11  ;;  %v302_v12 = vld [vmem:[%s5228_s18 + $0xc0] sm:$0xff]  ;;  %v304_v13 = vld [vmem:[%s5228_s18 + $0xc8] sm:$0xff] }
  0x25   : > { %v306_v14 = vld [vmem:[%s5228_s18 + $0xe0] sm:$0xff]  ;;  %303 = vst [vmem:[%s5233_s19 + $0x60] sm:$0xff] %v302_v12  ;;  %305 = vst [vmem:[%s5233_s19 + $0x68] sm:$0xff] %v304_v13  ;;  %v308_v15 = vld [vmem:[%s5228_s18 + $0xe8] sm:$0xff] }
  0x26   : > { %307 = vst [vmem:[%s5233_s19 + $0x70] sm:$0xff] %v306_v14  ;;  %v310_v16 = vld [vmem:[%s5228_s18 + $0x100] sm:$0xff]  ;;  %v312_v17 = vld [vmem:[%s5228_s18 + $0x108] sm:$0xff]  ;;  %309 = vst [vmem:[%s5233_s19 + $0x78] sm:$0xff] %v308_v15 }
  0x27   : > { %311 = vst [vmem:[%s5233_s19 + $0x80] sm:$0xff] %v310_v16  ;;  %313 = vst [vmem:[%s5233_s19 + $0x88] sm:$0xff] %v312_v17  ;;  %v314_v18 = vld [vmem:[%s5228_s18 + $0x120] sm:$0xff]  ;;  %v316_v19 = vld [vmem:[%s5228_s18 + $0x128] sm:$0xff] }
  0x28   : > { %v318_v20 = vld [vmem:[%s5228_s18 + $0x140] sm:$0xff]  ;;  %315 = vst [vmem:[%s5233_s19 + $0x90] sm:$0xff] %v314_v18  ;;  %317 = vst [vmem:[%s5233_s19 + $0x98] sm:$0xff] %v316_v19  ;;  %v320_v21 = vld [vmem:[%s5228_s18 + $0x148] sm:$0xff] }
  0x29   : > { %319 = vst [vmem:[%s5233_s19 + $0xa0] sm:$0xff] %v318_v20  ;;  %v322_v22 = vld [vmem:[%s5228_s18 + $0x160] sm:$0xff]  ;;  %v324_v23 = vld [vmem:[%s5228_s18 + $0x168] sm:$0xff]  ;;  %321 = vst [vmem:[%s5233_s19 + $0xa8] sm:$0xff] %v320_v21 }
  0x2a   : > { %323 = vst [vmem:[%s5233_s19 + $0xb0] sm:$0xff] %v322_v22  ;;  %325 = vst [vmem:[%s5233_s19 + $0xb8] sm:$0xff] %v324_v23  ;;  %v326_v24 = vld [vmem:[%s5228_s18 + $0x180] sm:$0xff]  ;;  %v328_v25 = vld [vmem:[%s5228_s18 + $0x188] sm:$0xff] }
  0x2b   : > { %v330_v26 = vld [vmem:[%s5228_s18 + $0x1a0] sm:$0xff]  ;;  %327 = vst [vmem:[%s5233_s19 + $0xc0] sm:$0xff] %v326_v24  ;;  %329 = vst [vmem:[%s5233_s19 + $0xc8] sm:$0xff] %v328_v25  ;;  %v332_v27 = vld [vmem:[%s5228_s18 + $0x1a8] sm:$0xff] }
  0x2c   : > { %331 = vst [vmem:[%s5233_s19 + $0xd0] sm:$0xff] %v330_v26  ;;  %v334_v28 = vld [vmem:[%s5228_s18 + $0x1c0] sm:$0xff]  ;;  %v336_v29 = vld [vmem:[%s5228_s18 + $0x1c8] sm:$0xff]  ;;  %333 = vst [vmem:[%s5233_s19 + $0xd8] sm:$0xff] %v332_v27 }
  0x2d   : > { %335 = vst [vmem:[%s5233_s19 + $0xe0] sm:$0xff] %v334_v28  ;;  %337 = vst [vmem:[%s5233_s19 + $0xe8] sm:$0xff] %v336_v29  ;;  %v338_v30 = vld [vmem:[%s5228_s18 + $0x1e0] sm:$0xff]  ;;  %v340_v31 = vld [vmem:[%s5228_s18 + $0x1e8] sm:$0xff] }
  0x2e   : > { %v342_v32 = vld [vmem:[%s5228_s18 + $0x200] sm:$0xff]  ;;  %339 = vst [vmem:[%s5233_s19 + $0xf0] sm:$0xff] %v338_v30  ;;  %341 = vst [vmem:[%s5233_s19 + $0xf8] sm:$0xff] %v340_v31  ;;  %v344_v33 = vld [vmem:[%s5228_s18 + $0x208] sm:$0xff] }
  0x2f   : > { %343 = vst [vmem:[%s5233_s19 + $0x100] sm:$0xff] %v342_v32  ;;  %v346_v34 = vld [vmem:[%s5228_s18 + $0x220] sm:$0xff]  ;;  %v348_v35 = vld [vmem:[%s5228_s18 + $0x228] sm:$0xff]  ;;  %345 = vst [vmem:[%s5233_s19 + $0x108] sm:$0xff] %v344_v33 }
  0x30   : > { %347 = vst [vmem:[%s5233_s19 + $0x110] sm:$0xff] %v346_v34  ;;  %349 = vst [vmem:[%s5233_s19 + $0x118] sm:$0xff] %v348_v35  ;;  %v350_v36 = vld [vmem:[%s5228_s18 + $0x240] sm:$0xff]  ;;  %v352_v37 = vld [vmem:[%s5228_s18 + $0x248] sm:$0xff] }
  0x31   : > { %v354_v38 = vld [vmem:[%s5228_s18 + $0x260] sm:$0xff]  ;;  %351 = vst [vmem:[%s5233_s19 + $0x120] sm:$0xff] %v350_v36  ;;  %353 = vst [vmem:[%s5233_s19 + $0x128] sm:$0xff] %v352_v37  ;;  %v356_v39 = vld [vmem:[%s5228_s18 + $0x268] sm:$0xff] }
  0x32   : > { %355 = vst [vmem:[%s5233_s19 + $0x130] sm:$0xff] %v354_v38  ;;  %v358_v40 = vld [vmem:[%s5228_s18 + $0x280] sm:$0xff]  ;;  %v360_v41 = vld [vmem:[%s5228_s18 + $0x288] sm:$0xff]  ;;  %357 = vst [vmem:[%s5233_s19 + $0x138] sm:$0xff] %v356_v39 }
  0x33   : > { %359 = vst [vmem:[%s5233_s19 + $0x140] sm:$0xff] %v358_v40  ;;  %361 = vst [vmem:[%s5233_s19 + $0x148] sm:$0xff] %v360_v41  ;;  %v362_v42 = vld [vmem:[%s5228_s18 + $0x2a0] sm:$0xff]  ;;  %v364_v43 = vld [vmem:[%s5228_s18 + $0x2a8] sm:$0xff] }
  0x34   : > { %v366_v44 = vld [vmem:[%s5228_s18 + $0x2c0] sm:$0xff]  ;;  %363 = vst [vmem:[%s5233_s19 + $0x150] sm:$0xff] %v362_v42  ;;  %365 = vst [vmem:[%s5233_s19 + $0x158] sm:$0xff] %v364_v43  ;;  %v368_v45 = vld [vmem:[%s5228_s18 + $0x2c8] sm:$0xff] }
  0x35   : > { %367 = vst [vmem:[%s5233_s19 + $0x160] sm:$0xff] %v366_v44  ;;  %v370_v46 = vld [vmem:[%s5228_s18 + $0x2e0] sm:$0xff]  ;;  %v372_v47 = vld [vmem:[%s5228_s18 + $0x2e8] sm:$0xff]  ;;  %369 = vst [vmem:[%s5233_s19 + $0x168] sm:$0xff] %v368_v45 }
  0x36   : > { %371 = vst [vmem:[%s5233_s19 + $0x170] sm:$0xff] %v370_v46  ;;  %373 = vst [vmem:[%s5233_s19 + $0x178] sm:$0xff] %v372_v47  ;;  %v374_v48 = vld [vmem:[%s5228_s18 + $0x300] sm:$0xff]  ;;  %v376_v49 = vld [vmem:[%s5228_s18 + $0x308] sm:$0xff] }
  0x37   : > { %v378_v50 = vld [vmem:[%s5228_s18 + $0x320] sm:$0xff]  ;;  %375 = vst [vmem:[%s5233_s19 + $0x180] sm:$0xff] %v374_v48  ;;  %377 = vst [vmem:[%s5233_s19 + $0x188] sm:$0xff] %v376_v49  ;;  %v380_v51 = vld [vmem:[%s5228_s18 + $0x328] sm:$0xff] }
  0x38   : > { %379 = vst [vmem:[%s5233_s19 + $0x190] sm:$0xff] %v378_v50  ;;  %v382_v52 = vld [vmem:[%s5228_s18 + $0x340] sm:$0xff]  ;;  %v384_v53 = vld [vmem:[%s5228_s18 + $0x348] sm:$0xff]  ;;  %381 = vst [vmem:[%s5233_s19 + $0x198] sm:$0xff] %v380_v51 }
  0x39   : > { %383 = vst [vmem:[%s5233_s19 + $0x1a0] sm:$0xff] %v382_v52  ;;  %385 = vst [vmem:[%s5233_s19 + $0x1a8] sm:$0xff] %v384_v53  ;;  %v386_v54 = vld [vmem:[%s5228_s18 + $0x360] sm:$0xff]  ;;  %v388_v55 = vld [vmem:[%s5228_s18 + $0x368] sm:$0xff] }
  0x3a   : > { %v390_v56 = vld [vmem:[%s5228_s18 + $0x380] sm:$0xff]  ;;  %387 = vst [vmem:[%s5233_s19 + $0x1b0] sm:$0xff] %v386_v54  ;;  %389 = vst [vmem:[%s5233_s19 + $0x1b8] sm:$0xff] %v388_v55  ;;  %v392_v57 = vld [vmem:[%s5228_s18 + $0x388] sm:$0xff] }
  0x3b   : > { %391 = vst [vmem:[%s5233_s19 + $0x1c0] sm:$0xff] %v390_v56  ;;  %v394_v58 = vld [vmem:[%s5228_s18 + $0x3a0] sm:$0xff]  ;;  %v396_v59 = vld [vmem:[%s5228_s18 + $0x3a8] sm:$0xff]  ;;  %393 = vst [vmem:[%s5233_s19 + $0x1c8] sm:$0xff] %v392_v57 }
  0x3c   : > { %395 = vst [vmem:[%s5233_s19 + $0x1d0] sm:$0xff] %v394_v58  ;;  %397 = vst [vmem:[%s5233_s19 + $0x1d8] sm:$0xff] %v396_v59  ;;  %v398_v60 = vld [vmem:[%s5228_s18 + $0x3c0] sm:$0xff]  ;;  %v400_v61 = vld [vmem:[%s5228_s18 + $0x3c8] sm:$0xff] }
  0x3d   : > { %v402_v62 = vld [vmem:[%s5228_s18 + $0x3e0] sm:$0xff]  ;;  %399 = vst [vmem:[%s5233_s19 + $0x1e0] sm:$0xff] %v398_v60  ;;  %401 = vst [vmem:[%s5233_s19 + $0x1e8] sm:$0xff] %v400_v61  ;;  %v404_v63 = vld [vmem:[%s5228_s18 + $0x3e8] sm:$0xff] }
  0x3e   : > { %403 = vst [vmem:[%s5233_s19 + $0x1f0] sm:$0xff] %v402_v62  ;;  %405 = vst [vmem:[%s5233_s19 + $0x1f8] sm:$0xff] %v404_v63 }
  0x3f PF: > { %p4280_p7 = scmp.ge.s32.totalorder %s5128_s30, 1  ;;  %p428_p8 = scmp.lt.s32.totalorder %s5128_s30, 5 }
  0x41   : > { %p429_p9 = pnand %p4280_p7, %p428_p8 }
  0x42   : > { %s435_s20 = sand.u32 (!%p429_p9), 1, %s5104_s24   ;;  %s4282_s21 = sshll.u32 (!%p429_p9), %s5116_s27, 5 }
  0x43   : > { %432 = sbr.rel (%p429_p9) target bundleno = 1210 (0x4ba), region = 67  ;;  %s4281_s22 = sshll.u32 (!%p429_p9), %s435_s20, 9 }
  0x44   : > { %p484_p10 = scmp.lt.s32.totalorder (!%p429_p9), %s4282_s21, 63  ;;  %s4285_s23 = sshll.u32 (!%p429_p9), %s5112_s26, 2 }
  0x45   : > { %p492_p11 = scmp.lt.s32.totalorder (!%p429_p9), %s4285_s23, 7  ;;  %s4286_s10 = sshll.u32 (!%p429_p9), %s5112_s26, 6 }
  0x46   : > { %p497_p12 = scmp.lt.s32.totalorder (!%p429_p9), %s4286_s10, 127  ;;  %s5386_s13 = scalar_lea.vmem (!%p429_p9), [#allocation4], %s4281_s22 }
  0x47   : > { %p4292_p13 = scmp.ne.s32.totalorder (!%p429_p9), %s5112_s26, 0 }
  0x4a   : > { %s7997_s21 = smov (!%p484_p10, %s4282_s21), 63  ;;  %s7999_s23 = smov (!%p492_p11, %s4285_s23), 7 }
  0x4b   : > { %s4425_s11 = sshll.u32 %s7997_s21, 4  ;;  %s8001_s10 = smov (!%p497_p12, %s4286_s10), 127 }
  0x4c   : > { %s5369_s15 = scalar_lea.vmem %s7621_s0, %s4425_s11  ;;  %s5374_s18 = scalar_lea.vmem %s7628_s7, %s4425_s11 }
  0x4d   : > { %s5379_s19 = scalar_lea.vmem %s7625_s4, %s7999_s23  ;;  %s4426_s20 = sshll.u32 %s8001_s10, 3 }
  0x4e   : > { %s5384_s9 = scalar_lea.vmem %s7626_s5, %s4426_s20  ;;  %513 = sbr.rel (%p4292_p13) target bundleno = 432 (0x1b0), region = 75 }
  0x55   : > { %v5390_v0 = vld [vmem:[%s5369_s15 + $0x20] sm:$0xff]  ;;  %v5393_v1 = vld [vmem:[%s5369_s15 + $0x28] sm:$0xff]  ;;  %v5404_v5 = vld [vmem:[%s5369_s15 + $0x30] sm:$0xff] }
  0x56   : > { %7749 = vst [vmem:[#allocation6_spill] sm:$0xff] %v5390_v0  ;;  %7750 = vst [vmem:[#allocation7_spill] sm:$0xff] %v5393_v1  ;;  %v5396_v2 = vld [vmem:[%s5369_s15] sm:$0xff]  ;;  %v584_v3 = vadd.f32 %v5393_v1, %v5390_v0  ;;  %v5401_v4 = vld [vmem:[%s5369_s15 + $0x8] sm:$0xff] }
  0x57   : > { %7751 = vst [vmem:[#allocation8_spill] sm:$0xff] %v5396_v2  ;;  %v5407_v6 = vld [vmem:[%s5369_s15 + $0x38] sm:$0xff]  ;;  %v578_v7 = vadd.f32 %v5401_v4, %v5396_v2  ;;  %v5412_v8 = vld [vmem:[%s5369_s15 + $0x10] sm:$0xff]  ;;  %v5428_v14 = vld [vmem:[%s5369_s15 + $0x40] sm:$0xff] }
  0x58   : > { %7752 = vst [vmem:[#allocation9_spill] sm:$0xff] %v5407_v6  ;;  %7753 = vst [vmem:[#allocation10_spill] sm:$0xff] %v5412_v8  ;;  %v5415_v9 = vld [vmem:[%s5369_s15 + $0x18] sm:$0xff]  ;;  %585 = vadd.xlane.f32.xlu1 %v584_v3  ;;  %v587_v10 = vadd.f32 %v5407_v6, %v5404_v5  ;;  %v5422_v12 = vld [vmem:[%s5369_s15 + $0x50] sm:$0xff] }
  0x59   : > { %7754 = vst [vmem:[#allocation11_spill] sm:$0xff] %v5415_v9  ;;  %579 = vadd.xlane.f32.xlu0 %v578_v7  ;;  %v581_v11 = vadd.f32 %v5415_v9, %v5412_v8  ;;  %7755 = vst [vmem:[#allocation12_spill] sm:$0xff] %v5422_v12  ;;  %v5425_v13 = vld [vmem:[%s5369_s15 + $0x58] sm:$0xff]  ;;  %v5431_v15 = vld [vmem:[%s5369_s15 + $0x48] sm:$0xff] }
  0x5a   : > { %7756 = vst [vmem:[#allocation13_spill] sm:$0xff] %v5428_v14  ;;  %7757 = vst [vmem:[#allocation14_spill] sm:$0xff] %v5431_v15  ;;  %v593_v16 = vadd.f32 %v5425_v13, %v5422_v12  ;;  %v590_v17 = vadd.f32 %v5431_v15, %v5428_v14  ;;  %v5438_v18 = vld [vmem:[%s5369_s15 + $0x70] sm:$0xff]  ;;  %v5441_v19 = vld [vmem:[%s5369_s15 + $0x78] sm:$0xff] }
  0x5b   : > { %7758 = vst [vmem:[#allocation15_spill] sm:$0xff] %v5438_v18  ;;  %7759 = vst [vmem:[#allocation16_spill] sm:$0xff] %v5441_v19  ;;  %v5444_v20 = vld [vmem:[%s5369_s15 + $0x60] sm:$0xff]  ;;  %v5447_v21 = vld [vmem:[%s5369_s15 + $0x68] sm:$0xff]  ;;  %v599_v22 = vadd.f32 %v5441_v19, %v5438_v18 }
  0x5c   : > { %588 = vadd.xlane.f32.xlu1 %v587_v10  ;;  %7760 = vst [vmem:[#allocation17_spill] sm:$0xff] %v5444_v20  ;;  %v596_v23 = vadd.f32 %v5447_v21, %v5444_v20  ;;  %v5454_v24 = vld [vmem:[%s5369_s15 + $0x90] sm:$0xff]  ;;  %v5457_v25 = vld [vmem:[%s5369_s15 + $0x98] sm:$0xff]  ;;  %v5460_v26 = vld [vmem:[%s5369_s15 + $0x80] sm:$0xff] }
  0x5d   : > { %582 = vadd.xlane.f32.xlu0 %v581_v11  ;;  %7761 = vst [vmem:[#allocation18_spill] sm:$0xff] %v5454_v24  ;;  %7762 = vst [vmem:[#allocation19_spill] sm:$0xff] %v5460_v26  ;;  %v5463_v27 = vld [vmem:[%s5369_s15 + $0x88] sm:$0xff]  ;;  %v605_v28 = vadd.f32 %v5457_v25, %v5454_v24  ;;  %v5470_v30 = vld [vmem:[%s5369_s15 + $0xb0] sm:$0xff] }
  0x5e   : > { %7763 = vst [vmem:[#allocation20_spill] sm:$0xff] %v5463_v27  ;;  %v602_v29 = vadd.f32 %v5463_v27, %v5460_v26  ;;  %7764 = vst [vmem:[#allocation21_spill] sm:$0xff] %v5470_v30  ;;  %v5473_v31 = vld [vmem:[%s5369_s15 + $0xb8] sm:$0xff]  ;;  %v5476_v32 = vld [vmem:[%s5369_s15 + $0xa0] sm:$0xff] }
  0x5f   : > { %7765 = vst [vmem:[#allocation22_spill] sm:$0xff] %v5473_v31  ;;  %7766 = vst [vmem:[#allocation23_spill] sm:$0xff] %v5476_v32  ;;  %v5479_v33 = vld [vmem:[%s5369_s15 + $0xa8] sm:$0xff]  ;;  %v611_v34 = vadd.f32 %v5473_v31, %v5470_v30  ;;  %v5486_v36 = vld [vmem:[%s5369_s15 + $0xd0] sm:$0xff] }
  0x60   : > { %594 = vadd.xlane.f32.xlu1 %v593_v16  ;;  %7767 = vst [vmem:[#allocation24_spill] sm:$0xff] %v5479_v33  ;;  %v608_v35 = vadd.f32 %v5479_v33, %v5476_v32  ;;  %7768 = vst [vmem:[#allocation25_spill] sm:$0xff] %v5486_v36  ;;  %v5489_v37 = vld [vmem:[%s5369_s15 + $0xd8] sm:$0xff]  ;;  %v5492_v38 = vld [vmem:[%s5369_s15 + $0xc0] sm:$0xff] }
  0x61   : > { %591 = vadd.xlane.f32.xlu0 %v590_v17  ;;  %7769 = vst [vmem:[#allocation26_spill] sm:$0xff] %v5489_v37  ;;  %7770 = vst [vmem:[#allocation27_spill] sm:$0xff] %v5492_v38  ;;  %v5495_v39 = vld [vmem:[%s5369_s15 + $0xc8] sm:$0xff]  ;;  %v617_v40 = vadd.f32 %v5489_v37, %v5486_v36  ;;  %v5502_v42 = vld [vmem:[%s5369_s15 + $0xf0] sm:$0xff] }
  0x62   : > { %7771 = vst [vmem:[#allocation28_spill] sm:$0xff] %v5495_v39  ;;  %v614_v41 = vadd.f32 %v5495_v39, %v5492_v38  ;;  %7772 = vst [vmem:[#allocation29_spill] sm:$0xff] %v5502_v42  ;;  %v5505_v43 = vld [vmem:[%s5369_s15 + $0xf8] sm:$0xff]  ;;  %v5508_v44 = vld [vmem:[%s5369_s15 + $0xe0] sm:$0xff] }
  0x63   : > { %7773 = vst [vmem:[#allocation30_spill] sm:$0xff] %v5505_v43  ;;  %7774 = vst [vmem:[#allocation31_spill] sm:$0xff] %v5508_v44  ;;  %v5511_v45 = vld [vmem:[%s5369_s15 + $0xe8] sm:$0xff]  ;;  %v623_v46 = vadd.f32 %v5505_v43, %v5502_v42  ;;  %v5518_v48 = vld [vmem:[%s5369_s15 + $0x110] sm:$0xff] }
  0x64   : > { %600 = vadd.xlane.f32.xlu1 %v599_v22  ;;  %7775 = vst [vmem:[#allocation32_spill] sm:$0xff] %v5511_v45  ;;  %v620_v47 = vadd.f32 %v5511_v45, %v5508_v44  ;;  %7776 = vst [vmem:[#allocation33_spill] sm:$0xff] %v5518_v48  ;;  %v5521_v49 = vld [vmem:[%s5369_s15 + $0x118] sm:$0xff]  ;;  %v5524_v50 = vld [vmem:[%s5369_s15 + $0x100] sm:$0xff] }
  0x65   : > { %597 = vadd.xlane.f32.xlu0 %v596_v23  ;;  %7777 = vst [vmem:[#allocation34_spill] sm:$0xff] %v5521_v49  ;;  %7778 = vst [vmem:[#allocation35_spill] sm:$0xff] %v5524_v50  ;;  %v5527_v51 = vld [vmem:[%s5369_s15 + $0x108] sm:$0xff]  ;;  %v629_v52 = vadd.f32 %v5521_v49, %v5518_v48  ;;  %v5534_v54 = vld [vmem:[%s5369_s15 + $0x130] sm:$0xff] }
  0x66   : > { %7779 = vst [vmem:[#allocation36_spill] sm:$0xff] %v5527_v51  ;;  %v626_v53 = vadd.f32 %v5527_v51, %v5524_v50  ;;  %7780 = vst [vmem:[#allocation37_spill] sm:$0xff] %v5534_v54  ;;  %v5537_v55 = vld [vmem:[%s5369_s15 + $0x138] sm:$0xff]  ;;  %v5540_v56 = vld [vmem:[%s5369_s15 + $0x120] sm:$0xff] }
  0x67   : > { %7781 = vst [vmem:[#allocation38_spill] sm:$0xff] %v5537_v55  ;;  %7782 = vst [vmem:[#allocation39_spill] sm:$0xff] %v5540_v56  ;;  %v5543_v57 = vld [vmem:[%s5369_s15 + $0x128] sm:$0xff]  ;;  %v635_v58 = vadd.f32 %v5537_v55, %v5534_v54  ;;  %v5550_v60 = vld [vmem:[%s5369_s15 + $0x150] sm:$0xff] }
  0x68   : > { %606 = vadd.xlane.f32.xlu1 %v605_v28  ;;  %7783 = vst [vmem:[#allocation40_spill] sm:$0xff] %v5543_v57  ;;  %v632_v59 = vadd.f32 %v5543_v57, %v5540_v56  ;;  %7784 = vst [vmem:[#allocation41_spill] sm:$0xff] %v5550_v60  ;;  %v5553_v61 = vld [vmem:[%s5369_s15 + $0x158] sm:$0xff]  ;;  %v5556_v62 = vld [vmem:[%s5369_s15 + $0x140] sm:$0xff] }
  0x69   : > { %603 = vadd.xlane.f32.xlu0 %v602_v29  ;;  %7785 = vst [vmem:[#allocation42_spill] sm:$0xff] %v5553_v61  ;;  %7786 = vst [vmem:[#allocation43_spill] sm:$0xff] %v5556_v62  ;;  %v5559_v63 = vld [vmem:[%s5369_s15 + $0x148] sm:$0xff]  ;;  %v641_v3 = vadd.f32 %v5553_v61, %v5550_v60  ;;  %v5566_v10 = vld [vmem:[%s5369_s15 + $0x170] sm:$0xff] }
  0x6a   : > { %7787 = vst [vmem:[#allocation44_spill] sm:$0xff] %v5559_v63  ;;  %v638_v7 = vadd.f32 %v5559_v63, %v5556_v62  ;;  %7788 = vst [vmem:[#allocation45_spill] sm:$0xff] %v5566_v10  ;;  %v5569_v11 = vld [vmem:[%s5369_s15 + $0x178] sm:$0xff]  ;;  %v5572_v16 = vld [vmem:[%s5369_s15 + $0x160] sm:$0xff] }
  0x6b   : > { %7789 = vst [vmem:[#allocation46_spill] sm:$0xff] %v5569_v11  ;;  %7790 = vst [vmem:[#allocation47_spill] sm:$0xff] %v5572_v16  ;;  %v5575_v17 = vld [vmem:[%s5369_s15 + $0x168] sm:$0xff]  ;;  %v647_v22 = vadd.f32 %v5569_v11, %v5566_v10  ;;  %v5582_v28 = vld [vmem:[%s5369_s15 + $0x190] sm:$0xff] }
  0x6c   : > { %612 = vadd.xlane.f32.xlu1 %v611_v34  ;;  %7791 = vst [vmem:[#allocation48_spill] sm:$0xff] %v5575_v17  ;;  %v644_v23 = vadd.f32 %v5575_v17, %v5572_v16  ;;  %7792 = vst [vmem:[#allocation49_spill] sm:$0xff] %v5582_v28  ;;  %v5585_v29 = vld [vmem:[%s5369_s15 + $0x198] sm:$0xff]  ;;  %v5588_v34 = vld [vmem:[%s5369_s15 + $0x180] sm:$0xff] }
  0x6d   : > { %609 = vadd.xlane.f32.xlu0 %v608_v35  ;;  %7793 = vst [vmem:[#allocation50_spill] sm:$0xff] %v5585_v29  ;;  %7794 = vst [vmem:[#allocation51_spill] sm:$0xff] %v5588_v34  ;;  %v5591_v35 = vld [vmem:[%s5369_s15 + $0x188] sm:$0xff] }
  0x6e   : > { %7795 = vst [vmem:[#allocation52_spill] sm:$0xff] %v5591_v35 }
  0x70   : > { %618 = vadd.xlane.f32.xlu1 %v617_v40  ;;  %v653_v40 = vadd.f32 %v5585_v29, %v5582_v28 }
  0x71   : > { %615 = vadd.xlane.f32.xlu0 %v614_v41  ;;  %v650_v41 = vadd.f32 %v5591_v35, %v5588_v34 }
  0x74   : > { %624 = vadd.xlane.f32.xlu1 %v623_v46  ;;  %v5598_v46 = vld [vmem:[%s5369_s15 + $0x1b0] sm:$0xff] }
  0x75   : > { %621 = vadd.xlane.f32.xlu0 %v620_v47  ;;  %7796 = vst [vmem:[#allocation53_spill] sm:$0xff] %v5598_v46  ;;  %v5601_v47 = vld [vmem:[%s5369_s15 + $0x1b8] sm:$0xff] }
  0x76   : > { %7797 = vst [vmem:[#allocation54_spill] sm:$0xff] %v5601_v47 }
  0x78   : > { %630 = vadd.xlane.f32.xlu1 %v629_v52  ;;  %v5604_v52 = vld [vmem:[%s5369_s15 + $0x1a0] sm:$0xff] }
  0x79   : > { %627 = vadd.xlane.f32.xlu0 %v626_v53  ;;  %7798 = vst [vmem:[#allocation55_spill] sm:$0xff] %v5604_v52  ;;  %v5607_v53 = vld [vmem:[%s5369_s15 + $0x1a8] sm:$0xff] }
  0x7a   : > { %7799 = vst [vmem:[#allocation56_spill] sm:$0xff] %v5607_v53 }
  0x7c   : > { %636 = vadd.xlane.f32.xlu1 %v635_v58  ;;  %v659_v58 = vadd.f32 %v5601_v47, %v5598_v46  ;;  %v5633_v47 = vld [vmem:[%s5369_s15 + $0x1f8] sm:$0xff] }
  0x7d   : > { %633 = vadd.xlane.f32.xlu0 %v632_v59  ;;  %v656_v59 = vadd.f32 %v5607_v53, %v5604_v52  ;;  %7803 = vst [vmem:[#allocation60_spill] sm:$0xff] %v5633_v47  ;;  %v5636_v53 = vld [vmem:[%s5369_s15 + $0x1e0] sm:$0xff]  ;;  %v5639_v52 = vld [vmem:[%s5369_s15 + $0x1e8] sm:$0xff] }
  0x7e   : > { %7804 = vst [vmem:[#allocation61_spill] sm:$0xff] %v5639_v52 }
  0x80   : > { %642 = vadd.xlane.f32.xlu1 %v641_v3  ;;  %v5614_v3 = vld [vmem:[%s5369_s15 + $0x1d0] sm:$0xff] }
  0x81   : > { %639 = vadd.xlane.f32.xlu0 %v638_v7  ;;  %v5617_v7 = vld [vmem:[%s5369_s15 + $0x1d8] sm:$0xff] }
  0x82   : > { %7800 = vst [vmem:[#allocation57_spill] sm:$0xff] %v5617_v7  ;;  %v665_v35 = vadd.f32 %v5617_v7, %v5614_v3  ;;  %v675_v7 = vmul.f32 %v5401_v4, %v5401_v4 }
  0x84   : > { %648 = vadd.xlane.f32.xlu1 %v647_v22  ;;  %v5620_v22 = vld [vmem:[%s5369_s15 + $0x1c0] sm:$0xff] }
  0x85   : > { %645 = vadd.xlane.f32.xlu0 %v644_v23  ;;  %7801 = vst [vmem:[#allocation58_spill] sm:$0xff] %v5620_v22  ;;  %v5623_v23 = vld [vmem:[%s5369_s15 + $0x1c8] sm:$0xff] }
  0x86   : > { %7802 = vst [vmem:[#allocation59_spill] sm:$0xff] %v5623_v23 }
  0x88   : > { %654 = vadd.xlane.f32.xlu1 %v653_v40  ;;  %v662_v40 = vadd.f32 %v5623_v23, %v5620_v22  ;;  %v668_v23 = vadd.f32 %v5639_v52, %v5636_v53  ;;  %v674_v22 = vmul.f32 %v5396_v2, %v5396_v2  ;;  %v679_v52 = vmul.f32 %v5393_v1, %v5393_v1 }
  0x89   : > { %651 = vadd.xlane.f32.xlu0 %v650_v41  ;;  %v5630_v41 = vld [vmem:[%s5369_s15 + $0x1f0] sm:$0xff] }
  0x8a   : > { %v671_v46 = vadd.f32 %v5633_v47, %v5630_v41  ;;  %v680_v47 = vmul.f32 %v5404_v5, %v5404_v5 }
  0x8c   : > { %660 = vadd.xlane.f32.xlu1 %v659_v58  ;;  %v676_v58 = vmul.f32 %v5412_v8, %v5412_v8  ;;  %v681_v8 = vmul.f32 %v5407_v6, %v5407_v6 }
  0x8d   : > { %657 = vadd.xlane.f32.xlu0 %v656_v59  ;;  %v677_v59 = vmul.f32 %v5415_v9, %v5415_v9  ;;  %v738_v9 = vadd.f32 %v675_v7, %v674_v22  ;;  %v683_v7 = vmul.f32 %v5431_v15, %v5431_v15 }
  0x8e   : > { %v747_v2 = vadd.f32 %v681_v8, %v680_v47  ;;  %v689_v8 = vmul.f32 %v5441_v19, %v5441_v19 }
  0x90   : > { %666 = vadd.xlane.f32.xlu1 %v665_v35  ;;  %v741_v35 = vadd.f32 %v677_v59, %v676_v58  ;;  %v685_v58 = vmul.f32 %v5425_v13, %v5425_v13 }
  0x91   : > { %663 = vadd.xlane.f32.xlu0 %v662_v40  ;;  %v678_v40 = vmul.f32 %v5390_v0, %v5390_v0 }
  0x93   : > { %v744_v59 = vadd.f32 %v679_v52, %v678_v40  ;;  %v687_v52 = vmul.f32 %v5447_v21, %v5447_v21 }
  0x94   : > { %672 = vadd.xlane.f32.xlu1 %v671_v46  ;;  %v684_v46 = vmul.f32 %v5422_v12, %v5422_v12 }
  0x95   : > { %669 = vadd.xlane.f32.xlu0 %v668_v23  ;;  %v682_v23 = vmul.f32 %v5428_v14, %v5428_v14 }
  0x96   : > { %v753_v22 = vadd.f32 %v685_v58, %v684_v46  ;;  %v693_v46 = vmul.f32 %v5457_v25, %v5457_v25 }
  0x97   : > { %v750_v47 = vadd.f32 %v683_v7, %v682_v23  ;;  %v691_v23 = vmul.f32 %v5463_v27, %v5463_v27 }
  0x98   : > { %742 = vadd.xlane.f32.xlu1 %v741_v35  ;;  %v688_v35 = vmul.f32 %v5438_v18, %v5438_v18 }
  0x99   : > { %739 = vadd.xlane.f32.xlu0 %v738_v9  ;;  %v686_v9 = vmul.f32 %v5444_v20, %v5444_v20 }
  0x9a   : > { %v759_v40 = vadd.f32 %v689_v8, %v688_v35  ;;  %v697_v35 = vmul.f32 %v5473_v31, %v5473_v31 }
  0x9b   : > { %v756_v58 = vadd.f32 %v687_v52, %v686_v9  ;;  %v695_v9 = vmul.f32 %v5479_v33, %v5479_v33 }
  0x9c   : > { %748 = vadd.xlane.f32.xlu1 %v747_v2  ;;  %v692_v2 = vmul.f32 %v5454_v24, %v5454_v24 }
  0x9d   : > { %745 = vadd.xlane.f32.xlu0 %v744_v59  ;;  %v690_v59 = vmul.f32 %v5460_v26, %v5460_v26 }
  0x9e   : > { %v765_v7 = vadd.f32 %v693_v46, %v692_v2  ;;  %v701_v2 = vmul.f32 %v5489_v37, %v5489_v37 }
  0x9f   : > { %v762_v8 = vadd.f32 %v691_v23, %v690_v59  ;;  %v699_v59 = vmul.f32 %v5495_v39, %v5495_v39 }
  0xa0   : > { %754 = vadd.xlane.f32.xlu1 %v753_v22  ;;  %v696_v22 = vmul.f32 %v5470_v30, %v5470_v30 }
  0xa1   : > { %751 = vadd.xlane.f32.xlu0 %v750_v47  ;;  %v694_v47 = vmul.f32 %v5476_v32, %v5476_v32 }
  0xa2   : > { %v771_v52 = vadd.f32 %v697_v35, %v696_v22  ;;  %v705_v22 = vmul.f32 %v5505_v43, %v5505_v43 }
  0xa3   : > { %v768_v46 = vadd.f32 %v695_v9, %v694_v47  ;;  %v703_v47 = vmul.f32 %v5511_v45, %v5511_v45 }
  0xa4   : > { %760 = vadd.xlane.f32.xlu1 %v759_v40  ;;  %v700_v40 = vmul.f32 %v5486_v36, %v5486_v36 }
  0xa5   : > { %757 = vadd.xlane.f32.xlu0 %v756_v58  ;;  %v698_v58 = vmul.f32 %v5492_v38, %v5492_v38 }
  0xa6   : > { %v777_v23 = vadd.f32 %v701_v2, %v700_v40  ;;  %v709_v40 = vmul.f32 %v5521_v49, %v5521_v49 }
  0xa7   : > { %v774_v35 = vadd.f32 %v699_v59, %v698_v58  ;;  %v707_v58 = vmul.f32 %v5527_v51, %v5527_v51 }
  0xa8   : > { %766 = vadd.xlane.f32.xlu1 %v765_v7  ;;  %v704_v7 = vmul.f32 %v5502_v42, %v5502_v42 }
  0xa9   : > { %763 = vadd.xlane.f32.xlu0 %v762_v8  ;;  %v702_v8 = vmul.f32 %v5508_v44, %v5508_v44 }
  0xaa   : > { %v783_v9 = vadd.f32 %v705_v22, %v704_v7  ;;  %v713_v7 = vmul.f32 %v5537_v55, %v5537_v55 }
  0xab   : > { %v780_v2 = vadd.f32 %v703_v47, %v702_v8  ;;  %v711_v8 = vmul.f32 %v5543_v57, %v5543_v57  ;;  %v1186_v57 = vld [vmem:[%s7622_s1] sm:$0x3] }
  0xac   : > { %772 = vadd.xlane.f32.xlu1 %v771_v52  ;;  %v708_v52 = vmul.f32 %v5518_v48, %v5518_v48 }
  0xad   : > { %769 = vadd.xlane.f32.xlu0 %v768_v46  ;;  %v706_v46 = vmul.f32 %v5524_v50, %v5524_v50 }
  0xae   : > { %v789_v59 = vadd.f32 %v709_v40, %v708_v52  ;;  %v717_v52 = vmul.f32 %v5553_v61, %v5553_v61 }
  0xaf   : > { %v786_v22 = vadd.f32 %v707_v58, %v706_v46  ;;  %v715_v46 = vmul.f32 %v5559_v63, %v5559_v63 }
  0xb0   : > { %778 = vadd.xlane.f32.xlu1 %v777_v23  ;;  %v712_v23 = vmul.f32 %v5534_v54, %v5534_v54 }
  0xb1   : > { %775 = vadd.xlane.f32.xlu0 %v774_v35  ;;  %v710_v35 = vmul.f32 %v5540_v56, %v5540_v56  ;;  %v1262_v56 = vld [vmem:[%s7623_s2] sm:$0x3] }
  0xb2   : > { %v795_v47 = vadd.f32 %v713_v7, %v712_v23  ;;  %v721_v23 = vmul.f32 %v5569_v11, %v5569_v11  ;;  %v7806_v11 = vld [vmem:[#allocation53_spill] sm:$0xff] }
  0xb3   : > { %v792_v40 = vadd.f32 %v711_v8, %v710_v35  ;;  %v719_v35 = vmul.f32 %v5575_v17, %v5575_v17  ;;  %v7808_v17 = vld [vmem:[#allocation55_spill] sm:$0xff] }
  0xb4   : > { %784 = vadd.xlane.f32.xlu1 %v783_v9  ;;  %v716_v9 = vmul.f32 %v5550_v60, %v5550_v60 }
  0xb5   : > { %781 = vadd.xlane.f32.xlu0 %v780_v2  ;;  %v714_v2 = vmul.f32 %v5556_v62, %v5556_v62 }
  0xb6   : > { %v801_v58 = vadd.f32 %v717_v52, %v716_v9  ;;  %v725_v9 = vmul.f32 %v5585_v29, %v5585_v29 }
  0xb7   : > { %v798_v7 = vadd.f32 %v715_v46, %v714_v2  ;;  %v7805_v2 = vld [vmem:[#allocation52_spill] sm:$0xff] }
  0xb8   : > { %790 = vadd.xlane.f32.xlu1 %v789_v59  ;;  %v720_v59 = vmul.f32 %v5566_v10, %v5566_v10  ;;  %v723_v46 = vmul.f32 %v7805_v2, %v7805_v2  ;;  %v7811_v2 = vld [vmem:[#allocation58_spill] sm:$0xff] }
  0xb9   : > { %787 = vadd.xlane.f32.xlu0 %v786_v22  ;;  %v718_v22 = vmul.f32 %v5572_v16, %v5572_v16 }
  0xba   : > { %v807_v8 = vadd.f32 %v721_v23, %v720_v59  ;;  %v7807_v59 = vld [vmem:[#allocation54_spill] sm:$0xff] }
  0xbb   : > { %v804_v52 = vadd.f32 %v719_v35, %v718_v22  ;;  %v729_v23 = vmul.f32 %v7807_v59, %v7807_v59  ;;  %v7809_v22 = vld [vmem:[#allocation56_spill] sm:$0xff] }
  0xbc   : > { %796 = vadd.xlane.f32.xlu1 %v795_v47  ;;  %v724_v47 = vmul.f32 %v5582_v28, %v5582_v28  ;;  %v727_v35 = vmul.f32 %v7809_v22, %v7809_v22 }
  0xbd   : > { %793 = vadd.xlane.f32.xlu0 %v792_v40  ;;  %v722_v40 = vmul.f32 %v5588_v34, %v5588_v34 }
  0xbe   : > { %v813_v16 = vadd.f32 %v725_v9, %v724_v47  ;;  %v7810_v47 = vld [vmem:[#allocation57_spill] sm:$0xff] }
  0xbf   : > { %v810_v28 = vadd.f32 %v723_v46, %v722_v40  ;;  %v733_v9 = vmul.f32 %v7810_v47, %v7810_v47  ;;  %v7812_v40 = vld [vmem:[#allocation59_spill] sm:$0xff] }
  0xc0   : > { %802 = vadd.xlane.f32.xlu1 %v801_v58  ;;  %v728_v58 = vmul.f32 %v7806_v11, %v7806_v11  ;;  %v731_v46 = vmul.f32 %v7812_v40, %v7812_v40 }
  0xc1   : > { %799 = vadd.xlane.f32.xlu0 %v798_v7  ;;  %v726_v7 = vmul.f32 %v7808_v17, %v7808_v17 }
  0xc2   : > { %v819_v34 = vadd.f32 %v729_v23, %v728_v58  ;;  %v7813_v58 = vld [vmem:[#allocation60_spill] sm:$0xff]  ;;  %v7814_v23 = vld [vmem:[#allocation61_spill] sm:$0xff] }
  0xc3   : > { %v816_v11 = vadd.f32 %v727_v35, %v726_v7  ;;  %v737_v59 = vmul.f32 %v7813_v58, %v7813_v58  ;;  %v735_v7 = vmul.f32 %v7814_v23, %v7814_v23 }
  0xc4   : > { %808 = vadd.xlane.f32.xlu1 %v807_v8  ;;  %v732_v8 = vmul.f32 %v5614_v3, %v5614_v3 }
  0xc5   : > { %805 = vadd.xlane.f32.xlu0 %v804_v52  ;;  %v730_v52 = vmul.f32 %v7811_v2, %v7811_v2 }
  0xc6   : > { %v825_v17 = vadd.f32 %v733_v9, %v732_v8 }
  0xc7   : > { %v822_v3 = vadd.f32 %v731_v46, %v730_v52 }
  0xc8   : > { %814 = vadd.xlane.f32.xlu1 %v813_v16  ;;  %v736_v16 = vmul.f32 %v5630_v41, %v5630_v41 }
  0xc9   : > { %811 = vadd.xlane.f32.xlu0 %v810_v28  ;;  %v734_v28 = vmul.f32 %v5636_v53, %v5636_v53 }
  0xca   : > { %v831_v2 = vadd.f32 %v737_v59, %v736_v16 }
  0xcb   : > { %v828_v22 = vadd.f32 %v735_v7, %v734_v28  ;;  %v1188_v7 = vlaneseq }
  0xcc   : > { %820 = vadd.xlane.f32.xlu1 %v819_v34 }
  0xcd   : > { %817 = vadd.xlane.f32.xlu0 %v816_v11  ;;  %v1189_v29 = vshrl.u32 %v1188_v7, 7 }
  0xcf   : > { %v1190_v62 = vsub.s32 0, %v1189_v29  ;;  %v1194_v61 = vsub.s32 1, %v1189_v29 }
  0xd0   : > { %826 = vadd.xlane.f32.xlu1 %v825_v17 }
  0xd1   : > { %823 = vadd.xlane.f32.xlu0 %v822_v3  ;;  %v5817_v29 = vrot.slane %v1186_v57, %v1190_v62  ;;  %v5821_v50 = vrot.slane %v1262_v56, %v1190_v62 }
  0xd3   : > { %7820 = vst [vmem:[#allocation58_spill] sm:$0xff] %v5817_v29 }
  0xd4   : > { %832 = vadd.xlane.f32.xlu1 %v831_v2 }
  0xd5   : > { %829 = vadd.xlane.f32.xlu0 %v828_v22 }
  0xe5   : > { %v586_v34 = vpop.xlane.xlu1 %585 }
  0xe6   : > { %v580_v35 = vpop.xlane.xlu0 %579  ;;  %v5799_v60 = vmul.f32 0.00390625, %v586_v34  ;;  %v5819_v34 = vrot.slane %v1186_v57, %v1194_v61 }
  0xe7   : > { %v5807_v55 = vmul.f32 0.00390625, %v580_v35 }
  0xe8   : > { %7817 = vst [vmem:[#allocation55_spill] sm:$0xff] %v5799_v60  ;;  %v5839_v62 = vmul.f32 %v5799_v60, %v5799_v60 }
  0xe9   : > { %v589_v41 = vpop.xlane.xlu1 %588  ;;  %v5851_v35 = vmul.f32 %v5807_v55, %v5807_v55 }
  0xea   : > { %v583_v8 = vpop.xlane.xlu0 %582  ;;  %v5809_v54 = vmul.f32 0.00390625, %v589_v41 }
  0xeb   : > { %v5813_v51 = vmul.f32 0.00390625, %v583_v8  ;;  %v7821_v8 = vld [vmem:[#allocation8_spill] sm:$0xff] }
  0xec   : > { %7818 = vst [vmem:[#allocation56_spill] sm:$0xff] %v5809_v54  ;;  %v5861_v49 = vmul.f32 %v5809_v54, %v5809_v54 }
  0xed   : > { %v595_v47 = vpop.xlane.xlu1 %594  ;;  %v5871_v6 = vmul.f32 %v5813_v51, %v5813_v51 }
  0xee   : > { %v592_v9 = vpop.xlane.xlu0 %591  ;;  %v5827_v41 = vmul.f32 0.00390625, %v595_v47 }
  0xef   : > { %v5835_v57 = vmul.f32 0.00390625, %v592_v9  ;;  %v7822_v9 = vld [vmem:[#allocation10_spill] sm:$0xff] }
  0xf0   : > { %v5946_v29 = vmul.f32 %v5827_v41, %v5827_v41 }
  0xf1   : > { %v601_v11 = vpop.xlane.xlu1 %600  ;;  %v5959_v60 = vmul.f32 %v5835_v57, %v5835_v57 }
  0xf2   : > { %v598_v52 = vpop.xlane.xlu0 %597 }
  0xf5   : > { %v607_v40 = vpop.xlane.xlu1 %606 }
  0xf6   : > { %v5773_v46 = vpop.xlane.xlu0 %603  ;;  %v5867_v0 = vmul.f32 0.00390625, %v607_v40 }
  0xf7   : > { %v5942_v47 = vmul.f32 0.00390625, %v5773_v46 }
  0xf8   : > { %v5994_v54 = vmul.f32 %v5867_v0, %v5867_v0 }
  0xf9   : > { %v5775_v53 = vpop.xlane.xlu1 %612  ;;  %v6007_v20 = vmul.f32 %v5942_v47, %v5942_v47 }
  0xfa   : > { %v5777_v58 = vpop.xlane.xlu0 %609 }
  0xfb   : > { %v5966_v12 = vmul.f32 0.00390625, %v5777_v58 }
  0xfd   : > { %v5779_v17 = vpop.xlane.xlu1 %618  ;;  %7825 = vst [vmem:[#allocation60_spill] sm:$0xff] %v5966_v12  ;;  %v6031_v26 = vmul.f32 %v5966_v12, %v5966_v12 }
  0xfe   : > { %v5781_v16 = vpop.xlane.xlu0 %615  ;;  %v5979_v46 = vmul.f32 0.00390625, %v5779_v17 }
  0xff   : > { %v5990_v19 = vmul.f32 0.00390625, %v5781_v16 }
 0x100   : > { %7826 = vst [vmem:[#allocation61_spill] sm:$0xff] %v5979_v46  ;;  %v6042_v18 = vmul.f32 %v5979_v46, %v5979_v46 }
 0x101   : > { %v5783_v59 = vpop.xlane.xlu1 %624  ;;  %7827 = vst [vmem:[#allocation8_spill] sm:$0xff] %v5990_v19  ;;  %v6055_v32 = vmul.f32 %v5990_v19, %v5990_v19 }
 0x102   : > { %v5785_v3 = vpop.xlane.xlu0 %621  ;;  %v6001_v24 = vmul.f32 0.00390625, %v5783_v59 }
 0x103   : > { %v6014_v17 = vmul.f32 0.00390625, %v5785_v3 }
 0x104   : > { %7828 = vst [vmem:[#allocation10_spill] sm:$0xff] %v6001_v24 }
 0x105   : > { %v5787_v28 = vpop.xlane.xlu1 %630  ;;  %v6079_v38 = vmul.f32 %v6014_v17, %v6014_v17 }
 0x106   : > { %v5789_v23 = vpop.xlane.xlu0 %627  ;;  %v6027_v16 = vmul.f32 0.00390625, %v5787_v28 }
 0x107   : > { %v6038_v31 = vmul.f32 0.00390625, %v5789_v23 }
 0x108   : > { %7830 = vst [vmem:[#allocation62_spill] sm:$0xff] %v6027_v16  ;;  %v6089_v30 = vmul.f32 %v6027_v16, %v6027_v16 }
 0x109   : > { %v5791_v2 = vpop.xlane.xlu1 %636  ;;  %7831 = vst [vmem:[#allocation63_spill] sm:$0xff] %v6038_v31 }
 0x10a   : > { %v5793_v22 = vpop.xlane.xlu0 %633  ;;  %v6049_v36 = vmul.f32 0.00390625, %v5791_v2  ;;  %v6068_v2 = vmul.f32 %v6001_v24, %v6001_v24  ;;  %v6100_v24 = vmul.f32 %v6038_v31, %v6038_v31 }
 0x10b   : > { %v6062_v28 = vmul.f32 0.00390625, %v5793_v22 }
 0x10c   : > { %7832 = vst [vmem:[#allocation64_spill] sm:$0xff] %v6049_v36  ;;  %v6109_v42 = vmul.f32 %v6049_v36, %v6049_v36 }
 0x10d   : > { %v5795_v10 = vpop.xlane.xlu1 %642  ;;  %7833 = vst [vmem:[#allocation65_spill] sm:$0xff] %v6062_v28 }
 0x10e   : > { %7815 = vst [vmem:[#allocation53_spill] sm:$0xff] %v5795_v10  ;;  %v5797_v63 = vpop.xlane.xlu0 %639  ;;  %v5829_v10 = vrot.slane %v1262_v56, %v1194_v61  ;;  %v5845_v56 = vmul.f32 0.00390625, %v601_v11  ;;  %v7823_v11 = vld [vmem:[#allocation11_spill] sm:$0xff] }
 0x10f   : > { %7816 = vst [vmem:[#allocation54_spill] sm:$0xff] %v5797_v63  ;;  %7829 = vst [vmem:[#allocation11_spill] sm:$0xff] %v6014_v17 }
 0x111   : > { %v5811_v7 = vpop.xlane.xlu1 %648 }
 0x112   : > { %7819 = vst [vmem:[#allocation57_spill] sm:$0xff] %v5811_v7  ;;  %v5815_v63 = vpop.xlane.xlu0 %645  ;;  %v5855_v7 = vmul.f32 0.00390625, %v598_v52  ;;  %v5130_v52 = vmov 0.0  }
 0x113   : > { %1402 = vst [vmem:[#allocation3] sm:$0xff] %v5130_v52  ;;  %1403 = vst [vmem:[#allocation3 + $0x8] sm:$0xff] %v5130_v52 }
 0x114   : > { %1404 = vst [vmem:[#allocation3 + $0x10] sm:$0xff] %v5130_v52  ;;  %1405 = vst [vmem:[#allocation3 + $0x18] sm:$0xff] %v5130_v52  ;;  %v5983_v14 = vmul.f32 %v5855_v7, %v5855_v7 }
 0x115   : > { %v5847_v61 = vpop.xlane.xlu1 %654  ;;  %1406 = vst [vmem:[#allocation3 + $0x20] sm:$0xff] %v5130_v52  ;;  %1407 = vst [vmem:[#allocation3 + $0x28] sm:$0xff] %v5130_v52  ;;  %v7834_v19 = vld [vmem:[#allocation53_spill] sm:$0xff] }
 0x116   : > { %v5857_v1 = vpop.xlane.xlu0 %651  ;;  %1408 = vst [vmem:[#allocation3 + $0x30] sm:$0xff] %v5130_v52  ;;  %1409 = vst [vmem:[#allocation3 + $0x38] sm:$0xff] %v5130_v52  ;;  %v6075_v23 = vmul.f32 0.00390625, %v7834_v19  ;;  %v7841_v17 = vld [vmem:[#allocation54_spill] sm:$0xff] }
 0x117   : > { %1410 = vst [vmem:[#allocation3 + $0x40] sm:$0xff] %v5130_v52  ;;  %1411 = vst [vmem:[#allocation3 + $0x48] sm:$0xff] %v5130_v52  ;;  %v6096_v33 = vmul.f32 0.00390625, %v7841_v17 }
 0x118   : > { %1412 = vst [vmem:[#allocation3 + $0x50] sm:$0xff] %v5130_v52  ;;  %1413 = vst [vmem:[#allocation3 + $0x58] sm:$0xff] %v5130_v52  ;;  %v6127_v36 = vmul.f32 %v6075_v23, %v6075_v23 }
 0x119   : > { %1414 = vst [vmem:[#allocation3 + $0x60] sm:$0xff] %v5130_v52  ;;  %1415 = vst [vmem:[#allocation3 + $0x68] sm:$0xff] %v5130_v52  ;;  %v5955_v40 = vpop.xlane.xlu1 %660  ;;  %v7844_v43 = vld [vmem:[#allocation57_spill] sm:$0xff]  ;;  %v6136_v37 = vmul.f32 %v6096_v33, %v6096_v33 }
 0x11a   : > { %1416 = vst [vmem:[#allocation3 + $0x70] sm:$0xff] %v5130_v52  ;;  %1417 = vst [vmem:[#allocation3 + $0x78] sm:$0xff] %v5130_v52  ;;  %v5968_v15 = vpop.xlane.xlu0 %657  ;;  %v6105_v22 = vmul.f32 0.00390625, %v7844_v43 }
 0x11b   : > { %1418 = vst [vmem:[#allocation3 + $0x80] sm:$0xff] %v5130_v52  ;;  %1419 = vst [vmem:[#allocation3 + $0x88] sm:$0xff] %v5130_v52 }
 0x11c   : > { %1420 = vst [vmem:[#allocation3 + $0x90] sm:$0xff] %v5130_v52  ;;  %1421 = vst [vmem:[#allocation3 + $0x98] sm:$0xff] %v5130_v52 }
 0x11d   : > { %1422 = vst [vmem:[#allocation3 + $0xa0] sm:$0xff] %v5130_v52  ;;  %1423 = vst [vmem:[#allocation3 + $0xa8] sm:$0xff] %v5130_v52  ;;  %v6003_v58 = vpop.xlane.xlu1 %666 }
 0x11e   : > { %1424 = vst [vmem:[#allocation3 + $0xb0] sm:$0xff] %v5130_v52  ;;  %1425 = vst [vmem:[#allocation3 + $0xb8] sm:$0xff] %v5130_v52  ;;  %v6016_v27 = vpop.xlane.xlu0 %663 }
 0x11f   : > { %1426 = vst [vmem:[#allocation3 + $0xc0] sm:$0xff] %v5130_v52  ;;  %1427 = vst [vmem:[#allocation3 + $0xc8] sm:$0xff] %v5130_v52 }
 0x120   : > { %1428 = vst [vmem:[#allocation3 + $0xd0] sm:$0xff] %v5130_v52  ;;  %1429 = vst [vmem:[#allocation3 + $0xd8] sm:$0xff] %v5130_v52 }
 0x121   : > { %1430 = vst [vmem:[#allocation3 + $0xe0] sm:$0xff] %v5130_v52  ;;  %1431 = vst [vmem:[#allocation3 + $0xe8] sm:$0xff] %v5130_v52  ;;  %v6051_v3 = vpop.xlane.xlu1 %672 }
 0x122   : > { %1432 = vst [vmem:[#allocation3 + $0xf0] sm:$0xff] %v5130_v52  ;;  %1433 = vst [vmem:[#allocation3 + $0xf8] sm:$0xff] %v5130_v52  ;;  %v6064_v39 = vpop.xlane.xlu0 %669 }
 0x123   : > { %1434 = vst [vmem:[#allocation3 + $0x100] sm:$0xff] %v5130_v52  ;;  %1435 = vst [vmem:[#allocation3 + $0x108] sm:$0xff] %v5130_v52 }
 0x124   : > { %1436 = vst [vmem:[#allocation3 + $0x110] sm:$0xff] %v5130_v52  ;;  %1437 = vst [vmem:[#allocation3 + $0x118] sm:$0xff] %v5130_v52 }
 0x125   : > { %1438 = vst [vmem:[#allocation3 + $0x120] sm:$0xff] %v5130_v52  ;;  %1439 = vst [vmem:[#allocation3 + $0x128] sm:$0xff] %v5130_v52  ;;  %v743_v44 = vpop.xlane.xlu1 %742 }
 0x126   : > { %1440 = vst [vmem:[#allocation3 + $0x130] sm:$0xff] %v5130_v52  ;;  %1441 = vst [vmem:[#allocation3 + $0x138] sm:$0xff] %v5130_v52  ;;  %v867_v16 = vmul.f32 0.00390625, %v743_v44  ;;  %v740_v12 = vpop.xlane.xlu0 %739  ;;  %v6122_v44 = vmul.f32 0.00390625, %v5815_v63 }
 0x127   : > { %1442 = vst [vmem:[#allocation3 + $0x140] sm:$0xff] %v5130_v52  ;;  %1443 = vst [vmem:[#allocation3 + $0x148] sm:$0xff] %v5130_v52  ;;  %v866_v31 = vmul.f32 0.00390625, %v740_v12 }
 0x128   : > { %1444 = vst [vmem:[#allocation3 + $0x150] sm:$0xff] %v5130_v52  ;;  %1445 = vst [vmem:[#allocation3 + $0x158] sm:$0xff] %v5130_v52  ;;  %v931_v46 = vsub.f32 %v867_v16, %v5871_v6  ;;  %v6141_v16 = vmul.f32 0.00390625, %v5847_v61  ;;  %v6152_v6 = vmul.f32 0.00390625, %v5857_v1  ;;  %v6160_v45 = vmul.f32 %v6122_v44, %v6122_v44 }
 0x129   : > { %1446 = vst [vmem:[#allocation3 + $0x160] sm:$0xff] %v5130_v52  ;;  %1447 = vst [vmem:[#allocation3 + $0x168] sm:$0xff] %v5130_v52  ;;  %v930_v17 = vsub.f32 %v866_v31, %v5851_v35  ;;  %v6147_v31 = vmul.f32 %v6105_v22, %v6105_v22 }
 0x12a   : > { %1448 = vst [vmem:[#allocation3 + $0x170] sm:$0xff] %v5130_v52  ;;  %1449 = vst [vmem:[#allocation3 + $0x178] sm:$0xff] %v5130_v52  ;;  %v963_v43 = vmax.f32 %v931_v46, 0.0 }
 0x12b   : > { %1450 = vst [vmem:[#allocation3 + $0x180] sm:$0xff] %v5130_v52  ;;  %1451 = vst [vmem:[#allocation3 + $0x188] sm:$0xff] %v5130_v52  ;;  %v962_v48 = vmax.f32 %v930_v17, 0.0 }
 0x12c   : > { %1452 = vst [vmem:[#allocation3 + $0x190] sm:$0xff] %v5130_v52  ;;  %1453 = vst [vmem:[#allocation3 + $0x198] sm:$0xff] %v5130_v52  ;;  %v1059_v61 = vadd.f32 1e-05, %v963_v43 }
 0x12d   : > { %1454 = vst [vmem:[#allocation3 + $0x1a0] sm:$0xff] %v5130_v52  ;;  %1455 = vst [vmem:[#allocation3 + $0x1a8] sm:$0xff] %v5130_v52 }
 0x12e   : > { %1456 = vst [vmem:[#allocation3 + $0x1b0] sm:$0xff] %v5130_v52  ;;  %1457 = vst [vmem:[#allocation3 + $0x1b8] sm:$0xff] %v5130_v52  ;;  %4549 = vrsqrt.f32 %v1059_v61  ;;  %v6174_v61 = vmul.f32 0.00390625, %v5955_v40 }
 0x12f   : > { %1458 = vst [vmem:[#allocation3 + $0x1c0] sm:$0xff] %v5130_v52  ;;  %1459 = vst [vmem:[#allocation3 + $0x1c8] sm:$0xff] %v5130_v52 }
 0x130   : > { %1460 = vst [vmem:[#allocation3 + $0x1d0] sm:$0xff] %v5130_v52  ;;  %1461 = vst [vmem:[#allocation3 + $0x1d8] sm:$0xff] %v5130_v52 }
 0x131   : > { %1462 = vst [vmem:[#allocation3 + $0x1e0] sm:$0xff] %v5130_v52  ;;  %1463 = vst [vmem:[#allocation3 + $0x1e8] sm:$0xff] %v5130_v52 }
 0x132   : > { %1464 = vst [vmem:[#allocation3 + $0x1f0] sm:$0xff] %v5130_v52  ;;  %1465 = vst [vmem:[#allocation3 + $0x1f8] sm:$0xff] %v5130_v52  ;;  %v5953_v52 = vmul.f32 0.00390625, %v5775_v53  ;;  %v5972_v53 = vmul.f32 %v5845_v56, %v5845_v56 }
 0x133   : > { %7835 = vst [vmem:[#allocation53_spill] sm:$0xff] %v6075_v23  ;;  %7842 = vst [vmem:[#allocation54_spill] sm:$0xff] %v6096_v33 }
 0x134   : > { %7824 = vst [vmem:[#allocation59_spill] sm:$0xff] %v5953_v52  ;;  %v6020_v59 = vmul.f32 %v5953_v52, %v5953_v52  ;;  %7845 = vst [vmem:[#allocation57_spill] sm:$0xff] %v6105_v22  ;;  %v6117_v52 = vmul.f32 %v6062_v28, %v6062_v28  ;;  %v749_v28 = vpop.xlane.xlu1 %748  ;;  %v6171_v22 = vmul.f32 %v6141_v16, %v6141_v16 }
 0x135   : > { %7849 = vst [vmem:[#allocation66_spill] sm:$0xff] %v6122_v44  ;;  %7850 = vst [vmem:[#allocation67_spill] sm:$0xff] %v6127_v36  ;;  %v869_v23 = vmul.f32 0.00390625, %v749_v28  ;;  %v746_v36 = vpop.xlane.xlu0 %745 }
 0x136   : > { %7853 = vst [vmem:[#allocation68_spill] sm:$0xff] %v6136_v37  ;;  %7855 = vst [vmem:[#allocation69_spill] sm:$0xff] %v6141_v16  ;;  %v868_v12 = vmul.f32 0.00390625, %v746_v36  ;;  %v1058_v37 = vadd.f32 1e-05, %v962_v48 }
 0x137   : > { %7858 = vst [vmem:[#allocation70_spill] sm:$0xff] %v6152_v6  ;;  %v933_v46 = vsub.f32 %v869_v23, %v5861_v49 }
 0x138   : > { %v932_v17 = vsub.f32 %v868_v12, %v5839_v62  ;;  %v755_v36 = vpop.xlane.xlu1 %754  ;;  %4551 = vrsqrt.f32 %v1058_v37  ;;  %v6184_v12 = vmul.f32 0.00390625, %v6016_v27  ;;  %v6196_v27 = vmul.f32 %v6174_v61, %v6174_v61 }
 0x139   : > { %v965_v1 = vmax.f32 %v933_v46, 0.0  ;;  %v871_v35 = vmul.f32 0.00390625, %v755_v36  ;;  %v752_v43 = vpop.xlane.xlu0 %751  ;;  %v6177_v46 = vmul.f32 0.00390625, %v5968_v15 }
 0x13a   : > { %v964_v63 = vmax.f32 %v932_v17, 0.0  ;;  %v870_v48 = vmul.f32 0.00390625, %v752_v43  ;;  %v6181_v43 = vmul.f32 0.00390625, %v6003_v58  ;;  %7863 = vst [vmem:[#allocation71_spill] sm:$0xff] %v6184_v12  ;;  %v6191_v58 = vmul.f32 %v6152_v6, %v6152_v6 }
 0x13b   : > { %v1061_v28 = vadd.f32 1e-05, %v965_v1  ;;  %v935_v44 = vsub.f32 %v871_v35, %v5946_v29 }
 0x13c   : > { %v1060_v36 = vadd.f32 1e-05, %v964_v63  ;;  %v934_v37 = vsub.f32 %v870_v48, %v5959_v60  ;;  %v761_v17 = vpop.xlane.xlu1 %760 }
 0x13d   : > { %4553 = vrsqrt.f32 %v1061_v28  ;;  %v967_v1 = vmax.f32 %v935_v44, 0.0  ;;  %v873_v29 = vmul.f32 0.00390625, %v761_v17  ;;  %v758_v35 = vpop.xlane.xlu0 %757 }
 0x13e   : > { %4555 = vrsqrt.f32 %v1060_v36  ;;  %v966_v40 = vmax.f32 %v934_v37, 0.0  ;;  %v872_v23 = vmul.f32 0.00390625, %v758_v35  ;;  %v6200_v36 = vmul.f32 %v6177_v46, %v6177_v46  ;;  %v4550_v35 = vpop.eup %4549 }
 0x13f   : > { %v1063_v63 = vadd.f32 1e-05, %v967_v1  ;;  %v937_v60 = vsub.f32 %v873_v29, %v5972_v53  ;;  %v6204_v1 = vmul.f32 %v6181_v43, %v6181_v43 }
 0x140   : > { %v1062_v28 = vadd.f32 1e-05, %v966_v40  ;;  %v936_v44 = vsub.f32 %v872_v23, %v5983_v14  ;;  %v767_v48 = vpop.xlane.xlu1 %766  ;;  %v6208_v23 = vmul.f32 %v6184_v12, %v6184_v12  ;;  %v6211_v40 = vmul.f32 0.00390625, %v6051_v3 }
 0x141   : > { %4557 = vrsqrt.f32 %v1063_v63  ;;  %v969_v37 = vmax.f32 %v937_v60, 0.0  ;;  %v875_v17 = vmul.f32 0.00390625, %v767_v48  ;;  %v764_v53 = vpop.xlane.xlu0 %763  ;;  %v6214_v63 = vmul.f32 0.00390625, %v6064_v39 }
 0x142   : > { %4559 = vrsqrt.f32 %v1062_v28  ;;  %v968_v29 = vmax.f32 %v936_v44, 0.0  ;;  %v874_v14 = vmul.f32 0.00390625, %v764_v53  ;;  %v4552_v33 = vpop.eup %4551  ;;  %v7865_v28 = vsub.f32 %v7822_v9, %v5813_v51 }
 0x143   : > { %v1065_v60 = vadd.f32 1e-05, %v969_v37  ;;  %v939_v48 = vsub.f32 %v875_v17, %v5994_v54  ;;  %v7866_v53 = vsub.f32 %v7823_v11, %v5813_v51  ;;  %v7867_v39 = vsub.f32 %v7821_v8, %v5807_v55 }
 0x144   : > { %v1124_v44 = vmul.f32 %v4550_v35, %v7865_v28  ;;  %v1064_v6 = vadd.f32 1e-05, %v968_v29  ;;  %v938_v62 = vsub.f32 %v874_v14, %v6007_v20  ;;  %v773_v3 = vpop.xlane.xlu1 %772  ;;  %v7868_v54 = vsub.f32 %v5401_v4, %v5807_v55  ;;  %v7869_v28 = vld [vmem:[#allocation58_spill] sm:$0xff]  ;;  %v7870_v55 = vld [vmem:[#allocation56_spill] sm:$0xff] }
 0x145   : > { %v1125_v15 = vmul.f32 %v4550_v35, %v7866_v53  ;;  %v1122_v49 = vmul.f32 %v4552_v33, %v7867_v39  ;;  %4561 = vrsqrt.f32 %v1065_v60  ;;  %v971_v17 = vmax.f32 %v939_v48, 0.0  ;;  %v6230_v9 = vpop.xlane.xlu0 %769 }
 0x146   : > { %v1123_v37 = vmul.f32 %v4552_v33, %v7868_v54  ;;  %v1200_v16 = vmul.f32 %v7869_v28, %v1124_v44  ;;  %4563 = vrsqrt.f32 %v1064_v6  ;;  %v970_v11 = vmax.f32 %v938_v62, 0.0  ;;  %v7872_v44 = vld [vmem:[#allocation9_spill] sm:$0xff]  ;;  %v7875_v54 = vld [vmem:[#allocation55_spill] sm:$0xff] }
 0x147   : > { %v1201_v51 = vmul.f32 %v5819_v34, %v1125_v15  ;;  %v4554_v20 = vpop.eup %4553  ;;  %v1198_v29 = vmul.f32 %v7869_v28, %v1122_v49  ;;  %v1067_v14 = vadd.f32 1e-05, %v971_v17  ;;  %v877_v35 = vmul.f32 0.00390625, %v773_v3  ;;  %v7874_v3 = vld [vmem:[#allocation6_spill] sm:$0xff]  ;;  %v7877_v17 = vld [vmem:[#allocation7_spill] sm:$0xff] }
 0x148   : > { %v1199_v8 = vmul.f32 %v5819_v34, %v1123_v37  ;;  %v4556_v53 = vpop.eup %4555  ;;  %v1276_v4 = vadd.f32 %v5821_v50, %v1200_v16  ;;  %v7871_v60 = vsub.f32 %v5404_v5, %v7870_v55  ;;  %v7873_v6 = vsub.f32 %v7872_v44, %v7870_v55  ;;  %v6244_v15 = vpop.xlane.xlu1 %778 }
 0x149   : > { %v1277_v33 = vadd.f32 %v5829_v10, %v1201_v51  ;;  %v1274_v49 = vadd.f32 %v5821_v50, %v1198_v29  ;;  %v7876_v37 = vsub.f32 %v7874_v3, %v7875_v54  ;;  %v7878_v51 = vsub.f32 %v7877_v17, %v7875_v54  ;;  %v6254_v5 = vpop.xlane.xlu0 %775  ;;  %v7879_v54 = vld [vmem:[#allocation12_spill] sm:$0xff] }
 0x14a   : > { %v1128_v48 = vmul.f32 %v4554_v20, %v7871_v60  ;;  %v1129_v62 = vmul.f32 %v4554_v20, %v7873_v6  ;;  %v1275_v39 = vadd.f32 %v5829_v10, %v1199_v8  ;;  %4565 = vrsqrt.f32 %v1067_v14 }
 0x14b   : > { %v1126_v16 = vmul.f32 %v4556_v53, %v7876_v37  ;;  %v1127_v19 = vmul.f32 %v4556_v53, %v7878_v51  ;;  %v1066_v55 = vadd.f32 1e-05, %v970_v11  ;;  %v4558_v44 = vpop.eup %4557  ;;  %v1338_v29 = vpack.c.bf16 %v1276_v4, %v1274_v49 }
 0x14c   : > { %v1204_v60 = vmul.f32 %v7869_v28, %v1128_v48  ;;  %v1205_v20 = vmul.f32 %v5819_v34, %v1129_v62  ;;  %v1339_v6 = vpack.c.bf16 %v1277_v33, %v1275_v39  ;;  %v4560_v37 = vpop.eup %4559  ;;  %v7880_v17 = vsub.f32 %v7879_v54, %v5827_v41  ;;  %v785_v62 = vpop.xlane.xlu1 %784  ;;  %v7882_v33 = vld [vmem:[#allocation13_spill] sm:$0xff] }
 0x14d   : > { %v1202_v8 = vmul.f32 %v7869_v28, %v1126_v16  ;;  %v1203_v3 = vmul.f32 %v5819_v34, %v1127_v19  ;;  %v7881_v14 = vsub.f32 %v5425_v13, %v5827_v41  ;;  %1370 = vst [vmem:[#allocation2] sm:$0xff] %v1338_v29  ;;  %v7883_v49 = vsub.f32 %v7882_v33, %v5835_v57  ;;  %v7884_v16 = vld [vmem:[#allocation14_spill] sm:$0xff] }
 0x14e   : > { %v1280_v12 = vadd.f32 %v5821_v50, %v1204_v60  ;;  %v1281_v53 = vadd.f32 %v5829_v10, %v1205_v20  ;;  %v1132_v48 = vmul.f32 %v4558_v44, %v7880_v17  ;;  %1371 = vst [vmem:[#allocation2 + $0x8] sm:$0xff] %v1339_v6  ;;  %v7885_v51 = vsub.f32 %v7884_v16, %v5835_v57  ;;  %v6276_v20 = vpop.xlane.xlu0 %781 }
 0x14f   : > { %v1133_v11 = vmul.f32 %v4558_v44, %v7881_v14  ;;  %v1278_v4 = vadd.f32 %v5821_v50, %v1202_v8  ;;  %v1279_v19 = vadd.f32 %v5829_v10, %v1203_v3  ;;  %v1130_v39 = vmul.f32 %v4560_v37, %v7883_v49  ;;  %v4562_v29 = vpop.eup %4561  ;;  %v7886_v14 = vld [vmem:[#allocation15_spill] sm:$0xff] }
 0x150   : > { %v1131_v60 = vmul.f32 %v4560_v37, %v7885_v51  ;;  %v1208_v13 = vmul.f32 %v7869_v28, %v1132_v48  ;;  %4567 = vrsqrt.f32 %v1066_v55  ;;  %v941_v44 = vsub.f32 %v877_v35, %v6020_v59  ;;  %v4564_v17 = vpop.eup %4563  ;;  %v791_v16 = vpop.xlane.xlu1 %790 }
 0x151   : > { %v1209_v41 = vmul.f32 %v5819_v34, %v1133_v11  ;;  %v1340_v6 = vpack.c.bf16 %v1280_v12, %v1278_v4  ;;  %v1341_v8 = vpack.c.bf16 %v1281_v53, %v1279_v19  ;;  %v1206_v3 = vmul.f32 %v7869_v28, %v1130_v39  ;;  %v7888_v11 = vld [vmem:[#allocation16_spill] sm:$0xff]  ;;  %v7890_v53 = vld [vmem:[#allocation17_spill] sm:$0xff] }
 0x152   : > { %v1207_v54 = vmul.f32 %v5819_v34, %v1131_v60  ;;  %v1284_v57 = vadd.f32 %v5821_v50, %v1208_v13  ;;  %v7887_v48 = vsub.f32 %v7886_v14, %v5845_v56  ;;  %v7889_v55 = vsub.f32 %v7888_v11, %v5845_v56 }
 0x153   : > { %v1285_v37 = vadd.f32 %v5829_v10, %v1209_v41  ;;  %1372 = vst [vmem:[#allocation2 + $0x10] sm:$0xff] %v1340_v6  ;;  %1373 = vst [vmem:[#allocation2 + $0x18] sm:$0xff] %v1341_v8  ;;  %v1282_v12 = vadd.f32 %v5821_v50, %v1206_v3  ;;  %v7891_v4 = vsub.f32 %v7890_v53, %v5855_v7  ;;  %v973_v60 = vmax.f32 %v941_v44, 0.0  ;;  %v788_v3 = vpop.xlane.xlu0 %787 }
 0x154   : > { %v1136_v33 = vmul.f32 %v4562_v29, %v7887_v48  ;;  %v1137_v59 = vmul.f32 %v4562_v29, %v7889_v55  ;;  %v1283_v35 = vadd.f32 %v5829_v10, %v1207_v54  ;;  %v7892_v49 = vsub.f32 %v5447_v21, %v5855_v7  ;;  %v4566_v54 = vpop.eup %4565 }
 0x155   : > { %v1134_v19 = vmul.f32 %v4564_v17, %v7891_v4  ;;  %v876_v13 = vmul.f32 0.00390625, %v6230_v9  ;;  %v1342_v41 = vpack.c.bf16 %v1284_v57, %v1282_v12  ;;  %v1069_v7 = vadd.f32 1e-05, %v973_v60  ;;  %v7893_v57 = vld [vmem:[#allocation18_spill] sm:$0xff] }
 0x156   : > { %v1135_v39 = vmul.f32 %v4564_v17, %v7892_v49  ;;  %v1212_v51 = vmul.f32 %v7869_v28, %v1136_v33  ;;  %v1213_v56 = vmul.f32 %v5819_v34, %v1137_v59  ;;  %v1343_v29 = vpack.c.bf16 %v1285_v37, %v1283_v35 }
 0x157   : > { %v1210_v6 = vmul.f32 %v7869_v28, %v1134_v19  ;;  %v940_v17 = vsub.f32 %v876_v13, %v6031_v26  ;;  %1374 = vst [vmem:[#allocation2 + $0x20] sm:$0xff] %v1342_v41  ;;  %v7894_v37 = vsub.f32 %v7893_v57, %v5867_v0  ;;  %v7895_v33 = vsub.f32 %v5457_v25, %v5867_v0  ;;  %v797_v19 = vpop.xlane.xlu1 %796  ;;  %v7898_v41 = vld [vmem:[#allocation20_spill] sm:$0xff] }
 0x158   : > { %v1211_v8 = vmul.f32 %v5819_v34, %v1135_v39  ;;  %v1288_v14 = vadd.f32 %v5821_v50, %v1212_v51  ;;  %v1289_v21 = vadd.f32 %v5829_v10, %v1213_v56  ;;  %1375 = vst [vmem:[#allocation2 + $0x28] sm:$0xff] %v1343_v29  ;;  %4569 = vrsqrt.f32 %v1069_v7  ;;  %v7896_v56 = vld [vmem:[#allocation19_spill] sm:$0xff] }
 0x159   : > { %v1286_v44 = vadd.f32 %v5821_v50, %v1210_v6  ;;  %v1140_v48 = vmul.f32 %v4566_v54, %v7894_v37  ;;  %v1141_v11 = vmul.f32 %v4566_v54, %v7895_v33  ;;  %v972_v55 = vmax.f32 %v940_v17, 0.0 }
 0x15a   : > { %v1287_v9 = vadd.f32 %v5829_v10, %v1211_v8  ;;  %v879_v59 = vmul.f32 0.00390625, %v6244_v15  ;;  %v878_v26 = vmul.f32 0.00390625, %v6254_v5  ;;  %v4568_v49 = vpop.eup %4567  ;;  %v881_v25 = vmul.f32 0.00390625, %v785_v62  ;;  %v794_v8 = vpop.xlane.xlu0 %793 }
 0x15b   : > { %v1344_v12 = vpack.c.bf16 %v1288_v14, %v1286_v44  ;;  %v1216_v53 = vmul.f32 %v7869_v28, %v1140_v48  ;;  %v1217_v4 = vmul.f32 %v5819_v34, %v1141_v11  ;;  %v1068_v39 = vadd.f32 1e-05, %v972_v55 }
 0x15c   : > { %v1345_v35 = vpack.c.bf16 %v1289_v21, %v1287_v9  ;;  %v943_v51 = vsub.f32 %v879_v59, %v6042_v18  ;;  %v942_v0 = vsub.f32 %v878_v26, %v6055_v32  ;;  %v7897_v60 = vsub.f32 %v7896_v56, %v5942_v47 }
 0x15d   : > { %1376 = vst [vmem:[#allocation2 + $0x30] sm:$0xff] %v1344_v12  ;;  %v1292_v15 = vadd.f32 %v5821_v50, %v1216_v53  ;;  %v1293_v5 = vadd.f32 %v5829_v10, %v1217_v4  ;;  %v7899_v29 = vsub.f32 %v7898_v41, %v5942_v47  ;;  %4571 = vrsqrt.f32 %v1068_v39 }
 0x15e   : > { %1377 = vst [vmem:[#allocation2 + $0x38] sm:$0xff] %v1345_v35  ;;  %v1138_v13 = vmul.f32 %v4568_v49, %v7897_v60  ;;  %v975_v18 = vmax.f32 %v943_v51, 0.0  ;;  %v974_v54 = vmax.f32 %v942_v0, 0.0  ;;  %v945_v32 = vsub.f32 %v881_v25, %v6068_v2  ;;  %v803_v2 = vpop.xlane.xlu1 %802  ;;  %v800_v12 = vpop.xlane.xlu0 %799  ;;  %v7903_v51 = vld [vmem:[#allocation22_spill] sm:$0xff] }
 0x15f   : > { %v1139_v6 = vmul.f32 %v4568_v49, %v7899_v29  ;;  %v880_v21 = vmul.f32 0.00390625, %v6276_v20  ;;  %v883_v7 = vmul.f32 0.00390625, %v791_v16  ;;  %v882_v57 = vmul.f32 0.00390625, %v788_v3 }
 0x160   : > { %v1214_v62 = vmul.f32 %v7869_v28, %v1138_v13  ;;  %v1071_v17 = vadd.f32 1e-05, %v975_v18  ;;  %v1070_v44 = vadd.f32 1e-05, %v974_v54  ;;  %v977_v9 = vmax.f32 %v945_v32, 0.0  ;;  %v7905_v54 = vld [vmem:[#allocation67_spill] sm:$0xff] }
 0x161   : > { %v1215_v14 = vmul.f32 %v5819_v34, %v1139_v6  ;;  %v944_v48 = vsub.f32 %v880_v21, %v6079_v38  ;;  %v947_v33 = vsub.f32 %v883_v7, %v6089_v30  ;;  %v946_v55 = vsub.f32 %v882_v57, %v6100_v24  ;;  %v7900_v30 = vld [vmem:[#allocation21_spill] sm:$0xff]  ;;  %v7901_v38 = vld [vmem:[#allocation59_spill] sm:$0xff]  ;;  %v7907_v7 = vld [vmem:[#allocation60_spill] sm:$0xff] }
 0x162   : > { %v1290_v47 = vadd.f32 %v5821_v50, %v1214_v62  ;;  %4573 = vrsqrt.f32 %v1071_v17  ;;  %v1073_v11 = vadd.f32 1e-05, %v977_v9  ;;  %v885_v59 = vmul.f32 0.00390625, %v797_v19  ;;  %v4570_v3 = vpop.eup %4569  ;;  %v809_v29 = vpop.xlane.xlu1 %808  ;;  %v7906_v21 = vld [vmem:[#allocation23_spill] sm:$0xff]  ;;  %v7909_v9 = vld [vmem:[#allocation24_spill] sm:$0xff] }
 0x163   : > { %v1291_v37 = vadd.f32 %v5829_v10, %v1215_v14  ;;  %4575 = vrsqrt.f32 %v1070_v44  ;;  %v976_v26 = vmax.f32 %v944_v48, 0.0  ;;  %v979_v35 = vmax.f32 %v947_v33, 0.0  ;;  %v7911_v33 = vld [vmem:[#allocation68_spill] sm:$0xff] }
 0x164   : > { %v1346_v20 = vpack.c.bf16 %v1292_v15, %v1290_v47  ;;  %4577 = vrsqrt.f32 %v1073_v11  ;;  %v978_v53 = vmax.f32 %v946_v55, 0.0  ;;  %v949_v4 = vsub.f32 %v885_v59, %v6109_v42 }
 0x165   : > { %v1347_v16 = vpack.c.bf16 %v1293_v5, %v1291_v37  ;;  %v7902_v49 = vsub.f32 %v7900_v30, %v7901_v38  ;;  %v7904_v24 = vsub.f32 %v7903_v51, %v7901_v38  ;;  %v1072_v0 = vadd.f32 1e-05, %v976_v26  ;;  %v7912_v30 = vld [vmem:[#allocation25_spill] sm:$0xff]  ;;  %v7915_v51 = vld [vmem:[#allocation26_spill] sm:$0xff] }
 0x166   : > { %1378 = vst [vmem:[#allocation2 + $0x40] sm:$0xff] %v1346_v20  ;;  %v884_v25 = vmul.f32 0.00390625, %v794_v8  ;;  %v1075_v15 = vadd.f32 1e-05, %v979_v35  ;;  %v1074_v5 = vadd.f32 1e-05, %v978_v53  ;;  %v7908_v17 = vsub.f32 %v7906_v21, %v7907_v7 }
 0x167   : > { %1379 = vst [vmem:[#allocation2 + $0x48] sm:$0xff] %v1347_v16  ;;  %v1144_v39 = vmul.f32 %v4570_v3, %v7902_v49  ;;  %v1145_v19 = vmul.f32 %v4570_v3, %v7904_v24  ;;  %v981_v56 = vmax.f32 %v949_v4, 0.0  ;;  %v887_v60 = vmul.f32 0.00390625, %v803_v2  ;;  %v4572_v6 = vpop.eup %4571  ;;  %v7913_v38 = vld [vmem:[#allocation61_spill] sm:$0xff] }
 0x168   : > { %4579 = vrsqrt.f32 %v1072_v0  ;;  %v948_v41 = vsub.f32 %v884_v25, %v6117_v52  ;;  %v886_v62 = vmul.f32 0.00390625, %v800_v12  ;;  %v1142_v44 = vmul.f32 %v4572_v6, %v7908_v17  ;;  %v806_v52 = vpop.xlane.xlu0 %805  ;;  %v6372_v0 = vpop.xlane.xlu1 %814  ;;  %v7923_v17 = vld [vmem:[#allocation10_spill] sm:$0xff] }
 0x169   : > { %v1220_v13 = vmul.f32 %v7869_v28, %v1144_v39  ;;  %v1221_v42 = vmul.f32 %v5819_v34, %v1145_v19  ;;  %4581 = vrsqrt.f32 %v1075_v15  ;;  %v1077_v18 = vadd.f32 1e-05, %v981_v56  ;;  %v7917_v15 = vld [vmem:[#allocation27_spill] sm:$0xff] }
 0x16a   : > { %v951_v32 = vsub.f32 %v887_v60, %v7905_v54  ;;  %v7910_v57 = vsub.f32 %v7909_v9, %v7907_v7  ;;  %4583 = vrsqrt.f32 %v1074_v5  ;;  %v980_v37 = vmax.f32 %v948_v41, 0.0  ;;  %v7918_v5 = vld [vmem:[#allocation8_spill] sm:$0xff]  ;;  %v7922_v7 = vld [vmem:[#allocation29_spill] sm:$0xff] }
 0x16b   : > { %v1296_v8 = vadd.f32 %v5821_v50, %v1220_v13  ;;  %v1297_v14 = vadd.f32 %v5829_v10, %v1221_v42  ;;  %v950_v2 = vsub.f32 %v886_v62, %v7911_v33  ;;  %v1218_v11 = vmul.f32 %v7869_v28, %v1142_v44  ;;  %v7920_v13 = vld [vmem:[#allocation28_spill] sm:$0xff] }
 0x16c   : > { %v1143_v47 = vmul.f32 %v4572_v6, %v7910_v57  ;;  %v983_v48 = vmax.f32 %v951_v32, 0.0  ;;  %4585 = vrsqrt.f32 %v1077_v18  ;;  %v6360_v59 = vmul.f32 0.00390625, %v809_v29  ;;  %v4574_v20 = vpop.eup %4573  ;;  %v7925_v57 = vld [vmem:[#allocation30_spill] sm:$0xff] }
 0x16d   : > { %v1076_v16 = vadd.f32 1e-05, %v980_v37  ;;  %v982_v12 = vmax.f32 %v950_v2, 0.0  ;;  %v6362_v3 = vmul.f32 0.00390625, %v806_v52  ;;  %v4576_v35 = vpop.eup %4575  ;;  %v1294_v53 = vadd.f32 %v5821_v50, %v1218_v11  ;;  %v6392_v37 = vpop.xlane.xlu0 %811 }
 0x16e   : > { %v1219_v55 = vmul.f32 %v5819_v34, %v1143_v47  ;;  %v1079_v26 = vadd.f32 1e-05, %v983_v48  ;;  %v7914_v49 = vsub.f32 %v7912_v30, %v7913_v38  ;;  %v7916_v24 = vsub.f32 %v7915_v51, %v7913_v38  ;;  %v4578_v25 = vpop.eup %4577  ;;  %v7930_v30 = vld [vmem:[#allocation32_spill] sm:$0xff]  ;;  %v7935_v51 = vld [vmem:[#allocation34_spill] sm:$0xff] }
 0x16f   : > { %v7919_v56 = vsub.f32 %v7917_v15, %v7918_v5  ;;  %v7921_v42 = vsub.f32 %v7920_v13, %v7918_v5  ;;  %4587 = vrsqrt.f32 %v1076_v16  ;;  %v6380_v29 = vadd.f32 1e-05, %v982_v12  ;;  %v7927_v12 = vld [vmem:[#allocation31_spill] sm:$0xff] }
 0x170   : > { %v1295_v4 = vadd.f32 %v5829_v10, %v1219_v55  ;;  %v1148_v39 = vmul.f32 %v4574_v20, %v7914_v49  ;;  %v1149_v19 = vmul.f32 %v4574_v20, %v7916_v24  ;;  %v1348_v6 = vpack.c.bf16 %v1296_v8, %v1294_v53  ;;  %v7932_v49 = vld [vmem:[#allocation33_spill] sm:$0xff] }
 0x171   : > { %v1146_v60 = vmul.f32 %v4576_v35, %v7919_v56  ;;  %v1147_v41 = vmul.f32 %v4576_v35, %v7921_v42  ;;  %v7924_v44 = vsub.f32 %v7922_v7, %v7923_v17  ;;  %v7926_v47 = vsub.f32 %v7925_v57, %v7923_v17  ;;  %v7928_v35 = vld [vmem:[#allocation11_spill] sm:$0xff]  ;;  %v7940_v17 = vld [vmem:[#allocation36_spill] sm:$0xff]  ;;  %v7942_v57 = vld [vmem:[#allocation37_spill] sm:$0xff] }
 0x172   : > { %v1349_v18 = vpack.c.bf16 %v1297_v14, %v1295_v4  ;;  %v1224_v54 = vmul.f32 %v7869_v28, %v1148_v39  ;;  %v1225_v32 = vmul.f32 %v5819_v34, %v1149_v19  ;;  %v4580_v8 = vpop.eup %4579  ;;  %1380 = vst [vmem:[#allocation2 + $0x50] sm:$0xff] %v1348_v6  ;;  %4589 = vrsqrt.f32 %v1079_v26  ;;  %v7933_v39 = vld [vmem:[#allocation62_spill] sm:$0xff] }
 0x173   : > { %v1222_v62 = vmul.f32 %v7869_v28, %v1146_v60  ;;  %v1223_v21 = vmul.f32 %v5819_v34, %v1147_v41  ;;  %v1152_v9 = vmul.f32 %v4578_v25, %v7924_v44  ;;  %v1153_v52 = vmul.f32 %v4578_v25, %v7926_v47  ;;  %v4582_v2 = vpop.eup %4581  ;;  %v6414_v25 = vpop.xlane.xlu1 %820  ;;  %v7943_v47 = vld [vmem:[#allocation64_spill] sm:$0xff] }
 0x174   : > { %1381 = vst [vmem:[#allocation2 + $0x58] sm:$0xff] %v1349_v18  ;;  %v1300_v14 = vadd.f32 %v5821_v50, %v1224_v54  ;;  %v1301_v48 = vadd.f32 %v5829_v10, %v1225_v32  ;;  %v953_v33 = vsub.f32 %v6360_v59, %v6147_v31  ;;  %v7929_v53 = vsub.f32 %v7927_v12, %v7928_v35  ;;  %v4584_v15 = vpop.eup %4583  ;;  %v7937_v32 = vld [vmem:[#allocation35_spill] sm:$0xff] }
 0x175   : > { %v1298_v11 = vadd.f32 %v5821_v50, %v1222_v62  ;;  %v1299_v55 = vadd.f32 %v5829_v10, %v1223_v21  ;;  %v1228_v20 = vmul.f32 %v7869_v28, %v1152_v9  ;;  %v1229_v16 = vmul.f32 %v5819_v34, %v1153_v52  ;;  %v7938_v62 = vld [vmem:[#allocation63_spill] sm:$0xff] }
 0x176   : > { %v1150_v4 = vmul.f32 %v4580_v8, %v7929_v53  ;;  %v7931_v38 = vsub.f32 %v7930_v30, %v7928_v35  ;;  %v7934_v31 = vsub.f32 %v7932_v49, %v7933_v39  ;;  %v7936_v24 = vsub.f32 %v7935_v51, %v7933_v39  ;;  %v4586_v42 = vpop.eup %4585  ;;  %v7947_v39 = vld [vmem:[#allocation39_spill] sm:$0xff] }
 0x177   : > { %v1350_v5 = vpack.c.bf16 %v1300_v14, %v1298_v11  ;;  %v1351_v56 = vpack.c.bf16 %v1301_v48, %v1299_v55  ;;  %v1304_v60 = vadd.f32 %v5821_v50, %v1228_v20  ;;  %v1305_v13 = vadd.f32 %v5829_v10, %v1229_v16  ;;  %v7945_v14 = vld [vmem:[#allocation38_spill] sm:$0xff]  ;;  %v818_v11 = vpop.xlane.xlu0 %817 }
 0x178   : > { %v1151_v26 = vmul.f32 %v4580_v8, %v7931_v38  ;;  %v1156_v59 = vmul.f32 %v4582_v2, %v7934_v31  ;;  %v1157_v19 = vmul.f32 %v4582_v2, %v7936_v24  ;;  %v1226_v41 = vmul.f32 %v7869_v28, %v1150_v4  ;;  %v7948_v31 = vld [vmem:[#allocation65_spill] sm:$0xff]  ;;  %v7950_v24 = vld [vmem:[#allocation40_spill] sm:$0xff] }
 0x179   : > { %1382 = vst [vmem:[#allocation2 + $0x60] sm:$0xff] %v1350_v5  ;;  %1383 = vst [vmem:[#allocation2 + $0x68] sm:$0xff] %v1351_v56  ;;  %v7939_v21 = vsub.f32 %v7937_v32, %v7938_v62  ;;  %v7941_v44 = vsub.f32 %v7940_v17, %v7938_v62  ;;  %v7944_v52 = vsub.f32 %v7942_v57, %v7943_v47  ;;  %v4588_v35 = vpop.eup %4587  ;;  %v827_v5 = vpop.xlane.xlu1 %826  ;;  %4591 = vrsqrt.f32 %v6380_v29 }
 0x17a   : > { %v1227_v6 = vmul.f32 %v5819_v34, %v1151_v26  ;;  %v1232_v18 = vmul.f32 %v7869_v28, %v1156_v59  ;;  %v1233_v54 = vmul.f32 %v5819_v34, %v1157_v19  ;;  %v7946_v48 = vsub.f32 %v7945_v14, %v7943_v47 }
 0x17b   : > { %v1154_v7 = vmul.f32 %v4584_v15, %v7939_v21  ;;  %v1155_v9 = vmul.f32 %v4584_v15, %v7941_v44  ;;  %v1160_v8 = vmul.f32 %v4586_v42, %v7944_v52  ;;  %v1302_v55 = vadd.f32 %v5821_v50, %v1226_v41  ;;  %v7952_v21 = vld [vmem:[#allocation41_spill] sm:$0xff]  ;;  %v824_v52 = vpop.xlane.xlu0 %823 }
 0x17c   : > { %v1161_v2 = vmul.f32 %v4586_v42, %v7946_v48  ;;  %v1303_v20 = vadd.f32 %v5829_v10, %v1227_v6  ;;  %v1308_v16 = vadd.f32 %v5821_v50, %v1232_v18  ;;  %v1309_v12 = vadd.f32 %v5829_v10, %v1233_v54  ;;  %v4590_v18 = vpop.eup %4589 }
 0x17d   : > { %v1230_v53 = vmul.f32 %v7869_v28, %v1154_v7  ;;  %v1231_v4 = vmul.f32 %v5819_v34, %v1155_v9  ;;  %v1236_v30 = vmul.f32 %v7869_v28, %v1160_v8  ;;  %v1352_v26 = vpack.c.bf16 %v1304_v60, %v1302_v55  ;;  %v7953_v7 = vld [vmem:[#allocation53_spill] sm:$0xff]  ;;  %v7955_v9 = vld [vmem:[#allocation42_spill] sm:$0xff] }
 0x17e   : > { %v1237_v38 = vmul.f32 %v5819_v34, %v1161_v2  ;;  %v1353_v49 = vpack.c.bf16 %v1305_v13, %v1303_v20  ;;  %v7949_v59 = vsub.f32 %v7947_v39, %v7948_v31  ;;  %v7951_v19 = vsub.f32 %v7950_v24, %v7948_v31 }
 0x17f   : > { %v1306_v56 = vadd.f32 %v5821_v50, %v1230_v53  ;;  %v1307_v42 = vadd.f32 %v5829_v10, %v1231_v4  ;;  %v1312_v41 = vadd.f32 %v5821_v50, %v1236_v30  ;;  %1384 = vst [vmem:[#allocation2 + $0x70] sm:$0xff] %v1352_v26  ;;  %v985_v54 = vmax.f32 %v953_v33, 0.0  ;;  %v833_v53 = vpop.xlane.xlu1 %832 }
 0x180   : > { %v1158_v51 = vmul.f32 %v4588_v35, %v7949_v59  ;;  %v1159_v15 = vmul.f32 %v4588_v35, %v7951_v19  ;;  %v1313_v6 = vadd.f32 %v5829_v10, %v1237_v38  ;;  %1385 = vst [vmem:[#allocation2 + $0x78] sm:$0xff] %v1353_v49  ;;  %v7954_v17 = vsub.f32 %v7952_v21, %v7953_v7 }
 0x181   : > { %v1354_v32 = vpack.c.bf16 %v1308_v16, %v1306_v56  ;;  %v1355_v62 = vpack.c.bf16 %v1309_v12, %v1307_v42  ;;  %v7956_v57 = vsub.f32 %v7955_v9, %v7953_v7  ;;  %v1081_v48 = vadd.f32 1e-05, %v985_v54 }
 0x182   : > { %v1234_v60 = vmul.f32 %v7869_v28, %v1158_v51  ;;  %v1235_v13 = vmul.f32 %v5819_v34, %v1159_v15  ;;  %v1164_v44 = vmul.f32 %v4590_v18, %v7954_v17  ;;  %v952_v29 = vsub.f32 %v6362_v3, %v6160_v45  ;;  %v830_v51 = vpop.xlane.xlu0 %829 }
 0x183   : > { %v1165_v47 = vmul.f32 %v4590_v18, %v7956_v57  ;;  %1386 = vst [vmem:[#allocation2 + $0x80] sm:$0xff] %v1354_v32  ;;  %1387 = vst [vmem:[#allocation2 + $0x88] sm:$0xff] %v1355_v62  ;;  %v891_v33 = vmul.f32 0.00390625, %v6372_v0  ;;  %v890_v2 = vmul.f32 0.00390625, %v6392_v37  ;;  %v929_v55 = vmul.f32 %v6211_v40, %v6211_v40 }
 0x184   : > { %v1310_v8 = vadd.f32 %v5821_v50, %v1234_v60  ;;  %v1311_v14 = vadd.f32 %v5829_v10, %v1235_v13  ;;  %v928_v20 = vmul.f32 %v6214_v63, %v6214_v63  ;;  %4593 = vrsqrt.f32 %v1081_v48  ;;  %v7957_v60 = vld [vmem:[#allocation43_spill] sm:$0xff]  ;;  %v7958_v13 = vld [vmem:[#allocation54_spill] sm:$0xff] }
 0x185   : > { %v984_v35 = vmax.f32 %v952_v29, 0.0  ;;  %v1240_v4 = vmul.f32 %v7869_v28, %v1164_v44  ;;  %v1241_v45 = vmul.f32 %v5819_v34, %v1165_v47  ;;  %v955_v3 = vsub.f32 %v891_v33, %v6171_v22  ;;  %v6491_v47 = vld [vmem:[%s5369_s15 + $0x1b0] sm:$0xff]  ;;  %v7962_v33 = vld [vmem:[#allocation45_spill] sm:$0xff] }
 0x186   : > { %v1356_v16 = vpack.c.bf16 %v1312_v41, %v1310_v8  ;;  %v1357_v12 = vpack.c.bf16 %v1313_v6, %v1311_v14  ;;  %v954_v0 = vsub.f32 %v890_v2, %v6191_v58  ;;  %v893_v30 = vmul.f32 0.00390625, %v6414_v25  ;;  %v4592_v25 = vpop.eup %4591  ;;  %v7963_v2 = vld [vmem:[#allocation57_spill] sm:$0xff] }
 0x187   : > { %v1080_v37 = vadd.f32 1e-05, %v984_v35  ;;  %v892_v38 = vmul.f32 0.00390625, %v818_v11  ;;  %v895_v26 = vmul.f32 0.00390625, %v827_v5  ;;  %v987_v49 = vmax.f32 %v955_v3, 0.0 }
 0x188   : > { %1388 = vst [vmem:[#allocation2 + $0x90] sm:$0xff] %v1356_v16  ;;  %1389 = vst [vmem:[#allocation2 + $0x98] sm:$0xff] %v1357_v12  ;;  %v986_v39 = vmax.f32 %v954_v0, 0.0  ;;  %v894_v31 = vmul.f32 0.00390625, %v824_v52  ;;  %v897_v59 = vmul.f32 0.00390625, %v833_v53  ;;  %v957_v24 = vsub.f32 %v893_v30, %v6196_v27  ;;  %v7965_v12 = vld [vmem:[#allocation46_spill] sm:$0xff] }
 0x189   : > { %4595 = vrsqrt.f32 %v1080_v37  ;;  %v956_v19 = vsub.f32 %v892_v38, %v6200_v36  ;;  %v959_v22 = vsub.f32 %v895_v26, %v6204_v1  ;;  %v1083_v58 = vadd.f32 1e-05, %v987_v49  ;;  %v7960_v36 = vld [vmem:[#allocation44_spill] sm:$0xff]  ;;  %v4614_v26 = vld [vmem:[%s5369_s15 + $0x1b8] sm:$0xff] }
 0x18a   : > { %v1082_v15 = vadd.f32 1e-05, %v986_v39  ;;  %v958_v56 = vsub.f32 %v894_v31, %v6208_v23  ;;  %v961_v42 = vsub.f32 %v897_v59, %v929_v55  ;;  %v989_v11 = vmax.f32 %v957_v24, 0.0  ;;  %v4615_v39 = vld [vmem:[%s5369_s15 + $0x1a0] sm:$0xff] }
 0x18b   : > { %v988_v5 = vmax.f32 %v956_v19, 0.0  ;;  %v991_v41 = vmax.f32 %v959_v22, 0.0  ;;  %v896_v6 = vmul.f32 0.00390625, %v830_v51  ;;  %v1316_v18 = vadd.f32 %v5821_v50, %v1240_v4  ;;  %v4616_v51 = vld [vmem:[%s5369_s15 + $0x1a8] sm:$0xff]  ;;  %v6512_v19 = vld [vmem:[%s5369_s15 + $0x1d0] sm:$0xff] }
 0x18c   : > { %v7959_v27 = vsub.f32 %v7957_v60, %v7958_v13  ;;  %v7961_v1 = vsub.f32 %v7960_v36, %v7958_v13  ;;  %4597 = vrsqrt.f32 %v1083_v58  ;;  %v1085_v23 = vadd.f32 1e-05, %v989_v11  ;;  %v7967_v58 = vld [vmem:[#allocation47_spill] sm:$0xff] }
 0x18d   : > { %4599 = vrsqrt.f32 %v1082_v15  ;;  %v1084_v62 = vadd.f32 1e-05, %v988_v5  ;;  %v990_v21 = vmax.f32 %v958_v56, 0.0  ;;  %v1317_v7 = vadd.f32 %v5829_v10, %v1241_v45  ;;  %v7968_v15 = vld [vmem:[#allocation66_spill] sm:$0xff] }
 0x18e   : > { %v1162_v54 = vmul.f32 %v4592_v25, %v7959_v27  ;;  %v1163_v32 = vmul.f32 %v4592_v25, %v7961_v1  ;;  %v993_v9 = vmax.f32 %v961_v42, 0.0  ;;  %v4594_v57 = vpop.eup %4593  ;;  %v1048_v52 = vsub.f32 %v6491_v47, %v6174_v61  ;;  %v7970_v25 = vld [vmem:[#allocation48_spill] sm:$0xff] }
 0x18f   : > { %4601 = vrsqrt.f32 %v1085_v23  ;;  %v1087_v8 = vadd.f32 1e-05, %v991_v41  ;;  %v960_v14 = vsub.f32 %v896_v6, %v928_v20  ;;  %v7964_v55 = vsub.f32 %v7962_v33, %v7963_v2  ;;  %v4618_v41 = vld [vmem:[%s5369_s15 + $0x1d8] sm:$0xff] }
 0x190   : > { %v1238_v17 = vmul.f32 %v7869_v28, %v1162_v54  ;;  %v1239_v44 = vmul.f32 %v5819_v34, %v1163_v32  ;;  %v7966_v35 = vsub.f32 %v7965_v12, %v7963_v2  ;;  %4603 = vrsqrt.f32 %v1084_v62  ;;  %v7973_v62 = vld [vmem:[#allocation49_spill] sm:$0xff] }
 0x191   : > { %v1168_v16 = vmul.f32 %v4594_v57, %v7964_v55  ;;  %v1086_v4 = vadd.f32 1e-05, %v990_v21  ;;  %v1089_v45 = vadd.f32 1e-05, %v993_v9  ;;  %v992_v3 = vmax.f32 %v960_v14, 0.0  ;;  %v7974_v21 = vld [vmem:[#allocation69_spill] sm:$0xff] }
 0x192   : > { %v1314_v48 = vadd.f32 %v5821_v50, %v1238_v17  ;;  %v1315_v29 = vadd.f32 %v5829_v10, %v1239_v44  ;;  %v1169_v53 = vmul.f32 %v4594_v57, %v7966_v35  ;;  %v1049_v49 = vsub.f32 %v4614_v26, %v6174_v61  ;;  %v7976_v44 = vld [vmem:[#allocation50_spill] sm:$0xff]  ;;  %v7981_v55 = vld [vmem:[#allocation52_spill] sm:$0xff] }
 0x193   : > { %v1244_v37 = vmul.f32 %v7869_v28, %v1168_v16  ;;  %v4596_v38 = vpop.eup %4595  ;;  %v1046_v31 = vsub.f32 %v4615_v39, %v6177_v46  ;;  %4605 = vrsqrt.f32 %v1087_v8  ;;  %v1088_v59 = vadd.f32 1e-05, %v992_v3 }
 0x194   : > { %v1358_v20 = vpack.c.bf16 %v1316_v18, %v1314_v48  ;;  %v1359_v0 = vpack.c.bf16 %v1317_v7, %v1315_v29  ;;  %v1245_v30 = vmul.f32 %v5819_v34, %v1169_v53  ;;  %v1047_v24 = vsub.f32 %v4616_v51, %v6177_v46  ;;  %v6525_v46 = vld [vmem:[%s5369_s15 + $0x1c0] sm:$0xff]  ;;  %v7972_v18 = vld [vmem:[#allocation71_spill] sm:$0xff]  ;;  %v4621_v53 = vld [vmem:[%s5369_s15 + $0x1f0] sm:$0xff] }
 0x195   : > { %v1052_v22 = vsub.f32 %v6512_v19, %v6181_v43  ;;  %v7969_v56 = vsub.f32 %v7967_v58, %v7968_v15  ;;  %v7971_v11 = vsub.f32 %v7970_v25, %v7968_v15  ;;  %v1053_v6 = vsub.f32 %v4618_v41, %v6181_v43  ;;  %v4620_v43 = vld [vmem:[%s5369_s15 + $0x1c8] sm:$0xff]  ;;  %v7979_v29 = vld [vmem:[#allocation70_spill] sm:$0xff] }
 0x196   : > { %1390 = vst [vmem:[#allocation2 + $0xa0] sm:$0xff] %v1358_v20  ;;  %1391 = vst [vmem:[#allocation2 + $0xa8] sm:$0xff] %v1359_v0  ;;  %v1050_v60 = vsub.f32 %v6525_v46, %v7972_v18  ;;  %v1320_v13 = vadd.f32 %v5821_v50, %v1244_v37  ;;  %4607 = vrsqrt.f32 %v1086_v4  ;;  %v4598_v27 = vpop.eup %4597  ;;  %v1321_v54 = vadd.f32 %v5829_v10, %v1245_v30  ;;  %v7978_v48 = vld [vmem:[#allocation51_spill] sm:$0xff] }
 0x197   : > { %v1166_v42 = vmul.f32 %v4596_v38, %v7969_v56  ;;  %v1167_v5 = vmul.f32 %v4596_v38, %v7971_v11  ;;  %4609 = vrsqrt.f32 %v1089_v45  ;;  %v4600_v32 = vpop.eup %4599  ;;  %v1051_v23 = vsub.f32 %v4620_v43, %v7972_v18  ;;  %v4622_v45 = vld [vmem:[%s5369_s15 + $0x1f8] sm:$0xff]  ;;  %v4623_v11 = vld [vmem:[%s5369_s15 + $0x1e0] sm:$0xff]  ;;  %v4624_v41 = vld [vmem:[%s5369_s15 + $0x1e8] sm:$0xff] }
 0x198   : > { %v7975_v7 = vsub.f32 %v7973_v62, %v7974_v21  ;;  %v7977_v9 = vsub.f32 %v7976_v44, %v7974_v21  ;;  %4611 = vrsqrt.f32 %v1088_v59  ;;  %v7980_v33 = vsub.f32 %v7978_v48, %v7979_v29 }
 0x199   : > { %v1242_v36 = vmul.f32 %v7869_v28, %v1166_v42  ;;  %v1243_v1 = vmul.f32 %v5819_v34, %v1167_v5  ;;  %v7982_v16 = vsub.f32 %v7981_v55, %v7979_v29  ;;  %v4602_v35 = vpop.eup %4601  ;;  %v1056_v4 = vsub.f32 %v4621_v53, %v6211_v40 }
 0x19a   : > { %v1172_v17 = vmul.f32 %v4598_v27, %v7975_v7  ;;  %v1173_v57 = vmul.f32 %v4598_v27, %v7977_v9  ;;  %v1170_v2 = vmul.f32 %v4600_v32, %v7980_v33  ;;  %v1057_v3 = vsub.f32 %v4622_v45, %v6211_v40  ;;  %v4604_v39 = vpop.eup %4603 }
 0x19b   : > { %v1318_v8 = vadd.f32 %v5821_v50, %v1242_v36  ;;  %v1319_v14 = vadd.f32 %v5829_v10, %v1243_v1  ;;  %v1171_v12 = vmul.f32 %v4600_v32, %v7982_v16  ;;  %v1176_v40 = vmul.f32 %v4602_v35, %v1048_v52 }
 0x19c   : > { %v1248_v20 = vmul.f32 %v7869_v28, %v1172_v17  ;;  %v1249_v0 = vmul.f32 %v5819_v34, %v1173_v57  ;;  %v1246_v38 = vmul.f32 %v7869_v28, %v1170_v2  ;;  %v1177_v19 = vmul.f32 %v4602_v35, %v1049_v49 }
 0x19d   : > { %v1360_v37 = vpack.c.bf16 %v1320_v13, %v1318_v8  ;;  %v1361_v30 = vpack.c.bf16 %v1321_v54, %v1319_v14  ;;  %v1247_v26 = vmul.f32 %v5819_v34, %v1171_v12  ;;  %v1174_v56 = vmul.f32 %v4604_v39, %v1046_v31  ;;  %v4606_v25 = vpop.eup %4605 }
 0x19e   : > { %v1324_v59 = vadd.f32 %v5821_v50, %v1248_v20  ;;  %v1325_v51 = vadd.f32 %v5829_v10, %v1249_v0  ;;  %v1322_v58 = vadd.f32 %v5821_v50, %v1246_v38  ;;  %v1175_v42 = vmul.f32 %v4604_v39, %v1047_v24 }
 0x19f   : > { %1392 = vst [vmem:[#allocation2 + $0xb0] sm:$0xff] %v1360_v37  ;;  %1393 = vst [vmem:[#allocation2 + $0xb8] sm:$0xff] %v1361_v30  ;;  %v1323_v15 = vadd.f32 %v5829_v10, %v1247_v26  ;;  %v1054_v5 = vsub.f32 %v4623_v11, %v6214_v63  ;;  %v1055_v46 = vsub.f32 %v4624_v41, %v6214_v63 }
 0x1a0   : > { %v1252_v18 = vmul.f32 %v7869_v28, %v1176_v40  ;;  %v1253_v61 = vmul.f32 %v5819_v34, %v1177_v19  ;;  %v1362_v47 = vpack.c.bf16 %v1324_v59, %v1322_v58  ;;  %v1250_v49 = vmul.f32 %v7869_v28, %v1174_v56  ;;  %v4608_v27 = vpop.eup %4607 }
 0x1a1   : > { %v1363_v52 = vpack.c.bf16 %v1325_v51, %v1323_v15  ;;  %v1251_v13 = vmul.f32 %v5819_v34, %v1175_v42  ;;  %v1180_v54 = vmul.f32 %v4606_v25, %v1052_v22  ;;  %v1181_v36 = vmul.f32 %v4606_v25, %v1053_v6  ;;  %v4610_v1 = vpop.eup %4609 }
 0x1a2   : > { %v1328_v31 = vadd.f32 %v5821_v50, %v1252_v18  ;;  %v1329_v24 = vadd.f32 %v5829_v10, %v1253_v61  ;;  %1394 = vst [vmem:[#allocation2 + $0xc0] sm:$0xff] %v1362_v47  ;;  %v1326_v63 = vadd.f32 %v5821_v50, %v1250_v49  ;;  %v1178_v43 = vmul.f32 %v4608_v27, %v1050_v60  ;;  %v4612_v21 = vpop.eup %4611 }
 0x1a3   : > { %1395 = vst [vmem:[#allocation2 + $0xc8] sm:$0xff] %v1363_v52  ;;  %v1327_v32 = vadd.f32 %v5829_v10, %v1251_v13  ;;  %v1179_v62 = vmul.f32 %v4608_v27, %v1051_v23  ;;  %v1256_v7 = vmul.f32 %v7869_v28, %v1180_v54  ;;  %v1257_v17 = vmul.f32 %v5819_v34, %v1181_v36 }
 0x1a4   : > { %v1184_v44 = vmul.f32 %v4610_v1, %v1056_v4  ;;  %v1185_v9 = vmul.f32 %v4610_v1, %v1057_v3  ;;  %v1364_v57 = vpack.c.bf16 %v1328_v31, %v1326_v63  ;;  %v1254_v22 = vmul.f32 %v7869_v28, %v1178_v43 }
 0x1a5   : > { %v1365_v8 = vpack.c.bf16 %v1329_v24, %v1327_v32  ;;  %v1255_v6 = vmul.f32 %v5819_v34, %v1179_v62  ;;  %v1332_v14 = vadd.f32 %v5821_v50, %v1256_v7  ;;  %v1333_v48 = vadd.f32 %v5829_v10, %v1257_v17 }
 0x1a6   : > { %v1260_v60 = vmul.f32 %v7869_v28, %v1184_v44  ;;  %v1261_v23 = vmul.f32 %v5819_v34, %v1185_v9  ;;  %1396 = vst [vmem:[#allocation2 + $0xd0] sm:$0xff] %v1364_v57  ;;  %v1330_v29 = vadd.f32 %v5821_v50, %v1254_v22  ;;  %v1182_v2 = vmul.f32 %v4612_v21, %v1054_v5 }
 0x1a7   : > { %1397 = vst [vmem:[#allocation2 + $0xd8] sm:$0xff] %v1365_v8  ;;  %v1331_v33 = vadd.f32 %v5829_v10, %v1255_v6  ;;  %v1183_v55 = vmul.f32 %v4612_v21, %v1055_v46 }
 0x1a8   : > { %v1336_v16 = vadd.f32 %v5821_v50, %v1260_v60  ;;  %v1337_v12 = vadd.f32 %v5829_v10, %v1261_v23  ;;  %v1366_v35 = vpack.c.bf16 %v1332_v14, %v1330_v29  ;;  %v1258_v4 = vmul.f32 %v7869_v28, %v1182_v2 }
 0x1a9   : > { %v1367_v53 = vpack.c.bf16 %v1333_v48, %v1331_v33  ;;  %v1259_v45 = vmul.f32 %v5819_v34, %v1183_v55 }
 0x1aa   : > { %1398 = vst [vmem:[#allocation2 + $0xe0] sm:$0xff] %v1366_v35  ;;  %v1334_v3 = vadd.f32 %v5821_v50, %v1258_v4 }
 0x1ab   : > { %1399 = vst [vmem:[#allocation2 + $0xe8] sm:$0xff] %v1367_v53  ;;  %v1335_v20 = vadd.f32 %v5829_v10, %v1259_v45 }
 0x1ac   : > { %v1368_v0 = vpack.c.bf16 %v1336_v16, %v1334_v3 }
 0x1ad   : > { %v1369_v37 = vpack.c.bf16 %v1337_v12, %v1335_v20 }
 0x1ae   : > { %1400 = vst [vmem:[#allocation2 + $0xf0] sm:$0xff] %v1368_v0 }
 0x1af   : > { %1401 = vst [vmem:[#allocation2 + $0xf8] sm:$0xff] %v1369_v37 }
 0x1b0 PF: > { %v4625_v34 = vld [vmem:[%s5386_s13 + $0x4] ss:$16 sps:$4 sm:$0xff]   ;;  %v4627_v28 = vld [vmem:[%s5386_s13] ss:$16 sps:$4 sm:$0xff]   ;;  %v6605_v15 = vld [vmem:[#allocation2 + $0x8] sm:$0xff]  ;;  %p4421_p0 = scmp.ne.s32.totalorder %s5112_s26, 1 }
 0x1b1   : > { %1904 = vmatprep.subr.bf16.mxu1 %v4625_v34  ;;  %v4628_v50 = vld [vmem:[%s5386_s13 + $0x24] ss:$16 sps:$4 sm:$0xff]   ;;  %v4630_v10 = vld [vmem:[%s5386_s13 + $0x20] ss:$16 sps:$4 sm:$0xff]   ;;  %1936 = vmatprep.mubr.bf16.mxu1 %v6605_v15  ;;  %v4675_v63 = vld [vmem:[%s5386_s13 + $0xc] ss:$16 sps:$4 sm:$0xff]  }
 0x1b2   : > { %1905 = vmatpush1.bf16.msra.mxu1 %v4627_v28  ;;  %v4631_v30 = vld [vmem:[%s5386_s13 + $0x44] ss:$16 sps:$4 sm:$0xff]   ;;  %v4633_v38 = vld [vmem:[%s5386_s13 + $0x40] ss:$16 sps:$4 sm:$0xff]   ;;  %v4673_v43 = vld [vmem:[%s5386_s13 + $0x8] ss:$16 sps:$4 sm:$0xff]  }
 0x1b3   : > { %1906 = vmatprep.subr.bf16.mxu1 %v4628_v50  ;;  %v4634_v26 = vld [vmem:[%s5386_s13 + $0x64] ss:$16 sps:$4 sm:$0xff]   ;;  %v4636_v39 = vld [vmem:[%s5386_s13 + $0x60] ss:$16 sps:$4 sm:$0xff]   ;;  %v6631_v62 = vld [vmem:[#allocation2 + $0x18] sm:$0xff] }
 0x1b4   : > { %v4637_v59 = vld [vmem:[%s5386_s13 + $0x84] ss:$16 sps:$4 sm:$0xff]   ;;  %v4639_v51 = vld [vmem:[%s5386_s13 + $0x80] ss:$16 sps:$4 sm:$0xff]   ;;  %v4678_v21 = vld [vmem:[%s5386_s13 + $0x2c] ss:$16 sps:$4 sm:$0xff]  }
 0x1b5   : > { %v4640_v40 = vld [vmem:[%s5386_s13 + $0xa4] ss:$16 sps:$4 sm:$0xff]   ;;  %v4642_v19 = vld [vmem:[%s5386_s13 + $0xa0] ss:$16 sps:$4 sm:$0xff]   ;;  %v4676_v7 = vld [vmem:[%s5386_s13 + $0x28] ss:$16 sps:$4 sm:$0xff]  }
 0x1b6   : > { %1907 = vmatpush1.bf16.msra.mxu1 %v4630_v10  ;;  %v4643_v58 = vld [vmem:[%s5386_s13 + $0xc4] ss:$16 sps:$4 sm:$0xff]   ;;  %v4645_v56 = vld [vmem:[%s5386_s13 + $0xc0] ss:$16 sps:$4 sm:$0xff]   ;;  %v4681_v17 = vld [vmem:[%s5386_s13 + $0x4c] ss:$16 sps:$4 sm:$0xff]  }
 0x1b7   : > { %1908 = vmatprep.subr.bf16.mxu1 %v4631_v30  ;;  %v4646_v42 = vld [vmem:[%s5386_s13 + $0xe4] ss:$16 sps:$4 sm:$0xff]   ;;  %v4648_v25 = vld [vmem:[%s5386_s13 + $0xe0] ss:$16 sps:$4 sm:$0xff]   ;;  %v4679_v9 = vld [vmem:[%s5386_s13 + $0x48] ss:$16 sps:$4 sm:$0xff]  }
 0x1b8   : > { %v4649_v11 = vld [vmem:[%s5386_s13 + $0x104] ss:$16 sps:$4 sm:$0xff]   ;;  %v4651_v5 = vld [vmem:[%s5386_s13 + $0x100] ss:$16 sps:$4 sm:$0xff]   ;;  %v6641_v57 = vld [vmem:[#allocation2 + $0x28] sm:$0xff] }
 0x1b9   : > { %v4652_v41 = vld [vmem:[%s5386_s13 + $0x124] ss:$16 sps:$4 sm:$0xff]   ;;  %v4654_v46 = vld [vmem:[%s5386_s13 + $0x120] ss:$16 sps:$4 sm:$0xff]   ;;  %v4684_v8 = vld [vmem:[%s5386_s13 + $0x6c] ss:$16 sps:$4 sm:$0xff]  }
 0x1ba   : > { %1909 = vmatpush1.bf16.msra.mxu1 %v4633_v38  ;;  %v4655_v18 = vld [vmem:[%s5386_s13 + $0x144] ss:$16 sps:$4 sm:$0xff]   ;;  %v4657_v61 = vld [vmem:[%s5386_s13 + $0x140] ss:$16 sps:$4 sm:$0xff]   ;;  %v4682_v22 = vld [vmem:[%s5386_s13 + $0x68] ss:$16 sps:$4 sm:$0xff]  }
 0x1bb   : > { %1910 = vmatprep.subr.bf16.mxu1 %v4634_v26  ;;  %v4658_v47 = vld [vmem:[%s5386_s13 + $0x164] ss:$16 sps:$4 sm:$0xff]   ;;  %v4660_v52 = vld [vmem:[%s5386_s13 + $0x160] ss:$16 sps:$4 sm:$0xff]   ;;  %v4687_v6 = vld [vmem:[%s5386_s13 + $0x8c] ss:$16 sps:$4 sm:$0xff]  }
 0x1bc   : > { %v4661_v49 = vld [vmem:[%s5386_s13 + $0x184] ss:$16 sps:$4 sm:$0xff]   ;;  %v4663_v13 = vld [vmem:[%s5386_s13 + $0x180] ss:$16 sps:$4 sm:$0xff]   ;;  %v4685_v48 = vld [vmem:[%s5386_s13 + $0x88] ss:$16 sps:$4 sm:$0xff]  }
 0x1bd   : > { %v4664_v27 = vld [vmem:[%s5386_s13 + $0x1a4] ss:$16 sps:$4 sm:$0xff]   ;;  %v4666_v31 = vld [vmem:[%s5386_s13 + $0x1a0] ss:$16 sps:$4 sm:$0xff]   ;;  %v6651_v60 = vld [vmem:[#allocation2 + $0x38] sm:$0xff] }
 0x1be   : > { %1911 = vmatpush1.bf16.msra.mxu1 %v4636_v39  ;;  %v4667_v24 = vld [vmem:[%s5386_s13 + $0x1c4] ss:$16 sps:$4 sm:$0xff]   ;;  %v4669_v54 = vld [vmem:[%s5386_s13 + $0x1c0] ss:$16 sps:$4 sm:$0xff]   ;;  %v4690_v23 = vld [vmem:[%s5386_s13 + $0xac] ss:$16 sps:$4 sm:$0xff]  }
 0x1bf   : > { %1912 = vmatprep.subr.bf16.mxu1 %v4637_v59  ;;  %v4670_v36 = vld [vmem:[%s5386_s13 + $0x1e4] ss:$16 sps:$4 sm:$0xff]   ;;  %v4672_v1 = vld [vmem:[%s5386_s13 + $0x1e0] ss:$16 sps:$4 sm:$0xff]   ;;  %v4688_v29 = vld [vmem:[%s5386_s13 + $0xa8] ss:$16 sps:$4 sm:$0xff]  }
 0x1c0   : > { %v6628_v32 = vld [vmem:[#allocation2] sm:$0xff]  ;;  %v6638_v44 = vld [vmem:[#allocation2 + $0x10] sm:$0xff]  ;;  %v4693_v33 = vld [vmem:[%s5386_s13 + $0xcc] ss:$16 sps:$4 sm:$0xff]  }
 0x1c1   : > { %v6648_v14 = vld [vmem:[#allocation2 + $0x20] sm:$0xff]  ;;  %v6658_v2 = vld [vmem:[#allocation2 + $0x30] sm:$0xff]  ;;  %v4691_v55 = vld [vmem:[%s5386_s13 + $0xc8] ss:$16 sps:$4 sm:$0xff]  }
 0x1c2   : > { %1913 = vmatpush1.bf16.msra.mxu1 %v4639_v51  ;;  %v6661_v16 = vld [vmem:[#allocation2 + $0x48] sm:$0xff]  ;;  %v6668_v4 = vld [vmem:[#allocation2 + $0x40] sm:$0xff]  ;;  %v6671_v3 = vld [vmem:[#allocation2 + $0x58] sm:$0xff] }
 0x1c3   : > { %1914 = vmatprep.subr.bf16.mxu1 %v4640_v40  ;;  %v4696_v12 = vld [vmem:[%s5386_s13 + $0xec] ss:$16 sps:$4 sm:$0xff]   ;;  %v4694_v35 = vld [vmem:[%s5386_s13 + $0xe8] ss:$16 sps:$4 sm:$0xff]   ;;  %v6678_v34 = vld [vmem:[#allocation2 + $0x50] sm:$0xff] }
 0x1c4   : > { %v4699_v53 = vld [vmem:[%s5386_s13 + $0x10c] ss:$16 sps:$4 sm:$0xff]   ;;  %v4697_v45 = vld [vmem:[%s5386_s13 + $0x108] ss:$16 sps:$4 sm:$0xff]   ;;  %v6690_v59 = vld [vmem:[#allocation2 + $0x60] sm:$0xff] }
 0x1c5   : > { %v4702_v20 = vld [vmem:[%s5386_s13 + $0x12c] ss:$16 sps:$4 sm:$0xff]   ;;  %v4700_v0 = vld [vmem:[%s5386_s13 + $0x128] ss:$16 sps:$4 sm:$0xff]  }
 0x1c6   : > { %1915 = vmatpush1.bf16.msra.mxu1 %v4642_v19  ;;  %v4705_v37 = vld [vmem:[%s5386_s13 + $0x14c] ss:$16 sps:$4 sm:$0xff]   ;;  %v4703_v28 = vld [vmem:[%s5386_s13 + $0x148] ss:$16 sps:$4 sm:$0xff]  }
 0x1c7   : > { %1916 = vmatprep.subr.bf16.mxu1 %v4643_v58  ;;  %v6681_v50 = vld [vmem:[#allocation2 + $0x68] sm:$0xff]  ;;  %v6693_v40 = vld [vmem:[#allocation2 + $0x78] sm:$0xff] }
 0x1c8   : > { %v4708_v10 = vld [vmem:[%s5386_s13 + $0x16c] ss:$16 sps:$4 sm:$0xff]   ;;  %v4723_v38 = vld [vmem:[%s5384_s9] ss:$8 sps:$4 sm:$0xff]  }
 0x1c9   : > { %v4721_v30 = vld [vmem:[%s5384_s9 + $0x4] ss:$8 sps:$4 sm:$0xff]   ;;  %v4706_v26 = vld [vmem:[%s5386_s13 + $0x168] ss:$16 sps:$4 sm:$0xff]   ;;  %v4724_v58 = vld [vmem:[%s5384_s9 + $0x14] ss:$8 sps:$4 sm:$0xff]  }
 0x1ca   : > { %1917 = vmatpush1.bf16.msra.mxu1 %v4645_v56  ;;  %v4711_v39 = vld [vmem:[%s5386_s13 + $0x18c] ss:$16 sps:$4 sm:$0xff]   ;;  %3442 = vmatprep.subr.bf16.mxu0 %v4721_v30  ;;  %v4709_v51 = vld [vmem:[%s5386_s13 + $0x188] ss:$16 sps:$4 sm:$0xff]  }
 0x1cb   : > { %1918 = vmatprep.subr.bf16.mxu1 %v4646_v42  ;;  %3443 = vmatpush1.bf16.msra.mxu0 %v4723_v38  ;;  %v4714_v19 = vld [vmem:[%s5386_s13 + $0x1ac] ss:$16 sps:$4 sm:$0xff]   ;;  %v4726_v56 = vld [vmem:[%s5384_s9 + $0x10] ss:$8 sps:$4 sm:$0xff]   ;;  %v4765_v38 = vld [vmem:[%s5384_s9 + $0xe0] ss:$8 sps:$4 sm:$0xff]  }
 0x1cc   : > { %v4727_v42 = vld [vmem:[%s5384_s9 + $0x24] ss:$8 sps:$4 sm:$0xff]   ;;  %3444 = vmatprep.subr.bf16.mxu0 %v4724_v58 }
 0x1cd   : > { %v4763_v30 = vld [vmem:[%s5384_s9 + $0xe4] ss:$8 sps:$4 sm:$0xff]  }
 0x1ce   : > { %1919 = vmatpush1.bf16.msra.mxu1 %v4648_v25  ;;  %v4712_v25 = vld [vmem:[%s5386_s13 + $0x1a8] ss:$16 sps:$4 sm:$0xff]   ;;  %v6775_v58 = vld [vmem:[#allocation2 + $0xe0] sm:$0xff] }
 0x1cf   : > { %1920 = vmatprep.subr.bf16.mxu1 %v4649_v11  ;;  %v4717_v11 = vld [vmem:[%s5386_s13 + $0x1cc] ss:$16 sps:$4 sm:$0xff]   ;;  %3445 = vmatpush1.bf16.msra.mxu0 %v4726_v56 }
 0x1d0   : > { %3446 = vmatprep.subr.bf16.mxu0 %v4727_v42  ;;  %v6777_v56 = vld [vmem:[#allocation2 + $0xf8] sm:$0xff]  ;;  %v6781_v42 = vld [vmem:[#allocation2 + $0xf0] sm:$0xff] }
 0x1d2   : > { %1921 = vmatpush1.bf16.msra.mxu1 %v4651_v5  ;;  %v4729_v5 = vld [vmem:[%s5384_s9 + $0x20] ss:$8 sps:$4 sm:$0xff]  }
 0x1d3   : > { %1922 = vmatprep.subr.bf16.mxu1 %v4652_v41  ;;  %v6704_v41 = vld [vmem:[#allocation2 + $0x70] sm:$0xff]  ;;  %3447 = vmatpush1.bf16.msra.mxu0 %v4729_v5 }
 0x1d6   : > { %1923 = vmatpush1.bf16.msra.mxu1 %v4654_v46  ;;  %v4715_v46 = vld [vmem:[%s5386_s13 + $0x1c8] ss:$16 sps:$4 sm:$0xff]  }
 0x1d7   : > { %1924 = vmatprep.subr.bf16.mxu1 %v4655_v18  ;;  %v6707_v18 = vld [vmem:[#allocation2 + $0x88] sm:$0xff] }
 0x1da   : > { %1925 = vmatpush1.bf16.msra.mxu1 %v4657_v61  ;;  %v4720_v61 = vld [vmem:[%s5386_s13 + $0x1ec] ss:$16 sps:$4 sm:$0xff]  }
 0x1db   : > { %1926 = vmatprep.subr.bf16.mxu1 %v4658_v47  ;;  %v4730_v47 = vld [vmem:[%s5384_s9 + $0x34] ss:$8 sps:$4 sm:$0xff]  }
 0x1dc   : > { %3448 = vmatprep.subr.bf16.mxu0 %v4730_v47 }
 0x1de   : > { %1927 = vmatpush1.bf16.msra.mxu1 %v4660_v52  ;;  %v4732_v52 = vld [vmem:[%s5384_s9 + $0x30] ss:$8 sps:$4 sm:$0xff]  }
 0x1df   : > { %1928 = vmatprep.subr.bf16.mxu1 %v4661_v49  ;;  %v4733_v49 = vld [vmem:[%s5384_s9 + $0x44] ss:$8 sps:$4 sm:$0xff]   ;;  %3449 = vmatpush1.bf16.msra.mxu0 %v4732_v52 }
 0x1e0   : > { %3450 = vmatprep.subr.bf16.mxu0 %v4733_v49 }
 0x1e2   : > { %1929 = vmatpush1.bf16.msra.mxu1 %v4663_v13  ;;  %v4718_v13 = vld [vmem:[%s5386_s13 + $0x1e8] ss:$16 sps:$4 sm:$0xff]  }
 0x1e3   : > { %1930 = vmatprep.subr.bf16.mxu1 %v4664_v27  ;;  %v4735_v27 = vld [vmem:[%s5384_s9 + $0x40] ss:$8 sps:$4 sm:$0xff]  }
 0x1e4   : > { %3451 = vmatpush1.bf16.msra.mxu0 %v4735_v27 }
 0x1e6   : > { %1931 = vmatpush1.bf16.msra.mxu1 %v4666_v31  ;;  %v6717_v31 = vld [vmem:[#allocation2 + $0x80] sm:$0xff] }
 0x1e7   : > { %1932 = vmatprep.subr.bf16.mxu1 %v4667_v24  ;;  %v6719_v24 = vld [vmem:[#allocation2 + $0x98] sm:$0xff] }
 0x1ea   : > { %1933 = vmatpush1.bf16.msra.mxu1 %v4669_v54  ;;  %v4736_v54 = vld [vmem:[%s5384_s9 + $0x54] ss:$8 sps:$4 sm:$0xff]  }
 0x1eb   : > { %1934 = vmatprep.subr.bf16.mxu1 %v4670_v36  ;;  %v4738_v36 = vld [vmem:[%s5384_s9 + $0x50] ss:$8 sps:$4 sm:$0xff]   ;;  %3452 = vmatprep.subr.bf16.mxu0 %v4736_v54 }
 0x1ec   : > { %3453 = vmatpush1.bf16.msra.mxu0 %v4738_v36 }
 0x1ee   : > { %1935 = vmatpush1.bf16.msra.mxu1 %v4672_v1  ;;  %v4739_v1 = vld [vmem:[%s5384_s9 + $0x64] ss:$8 sps:$4 sm:$0xff]  }
 0x1ef   : > { %2097 = vmatprep.subr.bf16.mxu1 %v4675_v63  ;;  %v4741_v63 = vld [vmem:[%s5384_s9 + $0x60] ss:$8 sps:$4 sm:$0xff]   ;;  %3454 = vmatprep.subr.bf16.mxu0 %v4739_v1 }
 0x1f0   : > { %3455 = vmatpush1.bf16.msra.mxu0 %v4741_v63 }
 0x1f1   : > { %1937 = vmatmul.mubr.bf16.vlgmr.msra.gmra.mrb[0].mxu1 %v6628_v32 }
 0x1f2   : > { %2098 = vmatpush1.bf16.msra.mxu1 %v4673_v43  ;;  %1946 = vmatprep.mubr.bf16.mxu1 %v6631_v62  ;;  %v6727_v43 = vld [vmem:[#allocation2 + $0x90] sm:$0xff] }
 0x1f3   : > { %2099 = vmatprep.subr.bf16.mxu1 %v4678_v21  ;;  %v6729_v21 = vld [vmem:[#allocation2 + $0xa8] sm:$0xff] }
 0x1f6   : > { %2100 = vmatpush1.bf16.msra.mxu1 %v4676_v7  ;;  %v4742_v7 = vld [vmem:[%s5384_s9 + $0x74] ss:$8 sps:$4 sm:$0xff]  }
 0x1f7   : > { %2101 = vmatprep.subr.bf16.mxu1 %v4681_v17  ;;  %v4744_v17 = vld [vmem:[%s5384_s9 + $0x70] ss:$8 sps:$4 sm:$0xff]   ;;  %3456 = vmatprep.subr.bf16.mxu0 %v4742_v7 }
 0x1f8   : > { %3457 = vmatpush1.bf16.msra.mxu0 %v4744_v17 }
 0x1f9   : > { %1947 = vmatmul.mubr.bf16.gmra.mrb[4].mxu1 %v6638_v44 }
 0x1fa   : > { %1956 = vmatprep.mubr.bf16.mxu1 %v6641_v57  ;;  %2102 = vmatpush1.bf16.msra.mxu1 %v4679_v9  ;;  %v4745_v9 = vld [vmem:[%s5384_s9 + $0x84] ss:$8 sps:$4 sm:$0xff]  }
 0x1fb   : > { %2103 = vmatprep.subr.bf16.mxu1 %v4684_v8  ;;  %v4747_v8 = vld [vmem:[%s5384_s9 + $0x80] ss:$8 sps:$4 sm:$0xff]   ;;  %3458 = vmatprep.subr.bf16.mxu0 %v4745_v9 }
 0x1fc   : > { %3459 = vmatpush1.bf16.msra.mxu0 %v4747_v8 }
 0x1fe   : > { %2104 = vmatpush1.bf16.msra.mxu1 %v4682_v22  ;;  %v6737_v22 = vld [vmem:[#allocation2 + $0xa0] sm:$0xff] }
 0x1ff   : > { %2105 = vmatprep.subr.bf16.mxu1 %v4687_v6  ;;  %v6739_v6 = vld [vmem:[#allocation2 + $0xb8] sm:$0xff] }
 0x201   : > { %1957 = vmatmul.mubr.bf16.gmra.mrb[8].mxu1 %v6648_v14 }
 0x202   : > { %1966 = vmatprep.mubr.bf16.mxu1 %v6651_v60  ;;  %2106 = vmatpush1.bf16.msra.mxu1 %v4685_v48  ;;  %v4748_v48 = vld [vmem:[%s5384_s9 + $0x94] ss:$8 sps:$4 sm:$0xff]  }
 0x203   : > { %2107 = vmatprep.subr.bf16.mxu1 %v4690_v23  ;;  %v4750_v23 = vld [vmem:[%s5384_s9 + $0x90] ss:$8 sps:$4 sm:$0xff]   ;;  %3460 = vmatprep.subr.bf16.mxu0 %v4748_v48 }
 0x204   : > { %3461 = vmatpush1.bf16.msra.mxu0 %v4750_v23 }
 0x206   : > { %2108 = vmatpush1.bf16.msra.mxu1 %v4688_v29  ;;  %v4751_v29 = vld [vmem:[%s5384_s9 + $0xa4] ss:$8 sps:$4 sm:$0xff]  }
 0x207   : > { %2109 = vmatprep.subr.bf16.mxu1 %v4693_v33  ;;  %v4753_v33 = vld [vmem:[%s5384_s9 + $0xa0] ss:$8 sps:$4 sm:$0xff]   ;;  %3462 = vmatprep.subr.bf16.mxu0 %v4751_v29 }
 0x208   : > { %3463 = vmatpush1.bf16.msra.mxu0 %v4753_v33 }
 0x209   : > { %1967 = vmatmul.mubr.bf16.gmra.mrb[12].mxu1 %v6658_v2 }
 0x20a   : > { %1976 = vmatprep.mubr.bf16.mxu1 %v6661_v16  ;;  %2110 = vmatpush1.bf16.msra.mxu1 %v4691_v55  ;;  %v6747_v55 = vld [vmem:[#allocation2 + $0xb0] sm:$0xff] }
 0x20b   : > { %2111 = vmatprep.subr.bf16.mxu1 %v4696_v12  ;;  %v6749_v12 = vld [vmem:[#allocation2 + $0xc8] sm:$0xff] }
 0x20e   : > { %2112 = vmatpush1.bf16.msra.mxu1 %v4694_v35  ;;  %v4754_v35 = vld [vmem:[%s5384_s9 + $0xb4] ss:$8 sps:$4 sm:$0xff]  }
 0x20f   : > { %2113 = vmatprep.subr.bf16.mxu1 %v4699_v53  ;;  %v4756_v53 = vld [vmem:[%s5384_s9 + $0xb0] ss:$8 sps:$4 sm:$0xff]   ;;  %3464 = vmatprep.subr.bf16.mxu0 %v4754_v35 }
 0x210   : > { %3465 = vmatpush1.bf16.msra.mxu0 %v4756_v53 }
 0x211   : > { %1977 = vmatmul.mubr.bf16.gmra.mrb[16].mxu1 %v6668_v4 }
 0x212   : > { %1986 = vmatprep.mubr.bf16.mxu1 %v6671_v3  ;;  %2114 = vmatpush1.bf16.msra.mxu1 %v4697_v45  ;;  %v4757_v45 = vld [vmem:[%s5384_s9 + $0xc4] ss:$8 sps:$4 sm:$0xff]  }
 0x213   : > { %2115 = vmatprep.subr.bf16.mxu1 %v4702_v20  ;;  %v4759_v20 = vld [vmem:[%s5384_s9 + $0xc0] ss:$8 sps:$4 sm:$0xff]   ;;  %3466 = vmatprep.subr.bf16.mxu0 %v4757_v45 }
 0x214   : > { %3467 = vmatpush1.bf16.msra.mxu0 %v4759_v20 }
 0x216   : > { %2116 = vmatpush1.bf16.msra.mxu1 %v4700_v0  ;;  %v6757_v0 = vld [vmem:[#allocation2 + $0xc0] sm:$0xff] }
 0x217   : > { %2117 = vmatprep.subr.bf16.mxu1 %v4705_v37  ;;  %v6759_v37 = vld [vmem:[#allocation2 + $0xd8] sm:$0xff] }
 0x219   : > { %1987 = vmatmul.mubr.bf16.gmra.mrb[20].mxu1 %v6678_v34 }
 0x21a   : > { %1996 = vmatprep.mubr.bf16.mxu1 %v6681_v50  ;;  %2118 = vmatpush1.bf16.msra.mxu1 %v4703_v28  ;;  %v4760_v28 = vld [vmem:[%s5384_s9 + $0xd4] ss:$8 sps:$4 sm:$0xff]  }
 0x21b   : > { %2119 = vmatprep.subr.bf16.mxu1 %v4708_v10  ;;  %v4762_v10 = vld [vmem:[%s5384_s9 + $0xd0] ss:$8 sps:$4 sm:$0xff]   ;;  %3468 = vmatprep.subr.bf16.mxu0 %v4760_v28 }
 0x21c   : > { %3469 = vmatpush1.bf16.msra.mxu0 %v4762_v10 }
 0x21d   : > { %3470 = vmatprep.subr.bf16.mxu0 %v4763_v30 }
 0x21e   : > { %2120 = vmatpush1.bf16.msra.mxu1 %v4706_v26  ;;  %v6767_v26 = vld [vmem:[#allocation2 + $0xd0] sm:$0xff] }
 0x21f   : > { %2121 = vmatprep.subr.bf16.mxu1 %v4711_v39  ;;  %v6769_v39 = vld [vmem:[#allocation2 + $0xe8] sm:$0xff] }
 0x220   : > { %3471 = vmatpush1.bf16.msra.mxu0 %v4765_v38 }
 0x221   : > { %1997 = vmatmul.mubr.bf16.gmra.mrb[24].mxu1 %v6690_v59 }
 0x222   : > { %2006 = vmatprep.mubr.bf16.mxu1 %v6693_v40  ;;  %2122 = vmatpush1.bf16.msra.mxu1 %v4709_v51  ;;  %v4766_v51 = vld [vmem:[%s5384_s9 + $0xf4] ss:$8 sps:$4 sm:$0xff]  }
 0x223   : > { %2123 = vmatprep.subr.bf16.mxu1 %v4714_v19  ;;  %v4768_v19 = vld [vmem:[%s5384_s9 + $0xf0] ss:$8 sps:$4 sm:$0xff]   ;;  %3472 = vmatprep.subr.bf16.mxu0 %v4766_v51 }
 0x224   : > { %3473 = vmatpush1.bf16.msra.mxu0 %v4768_v19 }
 0x226   : > { %2124 = vmatpush1.bf16.msra.mxu1 %v4712_v25  ;;  %v4771_v25 = vld [vmem:[%s5384_s9 + $0x104] ss:$8 sps:$4 sm:$0xff]  }
 0x227   : > { %2125 = vmatprep.subr.bf16.mxu1 %v4717_v11  ;;  %3635 = vmatprep.subr.bf16.mxu0 %v4771_v25 }
 0x229   : > { %2007 = vmatmul.mubr.bf16.gmra.mrb[28].mxu1 %v6704_v41 }
 0x22a   : > { %2016 = vmatprep.mubr.bf16.mxu1 %v6707_v18  ;;  %2126 = vmatpush1.bf16.msra.mxu1 %v4715_v46 }
 0x22b   : > { %2127 = vmatprep.subr.bf16.mxu1 %v4720_v61 }
 0x22e   : > { %2128 = vmatpush1.bf16.msra.mxu1 %v4718_v13 }
 0x231   : > { %2017 = vmatmul.mubr.bf16.gmra.mrb[32].mxu1 %v6717_v31 }
 0x232   : > { %2026 = vmatprep.mubr.bf16.mxu1 %v6719_v24 }
 0x239   : > { %2027 = vmatmul.mubr.bf16.gmra.mrb[36].mxu1 %v6727_v43 }
 0x23a   : > { %2036 = vmatprep.mubr.bf16.mxu1 %v6729_v21 }
 0x241   : > { %2037 = vmatmul.mubr.bf16.gmra.mrb[40].mxu1 %v6737_v22 }
 0x242   : > { %2046 = vmatprep.mubr.bf16.mxu1 %v6739_v6 }
 0x249   : > { %2047 = vmatmul.mubr.bf16.gmra.mrb[44].mxu1 %v6747_v55 }
 0x24a   : > { %2056 = vmatprep.mubr.bf16.mxu1 %v6749_v12 }
 0x251   : > { %2057 = vmatmul.mubr.bf16.gmra.mrb[48].mxu1 %v6757_v0 }
 0x252   : > { %2066 = vmatprep.mubr.bf16.mxu1 %v6759_v37 }
 0x259   : > { %2067 = vmatmul.mubr.bf16.gmra.mrb[52].mxu1 %v6767_v26 }
 0x25a   : > { %2076 = vmatprep.mubr.bf16.mxu1 %v6769_v39 }
 0x261   : > { %2077 = vmatmul.mubr.bf16.gmra.mrb[56].mxu1 %v6775_v58 }
 0x262   : > { %2086 = vmatprep.mubr.bf16.mxu1 %v6777_v56 }
 0x269   : > { %2087 = vmatmul.mubr.bf16.gmra.mrb[60].mxu1 %v6781_v42 }
 0x26a   : > { %2129 = vmatprep.mubr.bf16.mxu1 %v6605_v15  ;;  %v1564_v15 = vlaneseq }
 0x271   : > { %2130 = vmatmul.mubr.bf16.vlgmr.msra.gmra.mrb[64].mxu1 %v6628_v32  ;;  %v6805_v32 = vshrl.u32 %v1564_v15, 7 }
 0x272   : > { %2139 = vmatprep.mubr.bf16.mxu1 %v6631_v62 }
 0x273   : > { %v1566_v62 = vsub.s32 0, %v6805_v32 }
 0x279   : > { %2140 = vmatmul.mubr.bf16.gmra.mrb[68].mxu1 %v6638_v44  ;;  %v1562_v44 = vld [vmem:[%s5379_s19] sm:$0xf] }
 0x27a   : > { %2149 = vmatprep.mubr.bf16.mxu1 %v6641_v57  ;;  %v1570_v57 = vsub.s32 1, %v6805_v32 }
 0x281   : > { %2150 = vmatmul.mubr.bf16.gmra.mrb[72].mxu1 %v6648_v14  ;;  %v6814_v14 = vrot.slane %v1562_v44, %v1566_v62 }
 0x282   : > { %2159 = vmatprep.mubr.bf16.mxu1 %v6651_v60  ;;  %v6818_v60 = vrot.slane %v1562_v44, %v1570_v57 }
 0x289   : > { %2160 = vmatmul.mubr.bf16.gmra.mrb[76].mxu1 %v6658_v2 }
 0x28a   : > { %2169 = vmatprep.mubr.bf16.mxu1 %v6661_v16 }
 0x291   : > { %2170 = vmatmul.mubr.bf16.gmra.mrb[80].mxu1 %v6668_v4 }
 0x292   : > { %2179 = vmatprep.mubr.bf16.mxu1 %v6671_v3 }
 0x299   : > { %2180 = vmatmul.mubr.bf16.gmra.mrb[84].mxu1 %v6678_v34 }
 0x29a   : > { %2189 = vmatprep.mubr.bf16.mxu1 %v6681_v50 }
 0x2a1   : > { %2190 = vmatmul.mubr.bf16.gmra.mrb[88].mxu1 %v6690_v59 }
 0x2a2   : > { %2199 = vmatprep.mubr.bf16.mxu1 %v6693_v40 }
 0x2a9   : > { %2200 = vmatmul.mubr.bf16.gmra.mrb[92].mxu1 %v6704_v41 }
 0x2aa   : > { %2209 = vmatprep.mubr.bf16.mxu1 %v6707_v18 }
 0x2b1   : > { %2210 = vmatmul.mubr.bf16.gmra.mrb[96].mxu1 %v6717_v31 }
 0x2b2   : > { %2219 = vmatprep.mubr.bf16.mxu1 %v6719_v24 }
 0x2b9   : > { %2220 = vmatmul.mubr.bf16.gmra.mrb[100].mxu1 %v6727_v43 }
 0x2ba   : > { %2229 = vmatprep.mubr.bf16.mxu1 %v6729_v21 }
 0x2c1   : > { %2230 = vmatmul.mubr.bf16.gmra.mrb[104].mxu1 %v6737_v22 }
 0x2c2   : > { %2239 = vmatprep.mubr.bf16.mxu1 %v6739_v6 }
 0x2c4   : > { %v1938_v2 = vpop.f32.mrb[0].mxu1 }
 0x2c5   : > { %v1939_v16 = vadd.f32 %v1938_v2, %v6814_v14  ;;  %v1940_v4 = vpop.f32.mrb[1].mxu1 }
 0x2c6   : > { %v1941_v3 = vadd.f32 %v1940_v4, %v6818_v60  ;;  %v1942_v34 = vpop.f32.mrb[2].mxu1 }
 0x2c7   : > { %v2418_v50 = vmul.f32 0.70710677, %v1939_v16  ;;  %v1943_v59 = vadd.f32 %v1942_v34, %v6814_v14  ;;  %v1944_v40 = vpop.f32.mrb[3].mxu1  ;;  %v2290_v17 = vmul.f32 0.5, %v1939_v16  ;;  %v4769_v34 = vld [vmem:[%s5384_s9 + $0x100] ss:$8 sps:$4 sm:$0xff]  }
 0x2c8   : > { %v2419_v11 = vmul.f32 0.70710677, %v1941_v3  ;;  %v1945_v5 = vadd.f32 %v1944_v40, %v6818_v60 }
 0x2c9   : > { %4817 = verf.f32 %v2418_v50  ;;  %v2422_v41 = vmul.f32 0.70710677, %v1943_v59  ;;  %2240 = vmatmul.mubr.bf16.gmra.mrb[108].mxu1 %v6747_v55  ;;  %v2294_v48 = vmul.f32 0.5, %v1943_v59 }
 0x2ca   : > { %4819 = verf.f32 %v2419_v11  ;;  %v2423_v46 = vmul.f32 0.70710677, %v1945_v5  ;;  %2249 = vmatprep.mubr.bf16.mxu1 %v6749_v12  ;;  %v2291_v12 = vmul.f32 0.5, %v1941_v3  ;;  %v4774_v11 = vld [vmem:[%s5384_s9 + $0x114] ss:$8 sps:$4 sm:$0xff]  }
 0x2cb   : > { %4821 = verf.f32 %v2422_v41 }
 0x2cc   : > { %4823 = verf.f32 %v2423_v46  ;;  %v1948_v18 = vpop.f32.mrb[4].mxu1 }
 0x2cd   : > { %v6828_v61 = vadd.f32 %v1948_v18, %v6814_v14  ;;  %v1950_v47 = vpop.f32.mrb[5].mxu1 }
 0x2ce   : > { %v6831_v52 = vadd.f32 %v1950_v47, %v6818_v60  ;;  %v1952_v49 = vpop.f32.mrb[6].mxu1 }
 0x2cf   : > { %v2426_v13 = vmul.f32 0.70710677, %v6828_v61  ;;  %v1953_v27 = vadd.f32 %v1952_v49, %v6814_v14  ;;  %v1954_v31 = vpop.f32.mrb[7].mxu1  ;;  %v2298_v41 = vmul.f32 0.5, %v6828_v61 }
 0x2d0   : > { %v2427_v24 = vmul.f32 0.70710677, %v6831_v52  ;;  %v1955_v54 = vadd.f32 %v1954_v31, %v6818_v60  ;;  %v2299_v49 = vmul.f32 0.5, %v6831_v52 }
 0x2d1   : > { %4825 = verf.f32 %v2426_v13  ;;  %v2430_v36 = vmul.f32 0.70710677, %v1953_v27  ;;  %2250 = vmatmul.mubr.bf16.gmra.mrb[112].mxu1 %v6757_v0 }
 0x2d2   : > { %4827 = verf.f32 %v2427_v24  ;;  %v2431_v1 = vmul.f32 0.70710677, %v1955_v54  ;;  %2259 = vmatprep.mubr.bf16.mxu1 %v6759_v37  ;;  %v2295_v37 = vmul.f32 0.5, %v1945_v5  ;;  %v2303_v13 = vmul.f32 0.5, %v1955_v54  ;;  %v4777_v54 = vld [vmem:[%s5384_s9 + $0x124] ss:$8 sps:$4 sm:$0xff]  }
 0x2d3   : > { %v4818_v63 = vpop.eup %4817  ;;  %4829 = verf.f32 %v2430_v36 }
 0x2d4   : > { %v4820_v43 = vpop.eup %4819  ;;  %4831 = verf.f32 %v2431_v1  ;;  %v1958_v21 = vpop.f32.mrb[8].mxu1  ;;  %v2674_v9 = vadd.f32 1.0, %v4818_v63 }
 0x2d5   : > { %v4822_v7 = vpop.eup %4821  ;;  %v6840_v8 = vadd.f32 %v1958_v21, %v6814_v14  ;;  %v1960_v22 = vpop.f32.mrb[9].mxu1  ;;  %v2675_v55 = vadd.f32 1.0, %v4820_v43  ;;  %v4772_v43 = vld [vmem:[%s5384_s9 + $0x110] ss:$8 sps:$4 sm:$0xff]  }
 0x2d6   : > { %v4824_v6 = vpop.eup %4823  ;;  %v2678_v23 = vadd.f32 1.0, %v4822_v7  ;;  %v6843_v29 = vadd.f32 %v1960_v22, %v6818_v60  ;;  %v1962_v33 = vpop.f32.mrb[10].mxu1  ;;  %v2802_v30 = vmul.f32 %v2674_v9, %v2290_v17 }
 0x2d7   : > { %v2434_v35 = vmul.f32 0.70710677, %v6840_v8  ;;  %v6847_v53 = vadd.f32 %v1962_v33, %v6814_v14  ;;  %v1964_v45 = vpop.f32.mrb[11].mxu1  ;;  %v2679_v20 = vadd.f32 1.0, %v4824_v6  ;;  %v2803_v19 = vmul.f32 %v2675_v55, %v2291_v12  ;;  %v4775_v12 = vld [vmem:[%s5384_s9 + $0x120] ss:$8 sps:$4 sm:$0xff]  }
 0x2d8   : > { %v2806_v0 = vmul.f32 %v2678_v23, %v2294_v48  ;;  %v2435_v28 = vmul.f32 0.70710677, %v6843_v29  ;;  %v6851_v10 = vadd.f32 %v1964_v45, %v6818_v60 }
 0x2d9   : > { %4833 = verf.f32 %v2434_v35  ;;  %v2438_v38 = vmul.f32 0.70710677, %v6847_v53  ;;  %2260 = vmatmul.mubr.bf16.gmra.mrb[116].mxu1 %v6767_v26  ;;  %v2807_v25 = vmul.f32 %v2679_v20, %v2295_v37  ;;  %v2306_v37 = vmul.f32 0.5, %v6840_v8 }
 0x2da   : > { %4835 = verf.f32 %v2435_v28  ;;  %v2439_v51 = vmul.f32 0.70710677, %v6851_v10  ;;  %2269 = vmatprep.mubr.bf16.mxu1 %v6769_v39  ;;  %v2994_v44 = vpack.c.bf16 %v2806_v0, %v2802_v30  ;;  %v2302_v39 = vmul.f32 0.5, %v1953_v27 }
 0x2db   : > { %v4826_v15 = vpop.eup %4825  ;;  %4837 = verf.f32 %v2438_v38  ;;  %v2995_v3 = vpack.c.bf16 %v2807_v25, %v2803_v19  ;;  %v2310_v28 = vmul.f32 0.5, %v6847_v53  ;;  %v2307_v19 = vmul.f32 0.5, %v6843_v29 }
 0x2dc   : > { %v4828_v2 = vpop.eup %4827  ;;  %v2682_v16 = vadd.f32 1.0, %v4826_v15  ;;  %4839 = verf.f32 %v2439_v51  ;;  %v1968_v4 = vpop.f32.mrb[12].mxu1  ;;  %v2311_v25 = vmul.f32 0.5, %v6851_v10  ;;  %v4783_v10 = vld [vmem:[%s5384_s9 + $0x144] ss:$8 sps:$4 sm:$0xff]  }
 0x2dd   : > { %v4830_v50 = vpop.eup %4829  ;;  %v2683_v59 = vadd.f32 1.0, %v4828_v2  ;;  %v6859_v26 = vadd.f32 %v1968_v4, %v6814_v14  ;;  %v1970_v40 = vpop.f32.mrb[13].mxu1  ;;  %3474 = vmatprep.mubr.bf16.mxu0 %v2995_v3  ;;  %v4778_v3 = vld [vmem:[%s5384_s9 + $0x130] ss:$8 sps:$4 sm:$0xff]  }
 0x2de   : > { %v4832_v5 = vpop.eup %4831  ;;  %v2686_v46 = vadd.f32 1.0, %v4830_v50  ;;  %v6864_v18 = vadd.f32 %v1970_v40, %v6818_v60  ;;  %v1972_v47 = vpop.f32.mrb[14].mxu1  ;;  %3475 = vmatmul.mubr.bf16.vlgmr.msra.gmra.mrb[0].mxu0 %v2994_v44  ;;  %v2810_v1 = vmul.f32 %v2682_v16, %v2298_v41 }
 0x2df   : > { %v2687_v31 = vadd.f32 1.0, %v4832_v5  ;;  %v2442_v24 = vmul.f32 0.70710677, %v6859_v26  ;;  %v1974_v36 = vpop.f32.mrb[15].mxu1  ;;  %v6870_v27 = vadd.f32 %v1972_v47, %v6814_v14  ;;  %3636 = vmatpush1.bf16.msra.mxu0 %v4769_v34  ;;  %v2811_v21 = vmul.f32 %v2683_v59, %v2299_v49  ;;  %v4781_v47 = vld [vmem:[%s5384_s9 + $0x140] ss:$8 sps:$4 sm:$0xff]  }
 0x2e0   : > { %v2814_v63 = vmul.f32 %v2686_v46, %v2302_v39  ;;  %v2443_v61 = vmul.f32 0.70710677, %v6864_v18  ;;  %v6874_v52 = vadd.f32 %v1974_v36, %v6818_v60  ;;  %3637 = vmatprep.subr.bf16.mxu0 %v4774_v11  ;;  %v2314_v36 = vmul.f32 0.5, %v6859_v26 }
 0x2e1   : > { %v2815_v7 = vmul.f32 %v2687_v31, %v2303_v13  ;;  %4841 = verf.f32 %v2442_v24  ;;  %2270 = vmatmul.mubr.bf16.gmra.mrb[120].mxu1 %v6775_v58  ;;  %v2446_v17 = vmul.f32 0.70710677, %v6870_v27  ;;  %v4786_v31 = vld [vmem:[%s5384_s9 + $0x154] ss:$8 sps:$4 sm:$0xff]  }
 0x2e2   : > { %4843 = verf.f32 %v2443_v61  ;;  %v2998_v9 = vpack.c.bf16 %v2814_v63, %v2810_v1  ;;  %2279 = vmatprep.mubr.bf16.mxu1 %v6777_v56  ;;  %v2447_v6 = vmul.f32 0.70710677, %v6874_v52  ;;  %v4780_v56 = vld [vmem:[%s5384_s9 + $0x134] ss:$8 sps:$4 sm:$0xff]  }
 0x2e3   : > { %v4834_v22 = vpop.eup %4833  ;;  %v2999_v48 = vpack.c.bf16 %v2815_v7, %v2811_v21  ;;  %4845 = verf.f32 %v2446_v17  ;;  %3638 = vmatpush1.bf16.msra.mxu0 %v4772_v43  ;;  %v2315_v21 = vmul.f32 0.5, %v6864_v18  ;;  %v2318_v7 = vmul.f32 0.5, %v6870_v27 }
 0x2e4   : > { %v4836_v23 = vpop.eup %4835  ;;  %v2690_v33 = vadd.f32 1.0, %v4834_v22  ;;  %v1978_v55 = vpop.f32.mrb[16].mxu1  ;;  %4847 = verf.f32 %v2447_v6  ;;  %3639 = vmatprep.subr.bf16.mxu0 %v4777_v54  ;;  %v2319_v22 = vmul.f32 0.5, %v6874_v52 }
 0x2e5   : > { %v4838_v58 = vpop.eup %4837  ;;  %v2691_v35 = vadd.f32 1.0, %v4836_v23  ;;  %v6883_v45 = vadd.f32 %v1978_v55, %v6814_v14  ;;  %v1980_v20 = vpop.f32.mrb[17].mxu1  ;;  %3484 = vmatprep.mubr.bf16.mxu0 %v2999_v48  ;;  %v4784_v23 = vld [vmem:[%s5384_s9 + $0x150] ss:$8 sps:$4 sm:$0xff]   ;;  %v4789_v55 = vld [vmem:[%s5384_s9 + $0x164] ss:$8 sps:$4 sm:$0xff]  }
 0x2e6   : > { %v4840_v0 = vpop.eup %4839  ;;  %v2694_v30 = vadd.f32 1.0, %v4838_v58  ;;  %v6889_v38 = vadd.f32 %v1980_v20, %v6818_v60  ;;  %v1982_v51 = vpop.f32.mrb[18].mxu1  ;;  %3485 = vmatmul.mubr.bf16.gmra.mrb[4].mxu0 %v2998_v9  ;;  %v2818_v16 = vmul.f32 %v2690_v33, %v2306_v37 }
 0x2e7   : > { %v2695_v15 = vadd.f32 1.0, %v4840_v0  ;;  %v2450_v44 = vmul.f32 0.70710677, %v6883_v45  ;;  %v1984_v2 = vpop.f32.mrb[19].mxu1  ;;  %v6896_v53 = vadd.f32 %v1982_v51, %v6814_v14  ;;  %3640 = vmatpush1.bf16.msra.mxu0 %v4775_v12  ;;  %v2819_v34 = vmul.f32 %v2691_v35, %v2307_v19 }
 0x2e8   : > { %v2822_v8 = vmul.f32 %v2694_v30, %v2310_v28  ;;  %v2451_v4 = vmul.f32 0.70710677, %v6889_v38  ;;  %v6900_v29 = vadd.f32 %v1984_v2, %v6818_v60  ;;  %3641 = vmatprep.subr.bf16.mxu0 %v4780_v56  ;;  %v4787_v30 = vld [vmem:[%s5384_s9 + $0x160] ss:$8 sps:$4 sm:$0xff]   ;;  %v2322_v2 = vmul.f32 0.5, %v6883_v45 }
 0x2e9   : > { %v2823_v50 = vmul.f32 %v2695_v15, %v2311_v25  ;;  %4849 = verf.f32 %v2450_v44  ;;  %2280 = vmatmul.mubr.bf16.gmra.mrb[124].mxu1 %v6781_v42  ;;  %v2454_v59 = vmul.f32 0.70710677, %v6896_v53  ;;  %v4792_v15 = vld [vmem:[%s5384_s9 + $0x174] ss:$8 sps:$4 sm:$0xff]  }
 0x2ea   : > { %4851 = verf.f32 %v2451_v4  ;;  %v3002_v40 = vpack.c.bf16 %v2822_v8, %v2818_v16  ;;  %v2455_v5 = vmul.f32 0.70710677, %v6900_v29  ;;  %v2327_v45 = vmul.f32 0.5, %v6900_v29 }
 0x2eb   : > { %v4842_v11 = vpop.eup %4841  ;;  %v3003_v41 = vpack.c.bf16 %v2823_v50, %v2819_v34  ;;  %4853 = verf.f32 %v2454_v59  ;;  %3642 = vmatpush1.bf16.msra.mxu0 %v4778_v3  ;;  %v2323_v34 = vmul.f32 0.5, %v6889_v38  ;;  %v2326_v50 = vmul.f32 0.5, %v6896_v53 }
 0x2ec   : > { %v4844_v39 = vpop.eup %4843  ;;  %v1988_v46 = vpop.f32.mrb[20].mxu1  ;;  %v2698_v49 = vadd.f32 1.0, %v4842_v11  ;;  %4855 = verf.f32 %v2455_v5  ;;  %3643 = vmatprep.subr.bf16.mxu0 %v4783_v10 }
 0x2ed   : > { %v6908_v42 = vadd.f32 %v1988_v46, %v6814_v14  ;;  %v1990_v13 = vpop.f32.mrb[21].mxu1  ;;  %3494 = vmatprep.mubr.bf16.mxu0 %v3003_v41  ;;  %v4846_v24 = vpop.eup %4845  ;;  %v2699_v1 = vadd.f32 1.0, %v4844_v39  ;;  %v4790_v39 = vld [vmem:[%s5384_s9 + $0x170] ss:$8 sps:$4 sm:$0xff]  }
 0x2ee   : > { %v6913_v63 = vadd.f32 %v1990_v13, %v6818_v60  ;;  %v1992_v61 = vpop.f32.mrb[22].mxu1  ;;  %v4848_v43 = vpop.eup %4847  ;;  %v2702_v54 = vadd.f32 1.0, %v4846_v24  ;;  %3495 = vmatmul.mubr.bf16.gmra.mrb[8].mxu0 %v3002_v40  ;;  %v2826_v33 = vmul.f32 %v2698_v49, %v2314_v36 }
 0x2ef   : > { %v2458_v17 = vmul.f32 0.70710677, %v6908_v42  ;;  %v1994_v9 = vpop.f32.mrb[23].mxu1  ;;  %v2703_v26 = vadd.f32 1.0, %v4848_v43  ;;  %v6921_v48 = vadd.f32 %v1992_v61, %v6814_v14  ;;  %3644 = vmatpush1.bf16.msra.mxu0 %v4781_v47  ;;  %v2827_v12 = vmul.f32 %v2699_v1, %v2315_v21  ;;  %v4795_v47 = vld [vmem:[%s5384_s9 + $0x184] ss:$8 sps:$4 sm:$0xff]  }
 0x2f0   : > { %v2459_v6 = vmul.f32 0.70710677, %v6913_v63  ;;  %v2830_v18 = vmul.f32 %v2702_v54, %v2318_v7  ;;  %v6925_v27 = vadd.f32 %v1994_v9, %v6818_v60  ;;  %3645 = vmatprep.subr.bf16.mxu0 %v4786_v31  ;;  %v4793_v21 = vld [vmem:[%s5384_s9 + $0x180] ss:$8 sps:$4 sm:$0xff]   ;;  %v4798_v9 = vld [vmem:[%s5384_s9 + $0x194] ss:$8 sps:$4 sm:$0xff]  }
 0x2f1   : > { %4857 = verf.f32 %v2458_v17  ;;  %v2831_v58 = vmul.f32 %v2703_v26, %v2319_v22  ;;  %v2462_v52 = vmul.f32 0.70710677, %v6921_v48  ;;  %v2330_v26 = vmul.f32 0.5, %v6908_v42 }
 0x2f2   : > { %4859 = verf.f32 %v2459_v6  ;;  %v2463_v20 = vmul.f32 0.70710677, %v6925_v27  ;;  %v3006_v56 = vpack.c.bf16 %v2830_v18, %v2826_v33  ;;  %v2335_v42 = vmul.f32 0.5, %v6925_v27 }
 0x2f3   : > { %v4850_v35 = vpop.eup %4849  ;;  %4861 = verf.f32 %v2462_v52  ;;  %v3007_v28 = vpack.c.bf16 %v2831_v58, %v2827_v12  ;;  %3646 = vmatpush1.bf16.msra.mxu0 %v4784_v23  ;;  %v2334_v12 = vmul.f32 0.5, %v6921_v48 }
 0x2f4   : > { %v4852_v0 = vpop.eup %4851  ;;  %v1998_v37 = vpop.f32.mrb[24].mxu1  ;;  %v2706_v51 = vadd.f32 1.0, %v4850_v35  ;;  %4863 = verf.f32 %v2463_v20  ;;  %3647 = vmatprep.subr.bf16.mxu0 %v4789_v55  ;;  %v2331_v55 = vmul.f32 0.5, %v6913_v63 }
 0x2f5   : > { %v6932_v19 = vadd.f32 %v1998_v37, %v6814_v14  ;;  %v2000_v25 = vpop.f32.mrb[25].mxu1  ;;  %v4854_v44 = vpop.eup %4853  ;;  %v2707_v16 = vadd.f32 1.0, %v4852_v0  ;;  %3504 = vmatprep.mubr.bf16.mxu0 %v3007_v28  ;;  %v4796_v37 = vld [vmem:[%s5384_s9 + $0x190] ss:$8 sps:$4 sm:$0xff]  }
 0x2f6   : > { %v6937_v8 = vadd.f32 %v2000_v25, %v6818_v60  ;;  %v2002_v4 = vpop.f32.mrb[26].mxu1  ;;  %v4856_v3 = vpop.eup %4855  ;;  %v2710_v10 = vadd.f32 1.0, %v4854_v44  ;;  %3505 = vmatmul.mubr.bf16.gmra.mrb[12].mxu0 %v3006_v56  ;;  %v2834_v46 = vmul.f32 %v2706_v51, %v2322_v2 }
 0x2f7   : > { %v2466_v59 = vmul.f32 0.70710677, %v6932_v19  ;;  %v2004_v40 = vpop.f32.mrb[27].mxu1  ;;  %v2711_v11 = vadd.f32 1.0, %v4856_v3  ;;  %v6945_v41 = vadd.f32 %v2002_v4, %v6814_v14  ;;  %3648 = vmatpush1.bf16.msra.mxu0 %v4787_v30  ;;  %v2835_v49 = vmul.f32 %v2707_v16, %v2323_v34  ;;  %v4801_v30 = vld [vmem:[%s5384_s9 + $0x1a4] ss:$8 sps:$4 sm:$0xff]  }
 0x2f8   : > { %v2467_v5 = vmul.f32 0.70710677, %v6937_v8  ;;  %v2838_v38 = vmul.f32 %v2710_v10, %v2326_v50  ;;  %v6949_v53 = vadd.f32 %v2004_v40, %v6818_v60  ;;  %3649 = vmatprep.subr.bf16.mxu0 %v4792_v15  ;;  %v4799_v34 = vld [vmem:[%s5384_s9 + $0x1a0] ss:$8 sps:$4 sm:$0xff]   ;;  %v4804_v40 = vld [vmem:[%s5384_s9 + $0x1b4] ss:$8 sps:$4 sm:$0xff]  }
 0x2f9   : > { %4865 = verf.f32 %v2466_v59  ;;  %v2839_v13 = vmul.f32 %v2711_v11, %v2327_v45  ;;  %v2470_v29 = vmul.f32 0.70710677, %v6945_v41  ;;  %v2338_v11 = vmul.f32 0.5, %v6932_v19 }
 0x2fa   : > { %4867 = verf.f32 %v2467_v5  ;;  %v2471_v24 = vmul.f32 0.70710677, %v6949_v53  ;;  %v3010_v36 = vpack.c.bf16 %v2838_v38, %v2834_v46  ;;  %v2343_v19 = vmul.f32 0.5, %v6949_v53 }
 0x2fb   : > { %v4858_v31 = vpop.eup %4857  ;;  %4869 = verf.f32 %v2470_v29  ;;  %v3011_v43 = vpack.c.bf16 %v2839_v13, %v2835_v49  ;;  %3650 = vmatpush1.bf16.msra.mxu0 %v4790_v39  ;;  %v2342_v49 = vmul.f32 0.5, %v6945_v41 }
 0x2fc   : > { %v4860_v1 = vpop.eup %4859  ;;  %v2008_v61 = vpop.f32.mrb[28].mxu1  ;;  %v2714_v7 = vadd.f32 1.0, %v4858_v31  ;;  %4871 = verf.f32 %v2471_v24  ;;  %3651 = vmatprep.subr.bf16.mxu0 %v4795_v47  ;;  %v2339_v47 = vmul.f32 0.5, %v6937_v8 }
 0x2fd   : > { %v6956_v54 = vadd.f32 %v2008_v61, %v6814_v14  ;;  %v2010_v17 = vpop.f32.mrb[29].mxu1  ;;  %v4862_v22 = vpop.eup %4861  ;;  %v2715_v6 = vadd.f32 1.0, %v4860_v1  ;;  %3514 = vmatprep.mubr.bf16.mxu0 %v3011_v43  ;;  %v4802_v61 = vld [vmem:[%s5384_s9 + $0x1b0] ss:$8 sps:$4 sm:$0xff]  }
 0x2fe   : > { %v6961_v23 = vadd.f32 %v2010_v17, %v6818_v60  ;;  %v2012_v33 = vpop.f32.mrb[30].mxu1  ;;  %v4864_v18 = vpop.eup %4863  ;;  %v2718_v58 = vadd.f32 1.0, %v4862_v22  ;;  %3515 = vmatmul.mubr.bf16.gmra.mrb[16].mxu0 %v3010_v36  ;;  %v2842_v28 = vmul.f32 %v2714_v7, %v2330_v26 }
 0x2ff   : > { %v2474_v52 = vmul.f32 0.70710677, %v6956_v54  ;;  %v2014_v35 = vpop.f32.mrb[31].mxu1  ;;  %v2719_v20 = vadd.f32 1.0, %v4864_v18  ;;  %v6969_v0 = vadd.f32 %v2012_v33, %v6814_v14  ;;  %3652 = vmatpush1.bf16.msra.mxu0 %v4793_v21  ;;  %v2843_v51 = vmul.f32 %v2715_v6, %v2331_v55  ;;  %v4807_v21 = vld [vmem:[%s5384_s9 + $0x1c4] ss:$8 sps:$4 sm:$0xff]  }
 0x300   : > { %v2475_v56 = vmul.f32 0.70710677, %v6961_v23  ;;  %v2846_v63 = vmul.f32 %v2718_v58, %v2334_v12  ;;  %v6973_v48 = vadd.f32 %v2014_v35, %v6818_v60  ;;  %3653 = vmatprep.subr.bf16.mxu0 %v4798_v9  ;;  %v4805_v55 = vld [vmem:[%s5384_s9 + $0x1c0] ss:$8 sps:$4 sm:$0xff]   ;;  %v4810_v35 = vld [vmem:[%s5384_s9 + $0x1d4] ss:$8 sps:$4 sm:$0xff]  }
 0x301   : > { %4873 = verf.f32 %v2474_v52  ;;  %v2847_v25 = vmul.f32 %v2719_v20, %v2335_v42  ;;  %v2478_v27 = vmul.f32 0.70710677, %v6969_v0  ;;  %v2346_v20 = vmul.f32 0.5, %v6956_v54 }
 0x302   : > { %4875 = verf.f32 %v2475_v56  ;;  %v2479_v44 = vmul.f32 0.70710677, %v6973_v48  ;;  %v3014_v2 = vpack.c.bf16 %v2846_v63, %v2842_v28  ;;  %v2351_v54 = vmul.f32 0.5, %v6973_v48 }
 0x303   : > { %v4866_v15 = vpop.eup %4865  ;;  %4877 = verf.f32 %v2478_v27  ;;  %v3015_v3 = vpack.c.bf16 %v2847_v25, %v2843_v51  ;;  %3654 = vmatpush1.bf16.msra.mxu0 %v4796_v37  ;;  %v2350_v51 = vmul.f32 0.5, %v6969_v0 }
 0x304   : > { %v4868_v16 = vpop.eup %4867  ;;  %v2018_v4 = vpop.f32.mrb[32].mxu1  ;;  %v2722_v50 = vadd.f32 1.0, %v4866_v15  ;;  %4879 = verf.f32 %v2479_v44  ;;  %3655 = vmatprep.subr.bf16.mxu0 %v4801_v30  ;;  %v2347_v30 = vmul.f32 0.5, %v6961_v23 }
 0x305   : > { %v6980_v10 = vadd.f32 %v2018_v4, %v6814_v14  ;;  %v2020_v59 = vpop.f32.mrb[33].mxu1  ;;  %v4870_v45 = vpop.eup %4869  ;;  %v2723_v5 = vadd.f32 1.0, %v4868_v16  ;;  %3524 = vmatprep.mubr.bf16.mxu0 %v3015_v3  ;;  %v4808_v4 = vld [vmem:[%s5384_s9 + $0x1d0] ss:$8 sps:$4 sm:$0xff]  }
 0x306   : > { %v6985_v39 = vadd.f32 %v2020_v59, %v6818_v60  ;;  %v2022_v46 = vpop.f32.mrb[34].mxu1  ;;  %v4872_v38 = vpop.eup %4871  ;;  %v2726_v13 = vadd.f32 1.0, %v4870_v45  ;;  %3525 = vmatmul.mubr.bf16.gmra.mrb[20].mxu0 %v3014_v2  ;;  %v2850_v43 = vmul.f32 %v2722_v50, %v2338_v11 }
 0x307   : > { %v2482_v29 = vmul.f32 0.70710677, %v6980_v10  ;;  %v2024_v31 = vpop.f32.mrb[35].mxu1  ;;  %v2727_v24 = vadd.f32 1.0, %v4872_v38  ;;  %v6993_v1 = vadd.f32 %v2022_v46, %v6814_v14  ;;  %3656 = vmatpush1.bf16.msra.mxu0 %v4799_v34  ;;  %v2851_v7 = vmul.f32 %v2723_v5, %v2339_v47  ;;  %v4813_v34 = vld [vmem:[%s5384_s9 + $0x1e4] ss:$8 sps:$4 sm:$0xff]  }
 0x308   : > { %v2483_v36 = vmul.f32 0.70710677, %v6985_v39  ;;  %v2854_v8 = vmul.f32 %v2726_v13, %v2342_v49  ;;  %v6997_v41 = vadd.f32 %v2024_v31, %v6818_v60  ;;  %3657 = vmatprep.subr.bf16.mxu0 %v4804_v40  ;;  %v4811_v47 = vld [vmem:[%s5384_s9 + $0x1e0] ss:$8 sps:$4 sm:$0xff]   ;;  %v4816_v31 = vld [vmem:[%s5384_s9 + $0x1f4] ss:$8 sps:$4 sm:$0xff]  }
 0x309   : > { %4881 = verf.f32 %v2482_v29  ;;  %v2855_v17 = vmul.f32 %v2727_v24, %v2343_v19  ;;  %v2486_v53 = vmul.f32 0.70710677, %v6993_v1  ;;  %v2354_v24 = vmul.f32 0.5, %v6980_v10 }
 0x30a   : > { %4883 = verf.f32 %v2483_v36  ;;  %v2487_v22 = vmul.f32 0.70710677, %v6997_v41  ;;  %v3018_v26 = vpack.c.bf16 %v2854_v8, %v2850_v43 }
 0x30b   : > { %v4874_v9 = vpop.eup %4873  ;;  %4885 = verf.f32 %v2486_v53  ;;  %v3019_v18 = vpack.c.bf16 %v2855_v17, %v2851_v7  ;;  %3658 = vmatpush1.bf16.msra.mxu0 %v4802_v61  ;;  %v2358_v7 = vmul.f32 0.5, %v6993_v1 }
 0x30c   : > { %v4876_v6 = vpop.eup %4875  ;;  %v2028_v33 = vpop.f32.mrb[36].mxu1  ;;  %v2730_v12 = vadd.f32 1.0, %v4874_v9  ;;  %4887 = verf.f32 %v2487_v22  ;;  %3659 = vmatprep.subr.bf16.mxu0 %v4807_v21  ;;  %v2355_v21 = vmul.f32 0.5, %v6985_v39  ;;  %v2359_v22 = vmul.f32 0.5, %v6997_v41 }
 0x30d   : > { %v7004_v58 = vadd.f32 %v2028_v33, %v6814_v14  ;;  %v2030_v52 = vpop.f32.mrb[37].mxu1  ;;  %v4878_v42 = vpop.eup %4877  ;;  %v2731_v56 = vadd.f32 1.0, %v4876_v6  ;;  %3534 = vmatprep.mubr.bf16.mxu0 %v3019_v18  ;;  %v4814_v33 = vld [vmem:[%s5384_s9 + $0x1f0] ss:$8 sps:$4 sm:$0xff]  }
 0x30e   : > { %v7009_v37 = vadd.f32 %v2030_v52, %v6818_v60  ;;  %v2032_v28 = vpop.f32.mrb[38].mxu1  ;;  %v4880_v63 = vpop.eup %4879  ;;  %v2734_v25 = vadd.f32 1.0, %v4878_v42  ;;  %3535 = vmatmul.mubr.bf16.gmra.mrb[24].mxu0 %v3018_v26  ;;  %v2858_v3 = vmul.f32 %v2730_v12, %v2346_v20 }
 0x30f   : > { %v2490_v27 = vmul.f32 0.70710677, %v7004_v58  ;;  %v2034_v15 = vpop.f32.mrb[39].mxu1  ;;  %v2735_v44 = vadd.f32 1.0, %v4880_v63  ;;  %v7017_v16 = vadd.f32 %v2032_v28, %v6814_v14  ;;  %3660 = vmatpush1.bf16.msra.mxu0 %v4805_v55  ;;  %v2859_v50 = vmul.f32 %v2731_v56, %v2347_v30 }
 0x310   : > { %v2491_v2 = vmul.f32 0.70710677, %v7009_v37  ;;  %v2862_v23 = vmul.f32 %v2734_v25, %v2350_v51  ;;  %v7021_v0 = vadd.f32 %v2034_v15, %v6818_v60  ;;  %3661 = vmatprep.subr.bf16.mxu0 %v4810_v35 }
 0x311   : > { %4889 = verf.f32 %v2490_v27  ;;  %v2863_v59 = vmul.f32 %v2735_v44, %v2351_v54  ;;  %v2494_v48 = vmul.f32 0.70710677, %v7017_v16  ;;  %v2362_v27 = vmul.f32 0.5, %v7004_v58 }
 0x312   : > { %4891 = verf.f32 %v2491_v2  ;;  %v2495_v45 = vmul.f32 0.70710677, %v7021_v0  ;;  %v3022_v11 = vpack.c.bf16 %v2862_v23, %v2858_v3  ;;  %v2366_v3 = vmul.f32 0.5, %v7017_v16 }
 0x313   : > { %v4882_v40 = vpop.eup %4881  ;;  %4893 = verf.f32 %v2494_v48  ;;  %v3023_v38 = vpack.c.bf16 %v2863_v59, %v2859_v50  ;;  %3662 = vmatpush1.bf16.msra.mxu0 %v4808_v4  ;;  %v2363_v4 = vmul.f32 0.5, %v7009_v37  ;;  %v2367_v59 = vmul.f32 0.5, %v7021_v0 }
 0x314   : > { %v4884_v5 = vpop.eup %4883  ;;  %v2038_v46 = vpop.f32.mrb[40].mxu1  ;;  %v2738_v49 = vadd.f32 1.0, %v4882_v40  ;;  %4895 = verf.f32 %v2495_v45  ;;  %3663 = vmatprep.subr.bf16.mxu0 %v4813_v34 }
 0x315   : > { %v7028_v13 = vadd.f32 %v2038_v46, %v6814_v14  ;;  %v2040_v29 = vpop.f32.mrb[41].mxu1  ;;  %v4886_v19 = vpop.eup %4885  ;;  %v2739_v36 = vadd.f32 1.0, %v4884_v5  ;;  %3544 = vmatprep.mubr.bf16.mxu0 %v3023_v38 }
 0x316   : > { %v7033_v61 = vadd.f32 %v2040_v29, %v6818_v60  ;;  %v2042_v43 = vpop.f32.mrb[42].mxu1  ;;  %v4888_v8 = vpop.eup %4887  ;;  %v2742_v17 = vadd.f32 1.0, %v4886_v19  ;;  %3545 = vmatmul.mubr.bf16.gmra.mrb[28].mxu0 %v3022_v11  ;;  %v2866_v18 = vmul.f32 %v2738_v49, %v2354_v24 }
 0x317   : > { %v2498_v53 = vmul.f32 0.70710677, %v7028_v13  ;;  %v2044_v9 = vpop.f32.mrb[43].mxu1  ;;  %v2743_v10 = vadd.f32 1.0, %v4888_v8  ;;  %v7041_v6 = vadd.f32 %v2042_v43, %v6814_v14  ;;  %3664 = vmatpush1.bf16.msra.mxu0 %v4811_v47  ;;  %v2867_v1 = vmul.f32 %v2739_v36, %v2355_v21 }
 0x318   : > { %v2499_v26 = vmul.f32 0.70710677, %v7033_v61  ;;  %v2870_v55 = vmul.f32 %v2742_v17, %v2358_v7  ;;  %v7045_v39 = vadd.f32 %v2044_v9, %v6818_v60  ;;  %3665 = vmatprep.subr.bf16.mxu0 %v4816_v31  ;;  %v2370_v8 = vmul.f32 0.5, %v7028_v13 }
 0x319   : > { %4897 = verf.f32 %v2498_v53  ;;  %v2871_v12 = vmul.f32 %v2743_v10, %v2359_v22  ;;  %v2502_v41 = vmul.f32 0.70710677, %v7041_v6  ;;  %v2371_v9 = vmul.f32 0.5, %v7033_v61 }
 0x31a   : > { %4899 = verf.f32 %v2499_v26  ;;  %v2503_v35 = vmul.f32 0.70710677, %v7045_v39  ;;  %v3026_v42 = vpack.c.bf16 %v2870_v55, %v2866_v18  ;;  %v2374_v22 = vmul.f32 0.5, %v7041_v6 }
 0x31b   : > { %v4890_v52 = vpop.eup %4889  ;;  %4901 = verf.f32 %v2502_v41  ;;  %v3027_v28 = vpack.c.bf16 %v2871_v12, %v2867_v1  ;;  %3666 = vmatpush1.bf16.msra.mxu0 %v4814_v33  ;;  %v2375_v18 = vmul.f32 0.5, %v7045_v39 }
 0x31c   : > { %v4892_v20 = vpop.eup %4891  ;;  %v2048_v56 = vpop.f32.mrb[44].mxu1  ;;  %v2746_v63 = vadd.f32 1.0, %v4890_v52  ;;  %4903 = verf.f32 %v2503_v35 }
 0x31d   : > { %v7050_v30 = vadd.f32 %v2048_v56, %v6814_v14  ;;  %v2050_v51 = vpop.f32.mrb[45].mxu1  ;;  %v4894_v25 = vpop.eup %4893  ;;  %v2747_v15 = vadd.f32 1.0, %v4892_v20  ;;  %3554 = vmatprep.mubr.bf16.mxu0 %v3027_v28 }
 0x31e   : > { %v7054_v54 = vadd.f32 %v2050_v51, %v6818_v60  ;;  %v2052_v44 = vpop.f32.mrb[46].mxu1  ;;  %v4896_v2 = vpop.eup %4895  ;;  %v2750_v23 = vadd.f32 1.0, %v4894_v25  ;;  %3555 = vmatmul.mubr.bf16.gmra.mrb[32].mxu0 %v3026_v42  ;;  %v2874_v45 = vmul.f32 %v2746_v63, %v2362_v27 }
 0x31f   : > { %v2506_v34 = vmul.f32 0.70710677, %v7050_v30  ;;  %v2054_v50 = vpop.f32.mrb[47].mxu1  ;;  %v2751_v48 = vadd.f32 1.0, %v4896_v2  ;;  %v7062_v40 = vadd.f32 %v2052_v44, %v6814_v14  ;;  %v2875_v16 = vmul.f32 %v2747_v15, %v2363_v4 }
 0x320   : > { %v2507_v58 = vmul.f32 0.70710677, %v7054_v54  ;;  %v2878_v11 = vmul.f32 %v2750_v23, %v2366_v3  ;;  %v7065_v37 = vadd.f32 %v2054_v50, %v6818_v60  ;;  %v2378_v44 = vmul.f32 0.5, %v7050_v30 }
 0x321   : > { %4905 = verf.f32 %v2506_v34  ;;  %v2879_v5 = vmul.f32 %v2751_v48, %v2367_v59  ;;  %v2510_v46 = vmul.f32 0.70710677, %v7062_v40  ;;  %v2379_v34 = vmul.f32 0.5, %v7054_v54 }
 0x322   : > { %4907 = verf.f32 %v2507_v58  ;;  %v2511_v0 = vmul.f32 0.70710677, %v7065_v37  ;;  %v3030_v47 = vpack.c.bf16 %v2878_v11, %v2874_v45  ;;  %v2382_v50 = vmul.f32 0.5, %v7062_v40 }
 0x323   : > { %v4898_v38 = vpop.eup %4897  ;;  %4909 = verf.f32 %v2510_v46  ;;  %v3031_v31 = vpack.c.bf16 %v2879_v5, %v2875_v16  ;;  %v2383_v45 = vmul.f32 0.5, %v7065_v37 }
 0x324   : > { %v4900_v49 = vpop.eup %4899  ;;  %v2058_v29 = vpop.f32.mrb[48].mxu1  ;;  %v2754_v19 = vadd.f32 1.0, %v4898_v38  ;;  %4911 = verf.f32 %v2511_v0 }
 0x325   : > { %v7070_v24 = vadd.f32 %v2058_v29, %v6814_v14  ;;  %v2060_v36 = vpop.f32.mrb[49].mxu1  ;;  %v4902_v43 = vpop.eup %4901  ;;  %v2755_v21 = vadd.f32 1.0, %v4900_v49  ;;  %3564 = vmatprep.mubr.bf16.mxu0 %v3031_v31 }
 0x326   : > { %v7074_v7 = vadd.f32 %v2060_v36, %v6818_v60  ;;  %v2062_v17 = vpop.f32.mrb[50].mxu1  ;;  %v4904_v53 = vpop.eup %4903  ;;  %v2758_v10 = vadd.f32 1.0, %v4902_v43  ;;  %3565 = vmatmul.mubr.bf16.gmra.mrb[36].mxu0 %v3030_v47  ;;  %v2882_v12 = vmul.f32 %v2754_v19, %v2370_v8 }
 0x327   : > { %v2514_v26 = vmul.f32 0.70710677, %v7070_v24  ;;  %v2064_v33 = vpop.f32.mrb[51].mxu1  ;;  %v2759_v55 = vadd.f32 1.0, %v4904_v53  ;;  %v7082_v1 = vadd.f32 %v2062_v17, %v6814_v14  ;;  %v2883_v6 = vmul.f32 %v2755_v21, %v2371_v9 }
 0x328   : > { %v2515_v13 = vmul.f32 0.70710677, %v7074_v7  ;;  %v2886_v41 = vmul.f32 %v2758_v10, %v2374_v22  ;;  %v7085_v61 = vadd.f32 %v2064_v33, %v6818_v60  ;;  %v1574_v21 = vsub.s32 2, %v6805_v32 }
 0x329   : > { %4913 = verf.f32 %v2514_v26  ;;  %v2887_v52 = vmul.f32 %v2759_v55, %v2375_v18  ;;  %v2518_v35 = vmul.f32 0.70710677, %v7082_v1  ;;  %v2386_v53 = vmul.f32 0.5, %v7070_v24 }
 0x32a   : > { %4915 = verf.f32 %v2515_v13  ;;  %v2519_v39 = vmul.f32 0.70710677, %v7085_v61  ;;  %v3034_v20 = vpack.c.bf16 %v2886_v41, %v2882_v12  ;;  %v1578_v26 = vsub.s32 3, %v6805_v32 }
 0x32b   : > { %v4906_v42 = vpop.eup %4905  ;;  %4917 = verf.f32 %v2518_v35  ;;  %v3035_v63 = vpack.c.bf16 %v2887_v52, %v2883_v6  ;;  %v2387_v18 = vmul.f32 0.5, %v7074_v7  ;;  %v2390_v55 = vmul.f32 0.5, %v7082_v1 }
 0x32c   : > { %v4908_v56 = vpop.eup %4907  ;;  %v2068_v28 = vpop.f32.mrb[52].mxu1  ;;  %v2762_v51 = vadd.f32 1.0, %v4906_v42  ;;  %4919 = verf.f32 %v2519_v39  ;;  %v2391_v24 = vmul.f32 0.5, %v7085_v61 }
 0x32d   : > { %v7090_v25 = vadd.f32 %v2068_v28, %v6814_v14  ;;  %v2070_v27 = vpop.f32.mrb[53].mxu1  ;;  %v4910_v15 = vpop.eup %4909  ;;  %v2763_v2 = vadd.f32 1.0, %v4908_v56  ;;  %3574 = vmatprep.mubr.bf16.mxu0 %v3035_v63 }
 0x32e   : > { %v7094_v4 = vadd.f32 %v2070_v27, %v6818_v60  ;;  %v2072_v3 = vpop.f32.mrb[54].mxu1  ;;  %v4912_v23 = vpop.eup %4911  ;;  %v2766_v59 = vadd.f32 1.0, %v4910_v15  ;;  %3575 = vmatmul.mubr.bf16.gmra.mrb[40].mxu0 %v3034_v20  ;;  %v2890_v5 = vmul.f32 %v2762_v51, %v2378_v44 }
 0x32f   : > { %v2522_v48 = vmul.f32 0.70710677, %v7090_v25  ;;  %v2074_v58 = vpop.f32.mrb[55].mxu1  ;;  %v2767_v11 = vadd.f32 1.0, %v4912_v23  ;;  %v7102_v16 = vadd.f32 %v2072_v3, %v6814_v14  ;;  %v2891_v40 = vmul.f32 %v2763_v2, %v2379_v34  ;;  %v5073_v23 = vld [vmem:[%s5379_s19] sm:$0xf] }
 0x330   : > { %v2523_v30 = vmul.f32 0.70710677, %v7094_v4  ;;  %v2894_v46 = vmul.f32 %v2766_v59, %v2382_v50  ;;  %v7105_v54 = vadd.f32 %v2074_v58, %v6818_v60  ;;  %v7135_v34 = vrot.slane %v5073_v23, %v1574_v21 }
 0x331   : > { %4921 = verf.f32 %v2522_v48  ;;  %v2895_v38 = vmul.f32 %v2767_v11, %v2383_v45  ;;  %v2526_v0 = vmul.f32 0.70710677, %v7102_v16  ;;  %v2394_v59 = vmul.f32 0.5, %v7090_v25 }
 0x332   : > { %4923 = verf.f32 %v2523_v30  ;;  %v2527_v37 = vmul.f32 0.70710677, %v7105_v54  ;;  %v3038_v49 = vpack.c.bf16 %v2894_v46, %v2890_v5  ;;  %v7141_v11 = vrot.slane %v5073_v23, %v1578_v26 }
 0x333   : > { %v4914_v47 = vpop.eup %4913  ;;  %4925 = verf.f32 %v2526_v0  ;;  %v3039_v19 = vpack.c.bf16 %v2895_v38, %v2891_v40  ;;  %v2395_v5 = vmul.f32 0.5, %v7094_v4  ;;  %v2398_v46 = vmul.f32 0.5, %v7102_v16 }
 0x334   : > { %v4916_v29 = vpop.eup %4915  ;;  %v2078_v31 = vpop.f32.mrb[56].mxu1  ;;  %v2770_v36 = vadd.f32 1.0, %v4914_v47  ;;  %4927 = verf.f32 %v2527_v37  ;;  %v2399_v25 = vmul.f32 0.5, %v7105_v54 }
 0x335   : > { %v7110_v43 = vadd.f32 %v2078_v31, %v6814_v14  ;;  %v2080_v8 = vpop.f32.mrb[57].mxu1  ;;  %v4918_v17 = vpop.eup %4917  ;;  %v2771_v9 = vadd.f32 1.0, %v4916_v29  ;;  %3584 = vmatprep.mubr.bf16.mxu0 %v3039_v19 }
 0x336   : > { %v7115_v22 = vadd.f32 %v2080_v8, %v6818_v60  ;;  %v2082_v10 = vpop.f32.mrb[58].mxu1  ;;  %v4920_v33 = vpop.eup %4919  ;;  %v2774_v13 = vadd.f32 1.0, %v4918_v17  ;;  %3585 = vmatmul.mubr.bf16.gmra.mrb[44].mxu0 %v3038_v49  ;;  %v2898_v42 = vmul.f32 %v2770_v36, %v2386_v53 }
 0x337   : > { %v2530_v12 = vmul.f32 0.70710677, %v7110_v43  ;;  %v2084_v41 = vpop.f32.mrb[59].mxu1  ;;  %v2775_v6 = vadd.f32 1.0, %v4920_v33  ;;  %v7124_v35 = vadd.f32 %v2082_v10, %v6814_v14  ;;  %v2899_v1 = vmul.f32 %v2771_v9, %v2387_v18 }
 0x338   : > { %v2531_v52 = vmul.f32 0.70710677, %v7115_v22  ;;  %v2902_v39 = vmul.f32 %v2774_v13, %v2390_v55  ;;  %v7127_v7 = vadd.f32 %v2084_v41, %v6818_v60  ;;  %v2402_v33 = vmul.f32 0.5, %v7110_v43 }
 0x339   : > { %4929 = verf.f32 %v2530_v12  ;;  %v2903_v20 = vmul.f32 %v2775_v6, %v2391_v24  ;;  %v2534_v56 = vmul.f32 0.70710677, %v7124_v35  ;;  %v2403_v41 = vmul.f32 0.5, %v7115_v22 }
 0x33a   : > { %4931 = verf.f32 %v2531_v52  ;;  %v2535_v61 = vmul.f32 0.70710677, %v7127_v7  ;;  %v3042_v63 = vpack.c.bf16 %v2902_v39, %v2898_v42  ;;  %v2406_v24 = vmul.f32 0.5, %v7124_v35 }
 0x33b   : > { %v4922_v28 = vpop.eup %4921  ;;  %4933 = verf.f32 %v2534_v56  ;;  %v3043_v15 = vpack.c.bf16 %v2903_v20, %v2899_v1  ;;  %v2407_v39 = vmul.f32 0.5, %v7127_v7 }
 0x33c   : > { %v4924_v51 = vpop.eup %4923  ;;  %v2088_v27 = vpop.f32.mrb[60].mxu1  ;;  %v2778_v44 = vadd.f32 1.0, %v4922_v28  ;;  %4935 = verf.f32 %v2535_v61 }
 0x33d   : > { %v7132_v2 = vadd.f32 %v2088_v27, %v6814_v14  ;;  %v2090_v3 = vpop.f32.mrb[61].mxu1  ;;  %v4926_v50 = vpop.eup %4925  ;;  %v2779_v48 = vadd.f32 1.0, %v4924_v51  ;;  %3594 = vmatprep.mubr.bf16.mxu0 %v3043_v15 }
 0x33e   : > { %v7139_v58 = vadd.f32 %v2090_v3, %v6818_v60  ;;  %v2092_v45 = vpop.f32.mrb[62].mxu1  ;;  %v4928_v30 = vpop.eup %4927  ;;  %v2782_v40 = vadd.f32 1.0, %v4926_v50  ;;  %3595 = vmatmul.mubr.bf16.gmra.mrb[48].mxu0 %v3042_v63  ;;  %v2906_v29 = vmul.f32 %v2778_v44, %v2394_v59 }
 0x33f   : > { %v2538_v38 = vmul.f32 0.70710677, %v7132_v2  ;;  %v2094_v0 = vpop.f32.mrb[63].mxu1  ;;  %v2783_v47 = vadd.f32 1.0, %v4928_v30  ;;  %v7149_v49 = vadd.f32 %v2092_v45, %v6814_v14  ;;  %v2907_v16 = vmul.f32 %v2779_v48, %v2395_v5 }
 0x340   : > { %v2539_v37 = vmul.f32 0.70710677, %v7139_v58  ;;  %v2910_v31 = vmul.f32 %v2782_v40, %v2398_v46  ;;  %v7152_v4 = vadd.f32 %v2094_v0, %v6818_v60  ;;  %v2410_v45 = vmul.f32 0.5, %v7132_v2 }
 0x341   : > { %4937 = verf.f32 %v2538_v38  ;;  %v2911_v19 = vmul.f32 %v2783_v47, %v2399_v25  ;;  %v2542_v36 = vmul.f32 0.70710677, %v7149_v49  ;;  %v2411_v38 = vmul.f32 0.5, %v7139_v58 }
 0x342   : > { %4939 = verf.f32 %v2539_v37  ;;  %v2543_v54 = vmul.f32 0.70710677, %v7152_v4  ;;  %v3046_v21 = vpack.c.bf16 %v2910_v31, %v2906_v29  ;;  %v2414_v0 = vmul.f32 0.5, %v7149_v49 }
 0x343   : > { %v4930_v8 = vpop.eup %4929  ;;  %4941 = verf.f32 %v2542_v36  ;;  %v3047_v14 = vpack.c.bf16 %v2911_v19, %v2907_v16  ;;  %v2415_v29 = vmul.f32 0.5, %v7152_v4 }
 0x344   : > { %v4932_v17 = vpop.eup %4931  ;;  %v2131_v53 = vpop.f32.mrb[64].mxu1  ;;  %v2786_v9 = vadd.f32 1.0, %v4930_v8  ;;  %4943 = verf.f32 %v2543_v54 }
 0x345   : > { %v7157_v10 = vadd.f32 %v2131_v53, %v7135_v34  ;;  %v2133_v60 = vpop.f32.mrb[65].mxu1  ;;  %v4934_v26 = vpop.eup %4933  ;;  %v2787_v18 = vadd.f32 1.0, %v4932_v17  ;;  %3604 = vmatprep.mubr.bf16.mxu0 %v3047_v14 }
 0x346   : > { %v7161_v55 = vadd.f32 %v2133_v60, %v7141_v11  ;;  %v2135_v13 = vpop.f32.mrb[66].mxu1  ;;  %v4936_v12 = vpop.eup %4935  ;;  %v2790_v6 = vadd.f32 1.0, %v4934_v26  ;;  %3605 = vmatmul.mubr.bf16.gmra.mrb[52].mxu0 %v3046_v21  ;;  %v2914_v56 = vmul.f32 %v2786_v9, %v2402_v33 }
 0x347   : > { %v2420_v52 = vmul.f32 0.70710677, %v7157_v10  ;;  %v2137_v42 = vpop.f32.mrb[67].mxu1  ;;  %v2791_v1 = vadd.f32 1.0, %v4936_v12  ;;  %v7169_v20 = vadd.f32 %v2135_v13, %v7135_v34  ;;  %v2915_v35 = vmul.f32 %v2787_v18, %v2403_v41 }
 0x348   : > { %v2421_v43 = vmul.f32 0.70710677, %v7161_v55  ;;  %v2918_v28 = vmul.f32 %v2790_v6, %v2406_v24  ;;  %v7172_v22 = vadd.f32 %v2137_v42, %v7141_v11  ;;  %v2292_v13 = vmul.f32 0.5, %v7157_v10 }
 0x349   : > { %4945 = verf.f32 %v2420_v52  ;;  %v2919_v61 = vmul.f32 %v2791_v1, %v2407_v39  ;;  %v2424_v63 = vmul.f32 0.70710677, %v7169_v20  ;;  %v2293_v52 = vmul.f32 0.5, %v7161_v55 }
 0x34a   : > { %4947 = verf.f32 %v2421_v43  ;;  %v2425_v7 = vmul.f32 0.70710677, %v7172_v22  ;;  %v3050_v27 = vpack.c.bf16 %v2918_v28, %v2914_v56  ;;  %v2296_v42 = vmul.f32 0.5, %v7169_v20 }
 0x34b   : > { %v4938_v51 = vpop.eup %4937  ;;  %4949 = verf.f32 %v2424_v63  ;;  %v3051_v3 = vpack.c.bf16 %v2919_v61, %v2915_v35  ;;  %v2297_v56 = vmul.f32 0.5, %v7172_v22 }
 0x34c   : > { %v4940_v15 = vpop.eup %4939  ;;  %v2141_v44 = vpop.f32.mrb[68].mxu1  ;;  %v2794_v23 = vadd.f32 1.0, %v4938_v51  ;;  %4951 = verf.f32 %v2425_v7 }
 0x34d   : > { %v7177_v50 = vadd.f32 %v2141_v44, %v7135_v34  ;;  %v2143_v59 = vpop.f32.mrb[69].mxu1  ;;  %v4942_v48 = vpop.eup %4941  ;;  %v2795_v30 = vadd.f32 1.0, %v4940_v15  ;;  %3614 = vmatprep.mubr.bf16.mxu0 %v3051_v3 }
 0x34e   : > { %v7181_v5 = vadd.f32 %v2143_v59, %v7141_v11  ;;  %v2145_v46 = vpop.f32.mrb[70].mxu1  ;;  %v4944_v40 = vpop.eup %4943  ;;  %v2798_v25 = vadd.f32 1.0, %v4942_v48  ;;  %3615 = vmatmul.mubr.bf16.gmra.mrb[56].mxu0 %v3050_v27  ;;  %v2922_v19 = vmul.f32 %v2794_v23, %v2410_v45 }
 0x34f   : > { %v2428_v47 = vmul.f32 0.70710677, %v7177_v50  ;;  %v2147_v37 = vpop.f32.mrb[71].mxu1  ;;  %v2799_v31 = vadd.f32 1.0, %v4944_v40  ;;  %v7189_v16 = vadd.f32 %v2145_v46, %v7135_v34  ;;  %v2923_v49 = vmul.f32 %v2795_v30, %v2411_v38 }
 0x350   : > { %v2429_v2 = vmul.f32 0.70710677, %v7181_v5  ;;  %v2926_v36 = vmul.f32 %v2798_v25, %v2414_v0  ;;  %v7192_v58 = vadd.f32 %v2147_v37, %v7141_v11  ;;  %v2300_v46 = vmul.f32 0.5, %v7177_v50 }
 0x351   : > { %4953 = verf.f32 %v2428_v47  ;;  %v2927_v8 = vmul.f32 %v2799_v31, %v2415_v29  ;;  %v2432_v54 = vmul.f32 0.70710677, %v7189_v16  ;;  %v2301_v47 = vmul.f32 0.5, %v7181_v5 }
 0x352   : > { %4955 = verf.f32 %v2429_v2  ;;  %v2433_v4 = vmul.f32 0.70710677, %v7192_v58  ;;  %v3054_v17 = vpack.c.bf16 %v2926_v36, %v2922_v19  ;;  %v2304_v37 = vmul.f32 0.5, %v7189_v16 }
 0x353   : > { %v4946_v21 = vpop.eup %4945  ;;  %4957 = verf.f32 %v2432_v54  ;;  %v3055_v9 = vpack.c.bf16 %v2927_v8, %v2923_v49  ;;  %v2305_v19 = vmul.f32 0.5, %v7192_v58 }
 0x354   : > { %v4948_v53 = vpop.eup %4947  ;;  %v2151_v14 = vpop.f32.mrb[72].mxu1  ;;  %v2676_v60 = vadd.f32 1.0, %v4946_v21  ;;  %4959 = verf.f32 %v2433_v4 }
 0x355   : > { %v7197_v26 = vadd.f32 %v2151_v14, %v7135_v34  ;;  %v2153_v33 = vpop.f32.mrb[73].mxu1  ;;  %v4950_v18 = vpop.eup %4949  ;;  %v2677_v12 = vadd.f32 1.0, %v4948_v53  ;;  %3624 = vmatprep.mubr.bf16.mxu0 %v3055_v9 }
 0x356   : > { %v7201_v41 = vadd.f32 %v2153_v33, %v7141_v11  ;;  %v2155_v24 = vpop.f32.mrb[74].mxu1  ;;  %v4952_v6 = vpop.eup %4951  ;;  %v2680_v39 = vadd.f32 1.0, %v4950_v18  ;;  %3625 = vmatmul.mubr.bf16.gmra.mrb[60].mxu0 %v3054_v17  ;;  %v2804_v61 = vmul.f32 %v2676_v60, %v2292_v13 }
 0x357   : > { %v2436_v1 = vmul.f32 0.70710677, %v7197_v26  ;;  %v2157_v43 = vpop.f32.mrb[75].mxu1  ;;  %v2681_v28 = vadd.f32 1.0, %v4952_v6  ;;  %v7209_v35 = vadd.f32 %v2155_v24, %v7135_v34  ;;  %v2805_v20 = vmul.f32 %v2677_v12, %v2293_v52 }
 0x358   : > { %v2437_v10 = vmul.f32 0.70710677, %v7201_v41  ;;  %v2808_v63 = vmul.f32 %v2680_v39, %v2296_v42  ;;  %v7212_v55 = vadd.f32 %v2157_v43, %v7141_v11  ;;  %v2308_v24 = vmul.f32 0.5, %v7197_v26 }
 0x359   : > { %4961 = verf.f32 %v2436_v1  ;;  %v2809_v51 = vmul.f32 %v2681_v28, %v2297_v56  ;;  %v2440_v7 = vmul.f32 0.70710677, %v7209_v35  ;;  %v2309_v1 = vmul.f32 0.5, %v7201_v41 }
 0x35a   : > { %4963 = verf.f32 %v2437_v10  ;;  %v2996_v15 = vpack.c.bf16 %v2808_v63, %v2804_v61  ;;  %v2441_v22 = vmul.f32 0.70710677, %v7212_v55  ;;  %v2312_v43 = vmul.f32 0.5, %v7209_v35 }
 0x35b   : > { %v4954_v27 = vpop.eup %4953  ;;  %4965 = verf.f32 %v2440_v7  ;;  %v2997_v23 = vpack.c.bf16 %v2809_v51, %v2805_v20  ;;  %v2313_v61 = vmul.f32 0.5, %v7212_v55 }
 0x35c   : > { %v4956_v44 = vpop.eup %4955  ;;  %v2161_v3 = vpop.f32.mrb[76].mxu1  ;;  %v2684_v59 = vadd.f32 1.0, %v4954_v27  ;;  %4967 = verf.f32 %v2441_v22 }
 0x35d   : > { %v7217_v48 = vadd.f32 %v2161_v3, %v7135_v34  ;;  %v2163_v45 = vpop.f32.mrb[77].mxu1  ;;  %v4958_v30 = vpop.eup %4957  ;;  %v2685_v40 = vadd.f32 1.0, %v4956_v44  ;;  %3667 = vmatprep.mubr.bf16.mxu0 %v2997_v23 }
 0x35e   : > { %v7221_v38 = vadd.f32 %v2163_v45, %v7141_v11  ;;  %v2165_v0 = vpop.f32.mrb[78].mxu1  ;;  %v4960_v25 = vpop.eup %4959  ;;  %v2688_v29 = vadd.f32 1.0, %v4958_v30  ;;  %3668 = vmatmul.mubr.bf16.vlgmr.msra.gmra.mrb[0].mxu0 %v2996_v15  ;;  %v2812_v8 = vmul.f32 %v2684_v59, %v2300_v46 }
 0x35f   : > { %v2444_v31 = vmul.f32 0.70710677, %v7217_v48  ;;  %v2167_v2 = vpop.f32.mrb[79].mxu1  ;;  %v2689_v36 = vadd.f32 1.0, %v4960_v25  ;;  %v7229_v49 = vadd.f32 %v2165_v0, %v7135_v34  ;;  %v2813_v16 = vmul.f32 %v2685_v40, %v2301_v47 }
 0x360   : > { %v2445_v50 = vmul.f32 0.70710677, %v7221_v38  ;;  %v2816_v54 = vmul.f32 %v2688_v29, %v2304_v37  ;;  %v7232_v5 = vadd.f32 %v2167_v2, %v7141_v11  ;;  %v2316_v0 = vmul.f32 0.5, %v7217_v48 }
 0x361   : > { %4969 = verf.f32 %v2444_v31  ;;  %v2817_v21 = vmul.f32 %v2689_v36, %v2305_v19  ;;  %v2448_v4 = vmul.f32 0.70710677, %v7229_v49  ;;  %v2317_v31 = vmul.f32 0.5, %v7221_v38 }
 0x362   : > { %4971 = verf.f32 %v2445_v50  ;;  %v2449_v58 = vmul.f32 0.70710677, %v7232_v5  ;;  %v3000_v53 = vpack.c.bf16 %v2816_v54, %v2812_v8  ;;  %v2320_v2 = vmul.f32 0.5, %v7229_v49 }
 0x363   : > { %v4962_v17 = vpop.eup %4961  ;;  %4973 = verf.f32 %v2448_v4  ;;  %v3001_v60 = vpack.c.bf16 %v2817_v21, %v2813_v16  ;;  %v2321_v8 = vmul.f32 0.5, %v7232_v5 }
 0x364   : > { %v4964_v14 = vpop.eup %4963  ;;  %v2171_v9 = vpop.f32.mrb[80].mxu1  ;;  %v2692_v33 = vadd.f32 1.0, %v4962_v17  ;;  %4975 = verf.f32 %v2449_v58 }
 0x365   : > { %v7237_v18 = vadd.f32 %v2171_v9, %v7135_v34  ;;  %v2173_v13 = vpop.f32.mrb[81].mxu1  ;;  %v4966_v12 = vpop.eup %4965  ;;  %v2693_v6 = vadd.f32 1.0, %v4964_v14  ;;  %3677 = vmatprep.mubr.bf16.mxu0 %v3001_v60 }
 0x366   : > { %v7241_v52 = vadd.f32 %v2173_v13, %v7141_v11  ;;  %v2175_v42 = vpop.f32.mrb[82].mxu1  ;;  %v4968_v39 = vpop.eup %4967  ;;  %v2696_v56 = vadd.f32 1.0, %v4966_v12  ;;  %3678 = vmatmul.mubr.bf16.gmra.mrb[4].mxu0 %v3000_v53  ;;  %v2820_v51 = vmul.f32 %v2692_v33, %v2308_v24 }
 0x367   : > { %v2452_v28 = vmul.f32 0.70710677, %v7237_v18  ;;  %v2177_v10 = vpop.f32.mrb[83].mxu1  ;;  %v2697_v63 = vadd.f32 1.0, %v4968_v39  ;;  %v7249_v20 = vadd.f32 %v2175_v42, %v7135_v34  ;;  %v2821_v35 = vmul.f32 %v2693_v6, %v2309_v1 }
 0x368   : > { %v2453_v26 = vmul.f32 0.70710677, %v7241_v52  ;;  %v2824_v7 = vmul.f32 %v2696_v56, %v2312_v43  ;;  %v7252_v41 = vadd.f32 %v2177_v10, %v7141_v11  ;;  %v2324_v42 = vmul.f32 0.5, %v7237_v18 }
 0x369   : > { %4977 = verf.f32 %v2452_v28  ;;  %v2825_v27 = vmul.f32 %v2697_v63, %v2313_v61  ;;  %v2456_v15 = vmul.f32 0.70710677, %v7249_v20  ;;  %v2325_v28 = vmul.f32 0.5, %v7241_v52 }
 0x36a   : > { %4979 = verf.f32 %v2453_v26  ;;  %v2457_v55 = vmul.f32 0.70710677, %v7252_v41  ;;  %v3004_v44 = vpack.c.bf16 %v2824_v7, %v2820_v51  ;;  %v2328_v10 = vmul.f32 0.5, %v7249_v20 }
 0x36b   : > { %v4970_v22 = vpop.eup %4969  ;;  %4981 = verf.f32 %v2456_v15  ;;  %v3005_v59 = vpack.c.bf16 %v2825_v27, %v2821_v35  ;;  %v2329_v51 = vmul.f32 0.5, %v7252_v41 }
 0x36c   : > { %v4972_v3 = vpop.eup %4971  ;;  %v2181_v23 = vpop.f32.mrb[84].mxu1  ;;  %v2700_v45 = vadd.f32 1.0, %v4970_v22  ;;  %4983 = verf.f32 %v2457_v55 }
 0x36d   : > { %v7257_v30 = vadd.f32 %v2181_v23, %v7135_v34  ;;  %v2183_v46 = vpop.f32.mrb[85].mxu1  ;;  %v4974_v40 = vpop.eup %4973  ;;  %v2701_v25 = vadd.f32 1.0, %v4972_v3  ;;  %3687 = vmatprep.mubr.bf16.mxu0 %v3005_v59 }
 0x36e   : > { %v7261_v47 = vadd.f32 %v2183_v46, %v7141_v11  ;;  %v2185_v37 = vpop.f32.mrb[86].mxu1  ;;  %v4976_v29 = vpop.eup %4975  ;;  %v2704_v19 = vadd.f32 1.0, %v4974_v40  ;;  %3688 = vmatmul.mubr.bf16.gmra.mrb[8].mxu0 %v3004_v44  ;;  %v2828_v21 = vmul.f32 %v2700_v45, %v2316_v0 }
 0x36f   : > { %v2460_v36 = vmul.f32 0.70710677, %v7257_v30  ;;  %v2187_v50 = vpop.f32.mrb[87].mxu1  ;;  %v2705_v54 = vadd.f32 1.0, %v4976_v29  ;;  %v7269_v16 = vadd.f32 %v2185_v37, %v7135_v34  ;;  %v2829_v49 = vmul.f32 %v2701_v25, %v2317_v31 }
 0x370   : > { %v2461_v48 = vmul.f32 0.70710677, %v7261_v47  ;;  %v2832_v4 = vmul.f32 %v2704_v19, %v2320_v2  ;;  %v7272_v38 = vadd.f32 %v2187_v50, %v7141_v11  ;;  %v2332_v37 = vmul.f32 0.5, %v7257_v30 }
 0x371   : > { %4985 = verf.f32 %v2460_v36  ;;  %v2833_v17 = vmul.f32 %v2705_v54, %v2321_v8  ;;  %v2464_v58 = vmul.f32 0.70710677, %v7269_v16  ;;  %v2333_v36 = vmul.f32 0.5, %v7261_v47 }
 0x372   : > { %4987 = verf.f32 %v2461_v48  ;;  %v2465_v5 = vmul.f32 0.70710677, %v7272_v38  ;;  %v3008_v14 = vpack.c.bf16 %v2832_v4, %v2828_v21  ;;  %v2336_v50 = vmul.f32 0.5, %v7269_v16 }
 0x373   : > { %v4978_v53 = vpop.eup %4977  ;;  %4989 = verf.f32 %v2464_v58  ;;  %v3009_v33 = vpack.c.bf16 %v2833_v17, %v2829_v49  ;;  %v2337_v21 = vmul.f32 0.5, %v7272_v38 }
 0x374   : > { %v4980_v9 = vpop.eup %4979  ;;  %v2191_v60 = vpop.f32.mrb[88].mxu1  ;;  %v2708_v13 = vadd.f32 1.0, %v4978_v53  ;;  %4991 = verf.f32 %v2465_v5 }
 0x375   : > { %v7277_v12 = vadd.f32 %v2191_v60, %v7135_v34  ;;  %v2193_v24 = vpop.f32.mrb[89].mxu1  ;;  %v4982_v6 = vpop.eup %4981  ;;  %v2709_v39 = vadd.f32 1.0, %v4980_v9  ;;  %3697 = vmatprep.mubr.bf16.mxu0 %v3009_v33 }
 0x376   : > { %v7281_v1 = vadd.f32 %v2193_v24, %v7141_v11  ;;  %v2195_v43 = vpop.f32.mrb[90].mxu1  ;;  %v4984_v56 = vpop.eup %4983  ;;  %v2712_v61 = vadd.f32 1.0, %v4982_v6  ;;  %3698 = vmatmul.mubr.bf16.gmra.mrb[12].mxu0 %v3008_v14  ;;  %v2836_v27 = vmul.f32 %v2708_v13, %v2324_v42 }
 0x377   : > { %v2468_v63 = vmul.f32 0.70710677, %v7277_v12  ;;  %v2197_v26 = vpop.f32.mrb[91].mxu1  ;;  %v2713_v7 = vadd.f32 1.0, %v4984_v56  ;;  %v7289_v35 = vadd.f32 %v2195_v43, %v7135_v34  ;;  %v2837_v20 = vmul.f32 %v2709_v39, %v2325_v28 }
 0x378   : > { %v2469_v18 = vmul.f32 0.70710677, %v7281_v1  ;;  %v2840_v15 = vmul.f32 %v2712_v61, %v2328_v10  ;;  %v7292_v52 = vadd.f32 %v2197_v26, %v7141_v11  ;;  %v2340_v43 = vmul.f32 0.5, %v7277_v12 }
 0x379   : > { %4993 = verf.f32 %v2468_v63  ;;  %v2841_v22 = vmul.f32 %v2713_v7, %v2329_v51  ;;  %v2472_v55 = vmul.f32 0.70710677, %v7289_v35  ;;  %v2341_v63 = vmul.f32 0.5, %v7281_v1 }
 0x37a   : > { %4995 = verf.f32 %v2469_v18  ;;  %v2473_v41 = vmul.f32 0.70710677, %v7292_v52  ;;  %v3012_v3 = vpack.c.bf16 %v2840_v15, %v2836_v27  ;;  %v2344_v26 = vmul.f32 0.5, %v7289_v35 }
 0x37b   : > { %v4986_v44 = vpop.eup %4985  ;;  %4997 = verf.f32 %v2472_v55  ;;  %v3013_v45 = vpack.c.bf16 %v2841_v22, %v2837_v20  ;;  %v2345_v27 = vmul.f32 0.5, %v7292_v52 }
 0x37c   : > { %v4988_v23 = vpop.eup %4987  ;;  %v2201_v59 = vpop.f32.mrb[92].mxu1  ;;  %v2716_v46 = vadd.f32 1.0, %v4986_v44  ;;  %4999 = verf.f32 %v2473_v41 }
 0x37d   : > { %v7297_v40 = vadd.f32 %v2201_v59, %v7135_v34  ;;  %v2203_v0 = vpop.f32.mrb[93].mxu1  ;;  %v4990_v25 = vpop.eup %4989  ;;  %v2717_v29 = vadd.f32 1.0, %v4988_v23  ;;  %3707 = vmatprep.mubr.bf16.mxu0 %v3013_v45 }
 0x37e   : > { %v7301_v31 = vadd.f32 %v2203_v0, %v7141_v11  ;;  %v2205_v2 = vpop.f32.mrb[94].mxu1  ;;  %v4992_v19 = vpop.eup %4991  ;;  %v2720_v8 = vadd.f32 1.0, %v4990_v25  ;;  %3708 = vmatmul.mubr.bf16.gmra.mrb[16].mxu0 %v3012_v3  ;;  %v2844_v17 = vmul.f32 %v2716_v46, %v2332_v37 }
 0x37f   : > { %v2476_v54 = vmul.f32 0.70710677, %v7297_v40  ;;  %v2207_v48 = vpop.f32.mrb[95].mxu1  ;;  %v2721_v4 = vadd.f32 1.0, %v4992_v19  ;;  %v7309_v49 = vadd.f32 %v2205_v2, %v7135_v34  ;;  %v2845_v16 = vmul.f32 %v2717_v29, %v2333_v36 }
 0x380   : > { %v2477_v30 = vmul.f32 0.70710677, %v7301_v31  ;;  %v2848_v58 = vmul.f32 %v2720_v8, %v2336_v50  ;;  %v7312_v47 = vadd.f32 %v2207_v48, %v7141_v11  ;;  %v2348_v2 = vmul.f32 0.5, %v7297_v40 }
 0x381   : > { %5001 = verf.f32 %v2476_v54  ;;  %v2849_v53 = vmul.f32 %v2721_v4, %v2337_v21  ;;  %v2480_v5 = vmul.f32 0.70710677, %v7309_v49  ;;  %v2349_v54 = vmul.f32 0.5, %v7301_v31 }
 0x382   : > { %5003 = verf.f32 %v2477_v30  ;;  %v2481_v38 = vmul.f32 0.70710677, %v7312_v47  ;;  %v3016_v9 = vpack.c.bf16 %v2848_v58, %v2844_v17  ;;  %v2352_v48 = vmul.f32 0.5, %v7309_v49 }
 0x383   : > { %v4994_v14 = vpop.eup %4993  ;;  %5005 = verf.f32 %v2480_v5  ;;  %v3017_v13 = vpack.c.bf16 %v2849_v53, %v2845_v16  ;;  %v2353_v17 = vmul.f32 0.5, %v7312_v47 }
 0x384   : > { %v4996_v60 = vpop.eup %4995  ;;  %v2211_v33 = vpop.f32.mrb[96].mxu1  ;;  %v2724_v24 = vadd.f32 1.0, %v4994_v14  ;;  %5007 = verf.f32 %v2481_v38 }
 0x385   : > { %v7317_v6 = vadd.f32 %v2211_v33, %v7135_v34  ;;  %v2213_v42 = vpop.f32.mrb[97].mxu1  ;;  %v4998_v39 = vpop.eup %4997  ;;  %v2725_v56 = vadd.f32 1.0, %v4996_v60  ;;  %3717 = vmatprep.mubr.bf16.mxu0 %v3017_v13 }
 0x386   : > { %v7321_v28 = vadd.f32 %v2213_v42, %v7141_v11  ;;  %v2215_v10 = vpop.f32.mrb[98].mxu1  ;;  %v5000_v61 = vpop.eup %4999  ;;  %v2728_v51 = vadd.f32 1.0, %v4998_v39  ;;  %3718 = vmatmul.mubr.bf16.gmra.mrb[20].mxu0 %v3016_v9  ;;  %v2852_v22 = vmul.f32 %v2724_v24, %v2340_v43 }
 0x387   : > { %v2484_v7 = vmul.f32 0.70710677, %v7317_v6  ;;  %v2217_v18 = vpop.f32.mrb[99].mxu1  ;;  %v2729_v15 = vadd.f32 1.0, %v5000_v61  ;;  %v7329_v20 = vadd.f32 %v2215_v10, %v7135_v34  ;;  %v2853_v35 = vmul.f32 %v2725_v56, %v2341_v63 }
 0x388   : > { %v2485_v12 = vmul.f32 0.70710677, %v7321_v28  ;;  %v2856_v55 = vmul.f32 %v2728_v51, %v2344_v26  ;;  %v7332_v1 = vadd.f32 %v2217_v18, %v7141_v11  ;;  %v2356_v10 = vmul.f32 0.5, %v7317_v6 }
 0x389   : > { %5009 = verf.f32 %v2484_v7  ;;  %v2857_v44 = vmul.f32 %v2729_v15, %v2345_v27  ;;  %v2488_v41 = vmul.f32 0.70710677, %v7329_v20  ;;  %v2357_v7 = vmul.f32 0.5, %v7321_v28 }
 0x38a   : > { %5011 = verf.f32 %v2485_v12  ;;  %v2489_v52 = vmul.f32 0.70710677, %v7332_v1  ;;  %v3020_v23 = vpack.c.bf16 %v2856_v55, %v2852_v22  ;;  %v2360_v18 = vmul.f32 0.5, %v7329_v20 }
 0x38b   : > { %v5002_v3 = vpop.eup %5001  ;;  %5013 = verf.f32 %v2488_v41  ;;  %v3021_v46 = vpack.c.bf16 %v2857_v44, %v2853_v35  ;;  %v2361_v22 = vmul.f32 0.5, %v7332_v1 }
 0x38c   : > { %v5004_v59 = vpop.eup %5003  ;;  %v2221_v45 = vpop.f32.mrb[100].mxu1  ;;  %v2732_v0 = vadd.f32 1.0, %v5002_v3  ;;  %5015 = verf.f32 %v2489_v52 }
 0x38d   : > { %v7337_v25 = vadd.f32 %v2221_v45, %v7135_v34  ;;  %v2223_v37 = vpop.f32.mrb[101].mxu1  ;;  %v5006_v29 = vpop.eup %5005  ;;  %v2733_v19 = vadd.f32 1.0, %v5004_v59  ;;  %3727 = vmatprep.mubr.bf16.mxu0 %v3021_v46 }
 0x38e   : > { %v7341_v36 = vadd.f32 %v2223_v37, %v7141_v11  ;;  %v2225_v50 = vpop.f32.mrb[102].mxu1  ;;  %v5008_v8 = vpop.eup %5007  ;;  %v2736_v21 = vadd.f32 1.0, %v5006_v29  ;;  %3728 = vmatmul.mubr.bf16.gmra.mrb[24].mxu0 %v3020_v23  ;;  %v2860_v53 = vmul.f32 %v2732_v0, %v2348_v2 }
 0x38f   : > { %v2492_v4 = vmul.f32 0.70710677, %v7337_v25  ;;  %v2227_v30 = vpop.f32.mrb[103].mxu1  ;;  %v2737_v58 = vadd.f32 1.0, %v5008_v8  ;;  %v7349_v16 = vadd.f32 %v2225_v50, %v7135_v34  ;;  %v2861_v49 = vmul.f32 %v2733_v19, %v2349_v54 }
 0x390   : > { %v2493_v40 = vmul.f32 0.70710677, %v7341_v36  ;;  %v2864_v5 = vmul.f32 %v2736_v21, %v2352_v48  ;;  %v7352_v31 = vadd.f32 %v2227_v30, %v7141_v11  ;;  %v2364_v50 = vmul.f32 0.5, %v7337_v25 }
 0x391   : > { %5017 = verf.f32 %v2492_v4  ;;  %v2865_v14 = vmul.f32 %v2737_v58, %v2353_v17  ;;  %v2496_v38 = vmul.f32 0.70710677, %v7349_v16  ;;  %v2365_v4 = vmul.f32 0.5, %v7341_v36 }
 0x392   : > { %5019 = verf.f32 %v2493_v40  ;;  %v2497_v47 = vmul.f32 0.70710677, %v7352_v31  ;;  %v3024_v60 = vpack.c.bf16 %v2864_v5, %v2860_v53  ;;  %v2368_v30 = vmul.f32 0.5, %v7349_v16 }
 0x393   : > { %v5010_v9 = vpop.eup %5009  ;;  %5021 = verf.f32 %v2496_v38  ;;  %v3025_v24 = vpack.c.bf16 %v2865_v14, %v2861_v49  ;;  %v2369_v53 = vmul.f32 0.5, %v7352_v31 }
 0x394   : > { %v5012_v33 = vpop.eup %5011  ;;  %v2231_v13 = vpop.f32.mrb[104].mxu1  ;;  %v2740_v42 = vadd.f32 1.0, %v5010_v9  ;;  %5023 = verf.f32 %v2497_v47 }
 0x395   : > { %v7357_v39 = vadd.f32 %v2231_v13, %v7135_v34  ;;  %v2233_v43 = vpop.f32.mrb[105].mxu1  ;;  %v5014_v56 = vpop.eup %5013  ;;  %v2741_v61 = vadd.f32 1.0, %v5012_v33  ;;  %3737 = vmatprep.mubr.bf16.mxu0 %v3025_v24 }
 0x396   : > { %v7361_v63 = vadd.f32 %v2233_v43, %v7141_v11  ;;  %v2235_v26 = vpop.f32.mrb[106].mxu1  ;;  %v5016_v51 = vpop.eup %5015  ;;  %v2744_v27 = vadd.f32 1.0, %v5014_v56  ;;  %3738 = vmatmul.mubr.bf16.gmra.mrb[28].mxu0 %v3024_v60  ;;  %v2868_v44 = vmul.f32 %v2740_v42, %v2356_v10 }
 0x397   : > { %v2500_v15 = vmul.f32 0.70710677, %v7357_v39  ;;  %v2237_v12 = vpop.f32.mrb[107].mxu1  ;;  %v2745_v55 = vadd.f32 1.0, %v5016_v51  ;;  %v7369_v35 = vadd.f32 %v2235_v26, %v7135_v34  ;;  %v2869_v20 = vmul.f32 %v2741_v61, %v2357_v7 }
 0x398   : > { %v2501_v6 = vmul.f32 0.70710677, %v7361_v63  ;;  %v2872_v41 = vmul.f32 %v2744_v27, %v2360_v18  ;;  %v7372_v28 = vadd.f32 %v2237_v12, %v7141_v11  ;;  %v2372_v26 = vmul.f32 0.5, %v7357_v39 }
 0x399   : > { %5025 = verf.f32 %v2500_v15  ;;  %v2873_v3 = vmul.f32 %v2745_v55, %v2361_v22  ;;  %v2504_v52 = vmul.f32 0.70710677, %v7369_v35  ;;  %v2373_v15 = vmul.f32 0.5, %v7361_v63 }
 0x39a   : > { %5027 = verf.f32 %v2501_v6  ;;  %v2505_v1 = vmul.f32 0.70710677, %v7372_v28  ;;  %v3028_v59 = vpack.c.bf16 %v2872_v41, %v2868_v44  ;;  %v2376_v12 = vmul.f32 0.5, %v7369_v35 }
 0x39b   : > { %v5018_v23 = vpop.eup %5017  ;;  %5029 = verf.f32 %v2504_v52  ;;  %v3029_v0 = vpack.c.bf16 %v2873_v3, %v2869_v20  ;;  %v2377_v44 = vmul.f32 0.5, %v7372_v28 }
 0x39c   : > { %v5020_v45 = vpop.eup %5019  ;;  %v2241_v46 = vpop.f32.mrb[108].mxu1  ;;  %v2748_v37 = vadd.f32 1.0, %v5018_v23  ;;  %5031 = verf.f32 %v2505_v1 }
 0x39d   : > { %v7377_v29 = vadd.f32 %v2241_v46, %v7135_v34  ;;  %v2243_v2 = vpop.f32.mrb[109].mxu1  ;;  %v5022_v19 = vpop.eup %5021  ;;  %v2749_v8 = vadd.f32 1.0, %v5020_v45  ;;  %3747 = vmatprep.mubr.bf16.mxu0 %v3029_v0 }
 0x39e   : > { %v7381_v54 = vadd.f32 %v2243_v2, %v7141_v11  ;;  %v2245_v48 = vpop.f32.mrb[110].mxu1  ;;  %v5024_v21 = vpop.eup %5023  ;;  %v2752_v17 = vadd.f32 1.0, %v5022_v19  ;;  %3748 = vmatmul.mubr.bf16.gmra.mrb[32].mxu0 %v3028_v59  ;;  %v2876_v14 = vmul.f32 %v2748_v37, %v2364_v50 }
 0x39f   : > { %v2508_v58 = vmul.f32 0.70710677, %v7377_v29  ;;  %v2247_v40 = vpop.f32.mrb[111].mxu1  ;;  %v2753_v5 = vadd.f32 1.0, %v5024_v21  ;;  %v7389_v49 = vadd.f32 %v2245_v48, %v7135_v34  ;;  %v2877_v16 = vmul.f32 %v2749_v8, %v2365_v4 }
 0x3a0   : > { %v2509_v25 = vmul.f32 0.70710677, %v7381_v54  ;;  %v2880_v38 = vmul.f32 %v2752_v17, %v2368_v30  ;;  %v7392_v36 = vadd.f32 %v2247_v40, %v7141_v11  ;;  %v2380_v48 = vmul.f32 0.5, %v7377_v29 }
 0x3a1   : > { %5033 = verf.f32 %v2508_v58  ;;  %v2881_v9 = vmul.f32 %v2753_v5, %v2369_v53  ;;  %v2512_v47 = vmul.f32 0.70710677, %v7389_v49  ;;  %v2381_v58 = vmul.f32 0.5, %v7381_v54 }
 0x3a2   : > { %5035 = verf.f32 %v2509_v25  ;;  %v2513_v31 = vmul.f32 0.70710677, %v7392_v36  ;;  %v3032_v33 = vpack.c.bf16 %v2880_v38, %v2876_v14  ;;  %v2384_v40 = vmul.f32 0.5, %v7389_v49 }
 0x3a3   : > { %v5026_v60 = vpop.eup %5025  ;;  %5037 = verf.f32 %v2512_v47  ;;  %v3033_v42 = vpack.c.bf16 %v2881_v9, %v2877_v16  ;;  %v2385_v14 = vmul.f32 0.5, %v7392_v36 }
 0x3a4   : > { %v5028_v13 = vpop.eup %5027  ;;  %v2251_v24 = vpop.f32.mrb[112].mxu1  ;;  %v2756_v43 = vadd.f32 1.0, %v5026_v60  ;;  %5039 = verf.f32 %v2513_v31 }
 0x3a5   : > { %v7397_v56 = vadd.f32 %v2251_v24, %v7135_v34  ;;  %v2253_v10 = vpop.f32.mrb[113].mxu1  ;;  %v5030_v61 = vpop.eup %5029  ;;  %v2757_v51 = vadd.f32 1.0, %v5028_v13  ;;  %3757 = vmatprep.mubr.bf16.mxu0 %v3033_v42 }
 0x3a6   : > { %v7401_v7 = vadd.f32 %v2253_v10, %v7141_v11  ;;  %v2255_v18 = vpop.f32.mrb[114].mxu1  ;;  %v5032_v27 = vpop.eup %5031  ;;  %v2760_v22 = vadd.f32 1.0, %v5030_v61  ;;  %3758 = vmatmul.mubr.bf16.gmra.mrb[36].mxu0 %v3032_v33  ;;  %v2884_v3 = vmul.f32 %v2756_v43, %v2372_v26 }
 0x3a7   : > { %v2516_v55 = vmul.f32 0.70710677, %v7397_v56  ;;  %v2257_v6 = vpop.f32.mrb[115].mxu1  ;;  %v2761_v41 = vadd.f32 1.0, %v5032_v27  ;;  %v7409_v20 = vadd.f32 %v2255_v18, %v7135_v34  ;;  %v2885_v35 = vmul.f32 %v2757_v51, %v2373_v15 }
 0x3a8   : > { %v2517_v39 = vmul.f32 0.70710677, %v7401_v7  ;;  %v2888_v52 = vmul.f32 %v2760_v22, %v2376_v12  ;;  %v7412_v63 = vadd.f32 %v2257_v6, %v7141_v11  ;;  %v2388_v18 = vmul.f32 0.5, %v7397_v56 }
 0x3a9   : > { %5041 = verf.f32 %v2516_v55  ;;  %v2889_v23 = vmul.f32 %v2761_v41, %v2377_v44  ;;  %v2520_v1 = vmul.f32 0.70710677, %v7409_v20  ;;  %v2389_v55 = vmul.f32 0.5, %v7401_v7 }
 0x3aa   : > { %5043 = verf.f32 %v2517_v39  ;;  %v2521_v28 = vmul.f32 0.70710677, %v7412_v63  ;;  %v3036_v45 = vpack.c.bf16 %v2888_v52, %v2884_v3  ;;  %v2392_v6 = vmul.f32 0.5, %v7409_v20 }
 0x3ab   : > { %v5034_v59 = vpop.eup %5033  ;;  %5045 = verf.f32 %v2520_v1  ;;  %v3037_v37 = vpack.c.bf16 %v2889_v23, %v2885_v35  ;;  %v2393_v3 = vmul.f32 0.5, %v7412_v63 }
 0x3ac   : > { %v5036_v46 = vpop.eup %5035  ;;  %v2261_v0 = vpop.f32.mrb[116].mxu1  ;;  %v2764_v2 = vadd.f32 1.0, %v5034_v59  ;;  %5047 = verf.f32 %v2521_v28 }
 0x3ad   : > { %v7417_v19 = vadd.f32 %v2261_v0, %v7135_v34  ;;  %v2263_v50 = vpop.f32.mrb[117].mxu1  ;;  %v5038_v8 = vpop.eup %5037  ;;  %v2765_v21 = vadd.f32 1.0, %v5036_v46  ;;  %3767 = vmatprep.mubr.bf16.mxu0 %v3037_v37 }
 0x3ae   : > { %v7421_v4 = vadd.f32 %v2263_v50, %v7141_v11  ;;  %v2265_v30 = vpop.f32.mrb[118].mxu1  ;;  %v5040_v17 = vpop.eup %5039  ;;  %v2768_v53 = vadd.f32 1.0, %v5038_v8  ;;  %3768 = vmatmul.mubr.bf16.gmra.mrb[40].mxu0 %v3036_v45  ;;  %v2892_v9 = vmul.f32 %v2764_v2, %v2380_v48 }
 0x3af   : > { %v2524_v5 = vmul.f32 0.70710677, %v7417_v19  ;;  %v2267_v25 = vpop.f32.mrb[119].mxu1  ;;  %v2769_v38 = vadd.f32 1.0, %v5040_v17  ;;  %v7429_v16 = vadd.f32 %v2265_v30, %v7135_v34  ;;  %v2893_v49 = vmul.f32 %v2765_v21, %v2381_v58 }
 0x3b0   : > { %v2525_v29 = vmul.f32 0.70710677, %v7421_v4  ;;  %v2896_v47 = vmul.f32 %v2768_v53, %v2384_v40  ;;  %v7432_v54 = vadd.f32 %v2267_v25, %v7141_v11  ;;  %v2396_v30 = vmul.f32 0.5, %v7417_v19 }
 0x3b1   : > { %5049 = verf.f32 %v2524_v5  ;;  %v2897_v60 = vmul.f32 %v2769_v38, %v2385_v14  ;;  %v2528_v31 = vmul.f32 0.70710677, %v7429_v16  ;;  %v2397_v5 = vmul.f32 0.5, %v7421_v4 }
 0x3b2   : > { %5051 = verf.f32 %v2525_v29  ;;  %v2529_v36 = vmul.f32 0.70710677, %v7432_v54  ;;  %v3040_v13 = vpack.c.bf16 %v2896_v47, %v2892_v9  ;;  %v2400_v25 = vmul.f32 0.5, %v7429_v16 }
 0x3b3   : > { %v5042_v33 = vpop.eup %5041  ;;  %5053 = verf.f32 %v2528_v31  ;;  %v3041_v43 = vpack.c.bf16 %v2897_v60, %v2893_v49  ;;  %v2401_v9 = vmul.f32 0.5, %v7432_v54 }
 0x3b4   : > { %v5044_v24 = vpop.eup %5043  ;;  %v2271_v42 = vpop.f32.mrb[120].mxu1  ;;  %v2772_v10 = vadd.f32 1.0, %v5042_v33  ;;  %5055 = verf.f32 %v2529_v36 }
 0x3b5   : > { %v7437_v61 = vadd.f32 %v2271_v42, %v7135_v34  ;;  %v2273_v26 = vpop.f32.mrb[121].mxu1  ;;  %v5046_v51 = vpop.eup %5045  ;;  %v2773_v27 = vadd.f32 1.0, %v5044_v24  ;;  %3777 = vmatprep.mubr.bf16.mxu0 %v3041_v43 }
 0x3b6   : > { %v7441_v15 = vadd.f32 %v2273_v26, %v7141_v11  ;;  %v2275_v12 = vpop.f32.mrb[122].mxu1  ;;  %v5048_v22 = vpop.eup %5047  ;;  %v2776_v44 = vadd.f32 1.0, %v5046_v51  ;;  %3778 = vmatmul.mubr.bf16.gmra.mrb[44].mxu0 %v3040_v13  ;;  %v2900_v23 = vmul.f32 %v2772_v10, %v2388_v18 }
 0x3b7   : > { %v2532_v41 = vmul.f32 0.70710677, %v7437_v61  ;;  %v2277_v39 = vpop.f32.mrb[123].mxu1  ;;  %v2777_v52 = vadd.f32 1.0, %v5048_v22  ;;  %v2276_v35 = vadd.f32 %v2275_v12, %v7135_v34  ;;  %v2901_v7 = vmul.f32 %v2773_v27, %v2389_v55 }
 0x3b8   : > { %v2533_v56 = vmul.f32 0.70710677, %v7441_v15  ;;  %v2904_v1 = vmul.f32 %v2776_v44, %v2392_v6  ;;  %v2278_v59 = vadd.f32 %v2277_v39, %v7141_v11  ;;  %v2404_v18 = vmul.f32 0.5, %v7437_v61 }
 0x3b9   : > { %5057 = verf.f32 %v2532_v41  ;;  %v2905_v28 = vmul.f32 %v2777_v52, %v2393_v3  ;;  %v2536_v20 = vmul.f32 0.70710677, %v2276_v35  ;;  %v2408_v27 = vmul.f32 0.5, %v2276_v35 }
 0x3ba   : > { %5059 = verf.f32 %v2533_v56  ;;  %v2537_v46 = vmul.f32 0.70710677, %v2278_v59  ;;  %v3044_v0 = vpack.c.bf16 %v2904_v1, %v2900_v23  ;;  %v2405_v12 = vmul.f32 0.5, %v7441_v15 }
 0x3bb   : > { %v5050_v45 = vpop.eup %5049  ;;  %5061 = verf.f32 %v2536_v20  ;;  %v3045_v2 = vpack.c.bf16 %v2905_v28, %v2901_v7  ;;  %v2409_v22 = vmul.f32 0.5, %v2278_v59 }
 0x3bc   : > { %v5052_v37 = vpop.eup %5051  ;;  %v2281_v63 = vpop.f32.mrb[124].mxu1  ;;  %v2780_v50 = vadd.f32 1.0, %v5050_v45  ;;  %5063 = verf.f32 %v2537_v46 }
 0x3bd   : > { %v2282_v8 = vadd.f32 %v2281_v63, %v7135_v34  ;;  %v2283_v48 = vpop.f32.mrb[125].mxu1  ;;  %v5054_v21 = vpop.eup %5053  ;;  %v2781_v17 = vadd.f32 1.0, %v5052_v37  ;;  %3787 = vmatprep.mubr.bf16.mxu0 %v3045_v2 }
 0x3be   : > { %v2284_v58 = vadd.f32 %v2283_v48, %v7141_v11  ;;  %v2285_v40 = vpop.f32.mrb[126].mxu1  ;;  %v5056_v53 = vpop.eup %5055  ;;  %v2784_v14 = vadd.f32 1.0, %v5054_v21  ;;  %3788 = vmatmul.mubr.bf16.gmra.mrb[48].mxu0 %v3044_v0  ;;  %v2908_v60 = vmul.f32 %v2780_v50, %v2396_v30  ;;  %v2930_v21 = vld [vmem:[#allocation3] sm:$0xff]  ;;  %v2931_v30 = vld [vmem:[#allocation3 + $0x8] sm:$0xff] }
 0x3bf   : > { %v2540_v38 = vmul.f32 0.70710677, %v2282_v8  ;;  %v2287_v29 = vpop.f32.mrb[127].mxu1  ;;  %v2785_v47 = vadd.f32 1.0, %v5056_v53  ;;  %v2286_v19 = vadd.f32 %v2285_v40, %v7135_v34  ;;  %v2909_v36 = vmul.f32 %v2781_v17, %v2397_v5  ;;  %v2932_v40 = vld [vmem:[#allocation3 + $0x10] sm:$0xff]  ;;  %v2933_v5 = vld [vmem:[#allocation3 + $0x18] sm:$0xff] }
 0x3c0   : > { %v2541_v49 = vmul.f32 0.70710677, %v2284_v58  ;;  %v2912_v31 = vmul.f32 %v2784_v14, %v2400_v25  ;;  %v2288_v33 = vadd.f32 %v2287_v29, %v7141_v11  ;;  %v2412_v35 = vmul.f32 0.5, %v2282_v8 }
 0x3c1   : > { %5065 = verf.f32 %v2540_v38  ;;  %v2913_v13 = vmul.f32 %v2785_v47, %v2401_v9  ;;  %v2544_v4 = vmul.f32 0.70710677, %v2286_v19  ;;  %v2416_v20 = vmul.f32 0.5, %v2286_v19  ;;  %v2934_v9 = vld [vmem:[#allocation3 + $0x20] sm:$0xff]  ;;  %v2935_v47 = vld [vmem:[#allocation3 + $0x28] sm:$0xff]  ;;  %v2936_v19 = vld [vmem:[#allocation3 + $0x30] sm:$0xff] }
 0x3c2   : > { %5067 = verf.f32 %v2541_v49  ;;  %v2545_v24 = vmul.f32 0.70710677, %v2288_v33  ;;  %v3048_v42 = vpack.c.bf16 %v2912_v31, %v2908_v60  ;;  %v2413_v15 = vmul.f32 0.5, %v2284_v58 }
 0x3c3   : > { %v5058_v16 = vpop.eup %5057  ;;  %5069 = verf.f32 %v2544_v4  ;;  %v3049_v10 = vpack.c.bf16 %v2913_v13, %v2909_v36  ;;  %v2417_v59 = vmul.f32 0.5, %v2288_v33  ;;  %v2937_v33 = vld [vmem:[#allocation3 + $0x38] sm:$0xff] }
 0x3c4   : > { %v5060_v43 = vpop.eup %5059  ;;  %v2788_v54 = vadd.f32 1.0, %v5058_v16  ;;  %5071 = verf.f32 %v2545_v24 }
 0x3c5   : > { %v5062_v26 = vpop.eup %5061  ;;  %v2789_v51 = vadd.f32 1.0, %v5060_v43  ;;  %3797 = vmatprep.mubr.bf16.mxu0 %v3049_v10  ;;  %v2939_v43 = vld [vmem:[#allocation3 + $0x48] sm:$0xff] }
 0x3c6   : > { %v5064_v34 = vpop.eup %5063  ;;  %v2792_v11 = vadd.f32 1.0, %v5062_v26  ;;  %3798 = vmatmul.mubr.bf16.gmra.mrb[52].mxu0 %v3048_v42  ;;  %v2916_v6 = vmul.f32 %v2788_v54, %v2404_v18  ;;  %v2938_v42 = vld [vmem:[#allocation3 + $0x40] sm:$0xff]  ;;  %v2940_v54 = vld [vmem:[#allocation3 + $0x50] sm:$0xff] }
 0x3c7   : > { %v2793_v55 = vadd.f32 1.0, %v5064_v34  ;;  %v2917_v41 = vmul.f32 %v2789_v51, %v2405_v12  ;;  %v2941_v34 = vld [vmem:[#allocation3 + $0x58] sm:$0xff] }
 0x3c8   : > { %v2920_v44 = vmul.f32 %v2792_v11, %v2408_v27 }
 0x3c9   : > { %v2921_v39 = vmul.f32 %v2793_v55, %v2409_v22  ;;  %v2942_v55 = vld [vmem:[#allocation3 + $0x60] sm:$0xff] }
 0x3ca   : > { %v3052_v52 = vpack.c.bf16 %v2920_v44, %v2916_v6  ;;  %v2943_v6 = vld [vmem:[#allocation3 + $0x68] sm:$0xff] }
 0x3cb   : > { %v5066_v3 = vpop.eup %5065  ;;  %v3053_v23 = vpack.c.bf16 %v2921_v39, %v2917_v41  ;;  %v2944_v41 = vld [vmem:[#allocation3 + $0x70] sm:$0xff] }
 0x3cc   : > { %v5068_v56 = vpop.eup %5067  ;;  %v2796_v1 = vadd.f32 1.0, %v5066_v3 }
 0x3cd   : > { %v5070_v7 = vpop.eup %5069  ;;  %v2797_v28 = vadd.f32 1.0, %v5068_v56  ;;  %3807 = vmatprep.mubr.bf16.mxu0 %v3053_v23 }
 0x3ce   : > { %v5072_v61 = vpop.eup %5071  ;;  %v2800_v45 = vadd.f32 1.0, %v5070_v7  ;;  %3808 = vmatmul.mubr.bf16.gmra.mrb[56].mxu0 %v3052_v52  ;;  %v2924_v0 = vmul.f32 %v2796_v1, %v2412_v35  ;;  %v2945_v52 = vld [vmem:[#allocation3 + $0x78] sm:$0xff]  ;;  %v2947_v35 = vld [vmem:[#allocation3 + $0x88] sm:$0xff] }
 0x3cf   : > { %v2801_v46 = vadd.f32 1.0, %v5072_v61  ;;  %v2925_v63 = vmul.f32 %v2797_v28, %v2413_v15  ;;  %v2946_v61 = vld [vmem:[#allocation3 + $0x80] sm:$0xff] }
 0x3d0   : > { %v2928_v37 = vmul.f32 %v2800_v45, %v2416_v20  ;;  %v2948_v45 = vld [vmem:[#allocation3 + $0x90] sm:$0xff] }
 0x3d1   : > { %v2929_v2 = vmul.f32 %v2801_v46, %v2417_v59  ;;  %v2949_v46 = vld [vmem:[#allocation3 + $0x98] sm:$0xff] }
 0x3d2   : > { %v3056_v50 = vpack.c.bf16 %v2928_v37, %v2924_v0 }
 0x3d3   : > { %v3057_v48 = vpack.c.bf16 %v2929_v2, %v2925_v63 }
 0x3d5   : > { %3817 = vmatprep.mubr.bf16.mxu0 %v3057_v48  ;;  %v2950_v48 = vld [vmem:[#allocation3 + $0xa0] sm:$0xff] }
 0x3d6   : > { %3818 = vmatmul.mubr.bf16.gmra.mrb[60].mxu0 %v3056_v50 }
 0x431   : > { %v3669_v17 = vpop.f32.mrb[0].mxu0 }
 0x432   : > { %v3828_v53 = vadd.f32 %v3669_v17, %v2930_v21  ;;  %v3671_v8 = vpop.f32.mrb[1].mxu0  ;;  %v2951_v21 = vld [vmem:[#allocation3 + $0xa8] sm:$0xff]  ;;  %v2952_v17 = vld [vmem:[#allocation3 + $0xb0] sm:$0xff] }
 0x433   : > { %v3829_v25 = vadd.f32 %v3671_v8, %v2931_v30  ;;  %v3673_v14 = vpop.f32.mrb[2].mxu0  ;;  %v2953_v8 = vld [vmem:[#allocation3 + $0xb8] sm:$0xff] }
 0x434   : > { %3892 = vst [vmem:[#allocation3] sm:$0xff] %v3828_v53  ;;  %v3830_v58 = vadd.f32 %v3673_v14, %v2932_v40  ;;  %v3675_v38 = vpop.f32.mrb[3].mxu0 }
 0x435   : > { %3893 = vst [vmem:[#allocation3 + $0x8] sm:$0xff] %v3829_v25  ;;  %v3831_v29 = vadd.f32 %v3675_v38, %v2933_v5 }
 0x436   : > { %3894 = vst [vmem:[#allocation3 + $0x10] sm:$0xff] %v3830_v58 }
 0x437   : > { %3895 = vst [vmem:[#allocation3 + $0x18] sm:$0xff] %v3831_v29  ;;  %v2954_v29 = vld [vmem:[#allocation3 + $0xc0] sm:$0xff] }
 0x439   : > { %v3679_v49 = vpop.f32.mrb[4].mxu0 }
 0x43a   : > { %v3832_v60 = vadd.f32 %v3679_v49, %v2934_v9  ;;  %v3681_v31 = vpop.f32.mrb[5].mxu0  ;;  %v2955_v9 = vld [vmem:[#allocation3 + $0xc8] sm:$0xff]  ;;  %v2956_v49 = vld [vmem:[#allocation3 + $0xd0] sm:$0xff] }
 0x43b   : > { %v3833_v36 = vadd.f32 %v3681_v31, %v2935_v47  ;;  %v3683_v13 = vpop.f32.mrb[6].mxu0  ;;  %v2957_v31 = vld [vmem:[#allocation3 + $0xd8] sm:$0xff] }
 0x43c   : > { %3896 = vst [vmem:[#allocation3 + $0x20] sm:$0xff] %v3832_v60  ;;  %v3834_v4 = vadd.f32 %v3683_v13, %v2936_v19  ;;  %v3685_v16 = vpop.f32.mrb[7].mxu0 }
 0x43d   : > { %3897 = vst [vmem:[#allocation3 + $0x28] sm:$0xff] %v3833_v36  ;;  %v3835_v24 = vadd.f32 %v3685_v16, %v2937_v33 }
 0x43e   : > { %3898 = vst [vmem:[#allocation3 + $0x30] sm:$0xff] %v3834_v4 }
 0x43f   : > { %3899 = vst [vmem:[#allocation3 + $0x38] sm:$0xff] %v3835_v24  ;;  %v2958_v24 = vld [vmem:[#allocation3 + $0xe0] sm:$0xff] }
 0x441   : > { %v3689_v10 = vpop.f32.mrb[8].mxu0 }
 0x442   : > { %v3836_v26 = vadd.f32 %v3689_v10, %v2938_v42  ;;  %v3691_v51 = vpop.f32.mrb[9].mxu0  ;;  %v2959_v42 = vld [vmem:[#allocation3 + $0xe8] sm:$0xff]  ;;  %v2960_v10 = vld [vmem:[#allocation3 + $0xf0] sm:$0xff] }
 0x443   : > { %v3837_v18 = vadd.f32 %v3691_v51, %v2939_v43  ;;  %v3693_v27 = vpop.f32.mrb[10].mxu0  ;;  %v2961_v51 = vld [vmem:[#allocation3 + $0xf8] sm:$0xff] }
 0x444   : > { %3900 = vst [vmem:[#allocation3 + $0x40] sm:$0xff] %v3836_v26  ;;  %v3838_v11 = vadd.f32 %v3693_v27, %v2940_v54  ;;  %v3695_v12 = vpop.f32.mrb[11].mxu0 }
 0x445   : > { %3901 = vst [vmem:[#allocation3 + $0x48] sm:$0xff] %v3837_v18  ;;  %v3839_v22 = vadd.f32 %v3695_v12, %v2941_v34 }
 0x446   : > { %3902 = vst [vmem:[#allocation3 + $0x50] sm:$0xff] %v3838_v11 }
 0x447   : > { %3903 = vst [vmem:[#allocation3 + $0x58] sm:$0xff] %v3839_v22  ;;  %v2962_v22 = vld [vmem:[#allocation3 + $0x100] sm:$0xff] }
 0x449   : > { %v3699_v44 = vpop.f32.mrb[12].mxu0 }
 0x44a   : > { %v3840_v39 = vadd.f32 %v3699_v44, %v2942_v55  ;;  %v3701_v3 = vpop.f32.mrb[13].mxu0  ;;  %v2963_v55 = vld [vmem:[#allocation3 + $0x108] sm:$0xff]  ;;  %v2964_v44 = vld [vmem:[#allocation3 + $0x110] sm:$0xff] }
 0x44b   : > { %v3841_v56 = vadd.f32 %v3701_v3, %v2943_v6  ;;  %v3703_v23 = vpop.f32.mrb[14].mxu0  ;;  %v2965_v3 = vld [vmem:[#allocation3 + $0x118] sm:$0xff] }
 0x44c   : > { %3904 = vst [vmem:[#allocation3 + $0x60] sm:$0xff] %v3840_v39  ;;  %v3842_v1 = vadd.f32 %v3703_v23, %v2944_v41  ;;  %v3705_v7 = vpop.f32.mrb[15].mxu0 }
 0x44d   : > { %3905 = vst [vmem:[#allocation3 + $0x68] sm:$0xff] %v3841_v56  ;;  %v3843_v28 = vadd.f32 %v3705_v7, %v2945_v52 }
 0x44e   : > { %3906 = vst [vmem:[#allocation3 + $0x70] sm:$0xff] %v3842_v1 }
 0x44f   : > { %3907 = vst [vmem:[#allocation3 + $0x78] sm:$0xff] %v3843_v28  ;;  %v2966_v28 = vld [vmem:[#allocation3 + $0x120] sm:$0xff] }
 0x451   : > { %v3709_v20 = vpop.f32.mrb[16].mxu0 }
 0x452   : > { %v3844_v15 = vadd.f32 %v3709_v20, %v2946_v61  ;;  %v3711_v59 = vpop.f32.mrb[17].mxu0  ;;  %v2967_v61 = vld [vmem:[#allocation3 + $0x128] sm:$0xff]  ;;  %v2968_v20 = vld [vmem:[#allocation3 + $0x130] sm:$0xff] }
 0x453   : > { %v3845_v0 = vadd.f32 %v3711_v59, %v2947_v35  ;;  %v3713_v37 = vpop.f32.mrb[18].mxu0  ;;  %v2969_v59 = vld [vmem:[#allocation3 + $0x138] sm:$0xff] }
 0x454   : > { %3908 = vst [vmem:[#allocation3 + $0x80] sm:$0xff] %v3844_v15  ;;  %v3846_v63 = vadd.f32 %v3713_v37, %v2948_v45  ;;  %v3715_v2 = vpop.f32.mrb[19].mxu0 }
 0x455   : > { %3909 = vst [vmem:[#allocation3 + $0x88] sm:$0xff] %v3845_v0  ;;  %v3847_v50 = vadd.f32 %v3715_v2, %v2949_v46 }
 0x456   : > { %3910 = vst [vmem:[#allocation3 + $0x90] sm:$0xff] %v3846_v63 }
 0x457   : > { %3911 = vst [vmem:[#allocation3 + $0x98] sm:$0xff] %v3847_v50  ;;  %v2970_v50 = vld [vmem:[#allocation3 + $0x140] sm:$0xff] }
 0x459   : > { %v3719_v30 = vpop.f32.mrb[20].mxu0 }
 0x45a   : > { %v3848_v40 = vadd.f32 %v3719_v30, %v2950_v48  ;;  %v3721_v53 = vpop.f32.mrb[21].mxu0  ;;  %v2971_v48 = vld [vmem:[#allocation3 + $0x148] sm:$0xff]  ;;  %v2972_v30 = vld [vmem:[#allocation3 + $0x150] sm:$0xff] }
 0x45b   : > { %v3849_v5 = vadd.f32 %v3721_v53, %v2951_v21  ;;  %v3723_v25 = vpop.f32.mrb[22].mxu0  ;;  %v2973_v53 = vld [vmem:[#allocation3 + $0x158] sm:$0xff] }
 0x45c   : > { %3912 = vst [vmem:[#allocation3 + $0xa0] sm:$0xff] %v3848_v40  ;;  %v3850_v14 = vadd.f32 %v3723_v25, %v2952_v17  ;;  %v3725_v58 = vpop.f32.mrb[23].mxu0 }
 0x45d   : > { %3913 = vst [vmem:[#allocation3 + $0xa8] sm:$0xff] %v3849_v5  ;;  %v3851_v38 = vadd.f32 %v3725_v58, %v2953_v8 }
 0x45e   : > { %3914 = vst [vmem:[#allocation3 + $0xb0] sm:$0xff] %v3850_v14 }
 0x45f   : > { %3915 = vst [vmem:[#allocation3 + $0xb8] sm:$0xff] %v3851_v38  ;;  %v2974_v38 = vld [vmem:[#allocation3 + $0x160] sm:$0xff] }
 0x461   : > { %v3729_v47 = vpop.f32.mrb[24].mxu0 }
 0x462   : > { %v3852_v19 = vadd.f32 %v3729_v47, %v2954_v29  ;;  %v3731_v60 = vpop.f32.mrb[25].mxu0  ;;  %v2975_v29 = vld [vmem:[#allocation3 + $0x168] sm:$0xff]  ;;  %v2976_v47 = vld [vmem:[#allocation3 + $0x170] sm:$0xff] }
 0x463   : > { %v3853_v33 = vadd.f32 %v3731_v60, %v2955_v9  ;;  %v3733_v36 = vpop.f32.mrb[26].mxu0  ;;  %v2977_v60 = vld [vmem:[#allocation3 + $0x178] sm:$0xff] }
 0x464   : > { %3916 = vst [vmem:[#allocation3 + $0xc0] sm:$0xff] %v3852_v19  ;;  %v3854_v13 = vadd.f32 %v3733_v36, %v2956_v49  ;;  %v3735_v4 = vpop.f32.mrb[27].mxu0 }
 0x465   : > { %3917 = vst [vmem:[#allocation3 + $0xc8] sm:$0xff] %v3853_v33  ;;  %v3855_v16 = vadd.f32 %v3735_v4, %v2957_v31 }
 0x466   : > { %3918 = vst [vmem:[#allocation3 + $0xd0] sm:$0xff] %v3854_v13 }
 0x467   : > { %3919 = vst [vmem:[#allocation3 + $0xd8] sm:$0xff] %v3855_v16  ;;  %v2978_v16 = vld [vmem:[#allocation3 + $0x180] sm:$0xff] }
 0x469   : > { %v3739_v43 = vpop.f32.mrb[28].mxu0 }
 0x46a   : > { %v3856_v54 = vadd.f32 %v3739_v43, %v2958_v24  ;;  %v3741_v26 = vpop.f32.mrb[29].mxu0  ;;  %v2979_v24 = vld [vmem:[#allocation3 + $0x188] sm:$0xff]  ;;  %v2980_v43 = vld [vmem:[#allocation3 + $0x190] sm:$0xff] }
 0x46b   : > { %v3857_v34 = vadd.f32 %v3741_v26, %v2959_v42  ;;  %v3743_v18 = vpop.f32.mrb[30].mxu0  ;;  %v2981_v26 = vld [vmem:[#allocation3 + $0x198] sm:$0xff] }
 0x46c   : > { %3920 = vst [vmem:[#allocation3 + $0xe0] sm:$0xff] %v3856_v54  ;;  %v3858_v27 = vadd.f32 %v3743_v18, %v2960_v10  ;;  %v3745_v11 = vpop.f32.mrb[31].mxu0 }
 0x46d   : > { %3921 = vst [vmem:[#allocation3 + $0xe8] sm:$0xff] %v3857_v34  ;;  %v3859_v12 = vadd.f32 %v3745_v11, %v2961_v51 }
 0x46e   : > { %3922 = vst [vmem:[#allocation3 + $0xf0] sm:$0xff] %v3858_v27 }
 0x46f   : > { %3923 = vst [vmem:[#allocation3 + $0xf8] sm:$0xff] %v3859_v12  ;;  %v2982_v12 = vld [vmem:[#allocation3 + $0x1a0] sm:$0xff] }
 0x471   : > { %v3749_v6 = vpop.f32.mrb[32].mxu0 }
 0x472   : > { %v3860_v41 = vadd.f32 %v3749_v6, %v2962_v22  ;;  %v3751_v39 = vpop.f32.mrb[33].mxu0  ;;  %v2983_v22 = vld [vmem:[#allocation3 + $0x1a8] sm:$0xff]  ;;  %v2984_v6 = vld [vmem:[#allocation3 + $0x1b0] sm:$0xff] }
 0x473   : > { %v3861_v52 = vadd.f32 %v3751_v39, %v2963_v55  ;;  %v3753_v56 = vpop.f32.mrb[34].mxu0  ;;  %v2985_v39 = vld [vmem:[#allocation3 + $0x1b8] sm:$0xff] }
 0x474   : > { %3924 = vst [vmem:[#allocation3 + $0x100] sm:$0xff] %v3860_v41  ;;  %v3862_v23 = vadd.f32 %v3753_v56, %v2964_v44  ;;  %v3755_v1 = vpop.f32.mrb[35].mxu0 }
 0x475   : > { %3925 = vst [vmem:[#allocation3 + $0x108] sm:$0xff] %v3861_v52  ;;  %v3863_v7 = vadd.f32 %v3755_v1, %v2965_v3 }
 0x476   : > { %3926 = vst [vmem:[#allocation3 + $0x110] sm:$0xff] %v3862_v23 }
 0x477   : > { %3927 = vst [vmem:[#allocation3 + $0x118] sm:$0xff] %v3863_v7  ;;  %v2986_v7 = vld [vmem:[#allocation3 + $0x1c0] sm:$0xff] }
 0x479   : > { %v3759_v35 = vpop.f32.mrb[36].mxu0 }
 0x47a   : > { %v3864_v45 = vadd.f32 %v3759_v35, %v2966_v28  ;;  %v3761_v15 = vpop.f32.mrb[37].mxu0  ;;  %v2987_v28 = vld [vmem:[#allocation3 + $0x1c8] sm:$0xff]  ;;  %v2988_v35 = vld [vmem:[#allocation3 + $0x1d0] sm:$0xff] }
 0x47b   : > { %v3865_v46 = vadd.f32 %v3761_v15, %v2967_v61  ;;  %v3763_v0 = vpop.f32.mrb[38].mxu0  ;;  %v2989_v15 = vld [vmem:[#allocation3 + $0x1d8] sm:$0xff] }
 0x47c   : > { %3928 = vst [vmem:[#allocation3 + $0x120] sm:$0xff] %v3864_v45  ;;  %v3866_v37 = vadd.f32 %v3763_v0, %v2968_v20  ;;  %v3765_v63 = vpop.f32.mrb[39].mxu0 }
 0x47d   : > { %3929 = vst [vmem:[#allocation3 + $0x128] sm:$0xff] %v3865_v46  ;;  %v3867_v2 = vadd.f32 %v3765_v63, %v2969_v59 }
 0x47e   : > { %3930 = vst [vmem:[#allocation3 + $0x130] sm:$0xff] %v3866_v37 }
 0x47f   : > { %3931 = vst [vmem:[#allocation3 + $0x138] sm:$0xff] %v3867_v2  ;;  %v2990_v2 = vld [vmem:[#allocation3 + $0x1e0] sm:$0xff] }
 0x481   : > { %v3769_v21 = vpop.f32.mrb[40].mxu0 }
 0x482   : > { %v3868_v17 = vadd.f32 %v3769_v21, %v2970_v50  ;;  %v3771_v40 = vpop.f32.mrb[41].mxu0  ;;  %v2991_v50 = vld [vmem:[#allocation3 + $0x1e8] sm:$0xff]  ;;  %v2992_v21 = vld [vmem:[#allocation3 + $0x1f0] sm:$0xff] }
 0x483   : > { %v3869_v8 = vadd.f32 %v3771_v40, %v2971_v48  ;;  %v3773_v5 = vpop.f32.mrb[42].mxu0  ;;  %v2993_v40 = vld [vmem:[#allocation3 + $0x1f8] sm:$0xff] }
 0x484   : > { %3932 = vst [vmem:[#allocation3 + $0x140] sm:$0xff] %v3868_v17  ;;  %v3870_v25 = vadd.f32 %v3773_v5, %v2972_v30  ;;  %v3775_v14 = vpop.f32.mrb[43].mxu0 }
 0x485   : > { %3933 = vst [vmem:[#allocation3 + $0x148] sm:$0xff] %v3869_v8  ;;  %v3871_v58 = vadd.f32 %v3775_v14, %v2973_v53 }
 0x486   : > { %3934 = vst [vmem:[#allocation3 + $0x150] sm:$0xff] %v3870_v25 }
 0x487   : > { %3935 = vst [vmem:[#allocation3 + $0x158] sm:$0xff] %v3871_v58  ;;  %v3960_v58 = vld [vmem:[#allocation3] sm:$0xff] (!%p4421_p0) }
 0x489   : > { %v3779_v9 = vpop.f32.mrb[44].mxu0 }
 0x48a   : > { %v3872_v49 = vadd.f32 %v3779_v9, %v2974_v38  ;;  %v3781_v19 = vpop.f32.mrb[45].mxu0  ;;  %v4024_v38 = vld [vmem:[%s7627_s6] sm:$0x3] (!%p4421_p0) }
 0x48b   : > { %v3873_v31 = vadd.f32 %v3781_v19, %v2975_v29  ;;  %v3783_v33 = vpop.f32.mrb[46].mxu0  ;;  %v3961_v29 = vld [vmem:[#allocation3 + $0x8] sm:$0xff] (!%p4421_p0)  ;;  %v7466_v9 = vrot.slane (!%p4421_p0), %v4024_v38, %v1566_v62  ;;  %v3963_v19 = vld [vmem:[#allocation3 + $0x18] sm:$0xff] (!%p4421_p0) }
 0x48c   : > { %3936 = vst [vmem:[#allocation3 + $0x160] sm:$0xff] %v3872_v49  ;;  %v3874_v36 = vadd.f32 %v3783_v33, %v2976_v47  ;;  %v3785_v13 = vpop.f32.mrb[47].mxu0  ;;  %v7470_v47 = vrot.slane (!%p4421_p0), %v4024_v38, %v1570_v57  ;;  %v3962_v49 = vld [vmem:[#allocation3 + $0x10] sm:$0xff] (!%p4421_p0)  ;;  %v3968_v57 = vld [vmem:[#allocation3 + $0x40] sm:$0xff] (!%p4421_p0) }
 0x48d   : > { %3937 = vst [vmem:[#allocation3 + $0x168] sm:$0xff] %v3873_v31  ;;  %v3875_v4 = vadd.f32 %v3785_v13, %v2977_v60  ;;  %v3964_v60 = vld [vmem:[#allocation3 + $0x20] sm:$0xff] (!%p4421_p0)  ;;  %v3965_v31 = vld [vmem:[#allocation3 + $0x28] sm:$0xff] (!%p4421_p0)  ;;  %v3966_v33 = vld [vmem:[#allocation3 + $0x30] sm:$0xff] (!%p4421_p0)  ;;  %v4036_v13 = vadd.f32 (!%p4421_p0), %v7466_v9, %v3960_v58  ;;  %v4038_v62 = vadd.f32 (!%p4421_p0), %v7466_v9, %v3962_v49 }
 0x48e   : > { %3938 = vst [vmem:[#allocation3 + $0x170] sm:$0xff] %v3874_v36  ;;  %v3967_v36 = vld [vmem:[#allocation3 + $0x38] sm:$0xff] (!%p4421_p0)  ;;  %v4039_v32 = vadd.f32 (!%p4421_p0), %v7470_v47, %v3963_v19  ;;  %v3992_v49 = vld [vmem:[#allocation3 + $0x100] sm:$0xff] (!%p4421_p0)  ;;  %v3993_v19 = vld [vmem:[#allocation3 + $0x108] sm:$0xff] (!%p4421_p0) }
 0x48f   : > { %3939 = vst [vmem:[#allocation3 + $0x178] sm:$0xff] %v3875_v4  ;;  %v4037_v4 = vadd.f32 (!%p4421_p0), %v7470_v47, %v3961_v29  ;;  %4100 = vst [vmem:[%s5374_s18] sm:$0xff] (!%p4421_p0), %v4036_v13  ;;  %v3995_v13 = vld [vmem:[#allocation3 + $0x118] sm:$0xff] (!%p4421_p0) }
 0x490   : > { %4102 = vst [vmem:[%s5374_s18 + $0x10] sm:$0xff] (!%p4421_p0), %v4038_v62  ;;  %4103 = vst [vmem:[%s5374_s18 + $0x18] sm:$0xff] (!%p4421_p0), %v4039_v32  ;;  %v3997_v62 = vld [vmem:[#allocation3 + $0x128] sm:$0xff] (!%p4421_p0)  ;;  %v4071_v32 = vadd.f32 (!%p4421_p0), %v7470_v47, %v3995_v13 }
 0x491   : > { %v3789_v42 = vpop.f32.mrb[48].mxu0  ;;  %4101 = vst [vmem:[%s5374_s18 + $0x8] sm:$0xff] (!%p4421_p0), %v4037_v4  ;;  %v3996_v4 = vld [vmem:[#allocation3 + $0x120] sm:$0xff] (!%p4421_p0) }
 0x492   : > { %v3876_v10 = vadd.f32 %v3789_v42, %v2978_v16  ;;  %v3791_v54 = vpop.f32.mrb[49].mxu0  ;;  %v3969_v16 = vld [vmem:[#allocation3 + $0x48] sm:$0xff] (!%p4421_p0)  ;;  %v4040_v42 = vadd.f32 (!%p4421_p0), %v7466_v9, %v3964_v60  ;;  %v3994_v60 = vld [vmem:[#allocation3 + $0x110] sm:$0xff] (!%p4421_p0)  ;;  %4135 = vst [vmem:[%s5374_s18 + $0x118] sm:$0xff] (!%p4421_p0), %v4071_v32 }
 0x493   : > { %v3877_v51 = vadd.f32 %v3791_v54, %v2979_v24  ;;  %v3793_v34 = vpop.f32.mrb[50].mxu0  ;;  %v3970_v24 = vld [vmem:[#allocation3 + $0x50] sm:$0xff] (!%p4421_p0)  ;;  %v4043_v54 = vadd.f32 (!%p4421_p0), %v7470_v47, %v3967_v36  ;;  %v4070_v36 = vadd.f32 (!%p4421_p0), %v7466_v9, %v3994_v60 }
 0x494   : > { %3940 = vst [vmem:[#allocation3 + $0x180] sm:$0xff] %v3876_v10  ;;  %v3878_v18 = vadd.f32 %v3793_v34, %v2980_v43  ;;  %v3795_v27 = vpop.f32.mrb[51].mxu0  ;;  %v4041_v43 = vadd.f32 (!%p4421_p0), %v7470_v47, %v3965_v31  ;;  %v4042_v10 = vadd.f32 (!%p4421_p0), %v7466_v9, %v3966_v33  ;;  %v3973_v34 = vld [vmem:[#allocation3 + $0x68] sm:$0xff] (!%p4421_p0)  ;;  %4104 = vst [vmem:[%s5374_s18 + $0x20] sm:$0xff] (!%p4421_p0), %v4040_v42  ;;  %v3999_v42 = vld [vmem:[#allocation3 + $0x138] sm:$0xff] (!%p4421_p0) }
 0x495   : > { %3941 = vst [vmem:[#allocation3 + $0x188] sm:$0xff] %v3877_v51  ;;  %v3879_v11 = vadd.f32 %v3795_v27, %v2981_v26  ;;  %v3971_v26 = vld [vmem:[#allocation3 + $0x58] sm:$0xff] (!%p4421_p0)  ;;  %v3972_v51 = vld [vmem:[#allocation3 + $0x60] sm:$0xff] (!%p4421_p0)  ;;  %v4045_v27 = vadd.f32 (!%p4421_p0), %v7470_v47, %v3969_v16  ;;  %4107 = vst [vmem:[%s5374_s18 + $0x38] sm:$0xff] (!%p4421_p0), %v4043_v54  ;;  %v4068_v31 = vadd.f32 (!%p4421_p0), %v7466_v9, %v3992_v49 }
 0x496   : > { %3942 = vst [vmem:[#allocation3 + $0x190] sm:$0xff] %v3878_v18  ;;  %v4044_v18 = vadd.f32 (!%p4421_p0), %v7466_v9, %v3968_v57  ;;  %4105 = vst [vmem:[%s5374_s18 + $0x28] sm:$0xff] (!%p4421_p0), %v4041_v43  ;;  %v4069_v33 = vadd.f32 (!%p4421_p0), %v7470_v47, %v3993_v19  ;;  %v4072_v57 = vadd.f32 (!%p4421_p0), %v7466_v9, %v3996_v4  ;;  %v4000_v43 = vld [vmem:[#allocation3 + $0x140] sm:$0xff] (!%p4421_p0) }
 0x497   : > { %3943 = vst [vmem:[#allocation3 + $0x198] sm:$0xff] %v3879_v11  ;;  %v4046_v11 = vadd.f32 (!%p4421_p0), %v7466_v9, %v3970_v24  ;;  %4106 = vst [vmem:[%s5374_s18 + $0x30] sm:$0xff] (!%p4421_p0), %v4042_v10  ;;  %v4073_v16 = vadd.f32 (!%p4421_p0), %v7470_v47, %v3997_v62  ;;  %v3998_v24 = vld [vmem:[#allocation3 + $0x130] sm:$0xff] (!%p4421_p0)  ;;  %v4075_v54 = vadd.f32 (!%p4421_p0), %v7470_v47, %v3999_v42 }
 0x498   : > { %4108 = vst [vmem:[%s5374_s18 + $0x40] sm:$0xff] (!%p4421_p0), %v4044_v18  ;;  %4109 = vst [vmem:[%s5374_s18 + $0x48] sm:$0xff] (!%p4421_p0), %v4045_v27  ;;  %v4074_v10 = vadd.f32 (!%p4421_p0), %v7466_v9, %v3998_v24  ;;  %v4003_v18 = vld [vmem:[#allocation3 + $0x158] sm:$0xff] (!%p4421_p0) }
 0x499   : > { %v3799_v55 = vpop.f32.mrb[52].mxu0  ;;  %4110 = vst [vmem:[%s5374_s18 + $0x50] sm:$0xff] (!%p4421_p0), %v4046_v11  ;;  %4132 = vst [vmem:[%s5374_s18 + $0x100] sm:$0xff] (!%p4421_p0), %v4068_v31 }
 0x49a   : > { %v3880_v44 = vadd.f32 %v3799_v55, %v2982_v12  ;;  %v3801_v41 = vpop.f32.mrb[53].mxu0  ;;  %v4047_v12 = vadd.f32 (!%p4421_p0), %v7470_v47, %v3971_v26  ;;  %v3975_v55 = vld [vmem:[#allocation3 + $0x78] sm:$0xff] (!%p4421_p0)  ;;  %4133 = vst [vmem:[%s5374_s18 + $0x108] sm:$0xff] (!%p4421_p0), %v4069_v33  ;;  %4134 = vst [vmem:[%s5374_s18 + $0x110] sm:$0xff] (!%p4421_p0), %v4070_v36  ;;  %v4076_v26 = vadd.f32 (!%p4421_p0), %v7466_v9, %v4000_v43 }
 0x49b   : > { %v3881_v3 = vadd.f32 %v3801_v41, %v2983_v22  ;;  %v3803_v52 = vpop.f32.mrb[54].mxu0  ;;  %v3974_v22 = vld [vmem:[#allocation3 + $0x70] sm:$0xff] (!%p4421_p0)  ;;  %v4049_v41 = vadd.f32 (!%p4421_p0), %v7470_v47, %v3973_v34  ;;  %4136 = vst [vmem:[%s5374_s18 + $0x120] sm:$0xff] (!%p4421_p0), %v4072_v57  ;;  %4137 = vst [vmem:[%s5374_s18 + $0x128] sm:$0xff] (!%p4421_p0), %v4073_v16 }
 0x49c   : > { %3944 = vst [vmem:[#allocation3 + $0x1a0] sm:$0xff] %v3880_v44  ;;  %v3882_v56 = vadd.f32 %v3803_v52, %v2984_v6  ;;  %v3805_v23 = vpop.f32.mrb[55].mxu0  ;;  %v3976_v6 = vld [vmem:[#allocation3 + $0x80] sm:$0xff] (!%p4421_p0)  ;;  %v4048_v44 = vadd.f32 (!%p4421_p0), %v7466_v9, %v3972_v51  ;;  %v3977_v52 = vld [vmem:[#allocation3 + $0x88] sm:$0xff] (!%p4421_p0)  ;;  %4111 = vst [vmem:[%s5374_s18 + $0x58] sm:$0xff] (!%p4421_p0), %v4047_v12  ;;  %v4079_v12 = vadd.f32 (!%p4421_p0), %v7470_v47, %v4003_v18 }
 0x49d   : > { %3945 = vst [vmem:[#allocation3 + $0x1a8] sm:$0xff] %v3881_v3  ;;  %v3883_v1 = vadd.f32 %v3805_v23, %v2985_v39  ;;  %v4050_v39 = vadd.f32 (!%p4421_p0), %v7466_v9, %v3974_v22  ;;  %v4051_v3 = vadd.f32 (!%p4421_p0), %v7470_v47, %v3975_v55  ;;  %v3979_v23 = vld [vmem:[#allocation3 + $0x98] sm:$0xff] (!%p4421_p0)  ;;  %4113 = vst [vmem:[%s5374_s18 + $0x68] sm:$0xff] (!%p4421_p0), %v4049_v41  ;;  %v4001_v51 = vld [vmem:[#allocation3 + $0x148] sm:$0xff] (!%p4421_p0) }
 0x49e   : > { %3946 = vst [vmem:[#allocation3 + $0x1b0] sm:$0xff] %v3882_v56  ;;  %v3978_v56 = vld [vmem:[#allocation3 + $0x90] sm:$0xff] (!%p4421_p0)  ;;  %4112 = vst [vmem:[%s5374_s18 + $0x60] sm:$0xff] (!%p4421_p0), %v4048_v44  ;;  %v4077_v27 = vadd.f32 (!%p4421_p0), %v7470_v47, %v4001_v51  ;;  %v4004_v22 = vld [vmem:[#allocation3 + $0x160] sm:$0xff] (!%p4421_p0) }
 0x49f   : > { %3947 = vst [vmem:[#allocation3 + $0x1b8] sm:$0xff] %v3883_v1  ;;  %v4052_v1 = vadd.f32 (!%p4421_p0), %v7466_v9, %v3976_v6  ;;  %4114 = vst [vmem:[%s5374_s18 + $0x70] sm:$0xff] (!%p4421_p0), %v4050_v39  ;;  %v4002_v34 = vld [vmem:[#allocation3 + $0x150] sm:$0xff] (!%p4421_p0)  ;;  %v4005_v55 = vld [vmem:[#allocation3 + $0x168] sm:$0xff] (!%p4421_p0)  ;;  %v4080_v44 = vadd.f32 (!%p4421_p0), %v7466_v9, %v4004_v22 }
 0x4a0   : > { %4115 = vst [vmem:[%s5374_s18 + $0x78] sm:$0xff] (!%p4421_p0), %v4051_v3  ;;  %v4078_v11 = vadd.f32 (!%p4421_p0), %v7466_v9, %v4002_v34  ;;  %v4006_v6 = vld [vmem:[#allocation3 + $0x170] sm:$0xff] (!%p4421_p0)  ;;  %4138 = vst [vmem:[%s5374_s18 + $0x130] sm:$0xff] (!%p4421_p0), %v4074_v10  ;;  %v4081_v41 = vadd.f32 (!%p4421_p0), %v7470_v47, %v4005_v55  ;;  %v4007_v3 = vld [vmem:[#allocation3 + $0x178] sm:$0xff] (!%p4421_p0) }
 0x4a1   : > { %v3809_v61 = vpop.f32.mrb[56].mxu0  ;;  %4116 = vst [vmem:[%s5374_s18 + $0x80] sm:$0xff] (!%p4421_p0), %v4052_v1  ;;  %4139 = vst [vmem:[%s5374_s18 + $0x138] sm:$0xff] (!%p4421_p0), %v4075_v54  ;;  %v4082_v39 = vadd.f32 (!%p4421_p0), %v7466_v9, %v4006_v6 }
 0x4a2   : > { %v3884_v20 = vadd.f32 %v3809_v61, %v2986_v7  ;;  %v3811_v45 = vpop.f32.mrb[57].mxu0  ;;  %v4053_v7 = vadd.f32 (!%p4421_p0), %v7470_v47, %v3977_v52  ;;  %v4055_v61 = vadd.f32 (!%p4421_p0), %v7470_v47, %v3979_v23  ;;  %4140 = vst [vmem:[%s5374_s18 + $0x140] sm:$0xff] (!%p4421_p0), %v4076_v26  ;;  %v4008_v52 = vld [vmem:[#allocation3 + $0x180] sm:$0xff] (!%p4421_p0)  ;;  %4141 = vst [vmem:[%s5374_s18 + $0x148] sm:$0xff] (!%p4421_p0), %v4077_v27 }
 0x4a3   : > { %v3885_v59 = vadd.f32 %v3811_v45, %v2987_v28  ;;  %v3813_v46 = vpop.f32.mrb[58].mxu0  ;;  %v4054_v28 = vadd.f32 (!%p4421_p0), %v7466_v9, %v3978_v56  ;;  %v3982_v45 = vld [vmem:[#allocation3 + $0xb0] sm:$0xff] (!%p4421_p0)  ;;  %v4009_v56 = vld [vmem:[#allocation3 + $0x188] sm:$0xff] (!%p4421_p0)  ;;  %4142 = vst [vmem:[%s5374_s18 + $0x150] sm:$0xff] (!%p4421_p0), %v4078_v11  ;;  %4143 = vst [vmem:[%s5374_s18 + $0x158] sm:$0xff] (!%p4421_p0), %v4079_v12  ;;  %v4083_v23 = vadd.f32 (!%p4421_p0), %v7470_v47, %v4007_v3 }
 0x4a4   : > { %3948 = vst [vmem:[#allocation3 + $0x1c0] sm:$0xff] %v3884_v20  ;;  %v3886_v0 = vadd.f32 %v3813_v46, %v2988_v35  ;;  %v3815_v37 = vpop.f32.mrb[59].mxu0  ;;  %v3980_v35 = vld [vmem:[#allocation3 + $0xa0] sm:$0xff] (!%p4421_p0)  ;;  %v3981_v20 = vld [vmem:[#allocation3 + $0xa8] sm:$0xff] (!%p4421_p0)  ;;  %v4058_v46 = vadd.f32 (!%p4421_p0), %v7466_v9, %v3982_v45  ;;  %4117 = vst [vmem:[%s5374_s18 + $0x88] sm:$0xff] (!%p4421_p0), %v4053_v7  ;;  %v4084_v1 = vadd.f32 (!%p4421_p0), %v7466_v9, %v4008_v52 }
 0x4a5   : > { %3949 = vst [vmem:[#allocation3 + $0x1c8] sm:$0xff] %v3885_v59  ;;  %v3887_v63 = vadd.f32 %v3815_v37, %v2989_v15  ;;  %v4056_v15 = vadd.f32 (!%p4421_p0), %v7466_v9, %v3980_v35  ;;  %v4057_v59 = vadd.f32 (!%p4421_p0), %v7470_v47, %v3981_v20  ;;  %v3984_v37 = vld [vmem:[#allocation3 + $0xc0] sm:$0xff] (!%p4421_p0)  ;;  %4118 = vst [vmem:[%s5374_s18 + $0x90] sm:$0xff] (!%p4421_p0), %v4054_v28  ;;  %v4010_v28 = vld [vmem:[#allocation3 + $0x190] sm:$0xff] (!%p4421_p0) }
 0x4a6   : > { %3950 = vst [vmem:[#allocation3 + $0x1d0] sm:$0xff] %v3886_v0  ;;  %v3983_v0 = vld [vmem:[#allocation3 + $0xb8] sm:$0xff] (!%p4421_p0)  ;;  %4119 = vst [vmem:[%s5374_s18 + $0x98] sm:$0xff] (!%p4421_p0), %v4055_v61  ;;  %v4085_v7 = vadd.f32 (!%p4421_p0), %v7470_v47, %v4009_v56  ;;  %v4012_v35 = vld [vmem:[#allocation3 + $0x1a0] sm:$0xff] (!%p4421_p0)  ;;  %v4086_v20 = vadd.f32 (!%p4421_p0), %v7466_v9, %v4010_v28 }
 0x4a7   : > { %3951 = vst [vmem:[#allocation3 + $0x1d8] sm:$0xff] %v3887_v63  ;;  %v3985_v63 = vld [vmem:[#allocation3 + $0xc8] sm:$0xff] (!%p4421_p0)  ;;  %4120 = vst [vmem:[%s5374_s18 + $0xa0] sm:$0xff] (!%p4421_p0), %v4056_v15  ;;  %v4011_v61 = vld [vmem:[#allocation3 + $0x198] sm:$0xff] (!%p4421_p0)  ;;  %v4088_v15 = vadd.f32 (!%p4421_p0), %v7466_v9, %v4012_v35 }
 0x4a8   : > { %4121 = vst [vmem:[%s5374_s18 + $0xa8] sm:$0xff] (!%p4421_p0), %v4057_v59  ;;  %4122 = vst [vmem:[%s5374_s18 + $0xb0] sm:$0xff] (!%p4421_p0), %v4058_v46  ;;  %v4087_v45 = vadd.f32 (!%p4421_p0), %v7470_v47, %v4011_v61  ;;  %v4013_v59 = vld [vmem:[#allocation3 + $0x1a8] sm:$0xff] (!%p4421_p0)  ;;  %v4014_v46 = vld [vmem:[#allocation3 + $0x1b0] sm:$0xff] (!%p4421_p0) }
 0x4a9   : > { %v3819_v48 = vpop.f32.mrb[60].mxu0  ;;  %3959 = sbr.rel (%p4421_p0) target bundleno = 1210 (0x4ba), region = 79  ;;  %4144 = vst [vmem:[%s5374_s18 + $0x160] sm:$0xff] (!%p4421_p0), %v4080_v44  ;;  %4145 = vst [vmem:[%s5374_s18 + $0x168] sm:$0xff] (!%p4421_p0), %v4081_v41 }
 0x4aa   : > { %v3888_v30 = vadd.f32 %v3819_v48, %v2990_v2  ;;  %v3821_v17 = vpop.f32.mrb[61].mxu0  ;;  %v4059_v2 = vadd.f32 (!%p4421_p0), %v7470_v47, %v3983_v0  ;;  %v4061_v48 = vadd.f32 (!%p4421_p0), %v7470_v47, %v3985_v63  ;;  %4146 = vst [vmem:[%s5374_s18 + $0x170] sm:$0xff] (!%p4421_p0), %v4082_v39  ;;  %v4015_v0 = vld [vmem:[#allocation3 + $0x1b8] sm:$0xff] (!%p4421_p0)  ;;  %4147 = vst [vmem:[%s5374_s18 + $0x178] sm:$0xff] (!%p4421_p0), %v4083_v23 }
 0x4ab   : > { %v3889_v53 = vadd.f32 %v3821_v17, %v2991_v50  ;;  %v3823_v8 = vpop.f32.mrb[62].mxu0  ;;  %v4060_v50 = vadd.f32 (!%p4421_p0), %v7466_v9, %v3984_v37  ;;  %v3988_v17 = vld [vmem:[#allocation3 + $0xe0] sm:$0xff] (!%p4421_p0)  ;;  %4148 = vst [vmem:[%s5374_s18 + $0x180] sm:$0xff] (!%p4421_p0), %v4084_v1  ;;  %4149 = vst [vmem:[%s5374_s18 + $0x188] sm:$0xff] (!%p4421_p0), %v4085_v7  ;;  %v4089_v37 = vadd.f32 (!%p4421_p0), %v7470_v47, %v4013_v59 }
 0x4ac   : > { %3952 = vst [vmem:[#allocation3 + $0x1e0] sm:$0xff] %v3888_v30  ;;  %v3890_v5 = vadd.f32 %v3823_v8, %v2992_v21  ;;  %v3825_v25 = vpop.f32.mrb[63].mxu0  ;;  %v3986_v21 = vld [vmem:[#allocation3 + $0xd0] sm:$0xff] (!%p4421_p0)  ;;  %v3987_v30 = vld [vmem:[#allocation3 + $0xd8] sm:$0xff] (!%p4421_p0)  ;;  %v4064_v8 = vadd.f32 (!%p4421_p0), %v7466_v9, %v3988_v17  ;;  %4123 = vst [vmem:[%s5374_s18 + $0xb8] sm:$0xff] (!%p4421_p0), %v4059_v2  ;;  %v4090_v63 = vadd.f32 (!%p4421_p0), %v7466_v9, %v4014_v46 }
 0x4ad   : > { %3953 = vst [vmem:[#allocation3 + $0x1e8] sm:$0xff] %v3889_v53  ;;  %v3891_v14 = vadd.f32 %v3825_v25, %v2993_v40  ;;  %v4062_v40 = vadd.f32 (!%p4421_p0), %v7466_v9, %v3986_v21  ;;  %v4063_v53 = vadd.f32 (!%p4421_p0), %v7470_v47, %v3987_v30  ;;  %v3990_v25 = vld [vmem:[#allocation3 + $0xf0] sm:$0xff] (!%p4421_p0)  ;;  %4124 = vst [vmem:[%s5374_s18 + $0xc0] sm:$0xff] (!%p4421_p0), %v4060_v50  ;;  %v4016_v50 = vld [vmem:[#allocation3 + $0x1c0] sm:$0xff] (!%p4421_p0) }
 0x4ae   : > { %3954 = vst [vmem:[#allocation3 + $0x1f0] sm:$0xff] %v3890_v5  ;;  %v3989_v5 = vld [vmem:[#allocation3 + $0xe8] sm:$0xff] (!%p4421_p0)  ;;  %4125 = vst [vmem:[%s5374_s18 + $0xc8] sm:$0xff] (!%p4421_p0), %v4061_v48  ;;  %v4066_v38 = vadd.f32 (!%p4421_p0), %v7466_v9, %v3990_v25  ;;  %v4091_v2 = vadd.f32 (!%p4421_p0), %v7470_v47, %v4015_v0  ;;  %v4018_v21 = vld [vmem:[#allocation3 + $0x1d0] sm:$0xff] (!%p4421_p0)  ;;  %v4092_v30 = vadd.f32 (!%p4421_p0), %v7466_v9, %v4016_v50 }
 0x4af   : > { %3955 = vst [vmem:[#allocation3 + $0x1f8] sm:$0xff] %v3891_v14  ;;  %v3991_v14 = vld [vmem:[#allocation3 + $0xf8] sm:$0xff] (!%p4421_p0)  ;;  %v4065_v58 = vadd.f32 (!%p4421_p0), %v7470_v47, %v3989_v5  ;;  %4126 = vst [vmem:[%s5374_s18 + $0xd0] sm:$0xff] (!%p4421_p0), %v4062_v40  ;;  %v4017_v48 = vld [vmem:[#allocation3 + $0x1c8] sm:$0xff] (!%p4421_p0)  ;;  %v4094_v40 = vadd.f32 (!%p4421_p0), %v7466_v9, %v4018_v21 }
 0x4b0   : > { %v4067_v29 = vadd.f32 %v7470_v47, %v3991_v14  ;;  %4127 = vst [vmem:[%s5374_s18 + $0xd8] sm:$0xff] %v4063_v53  ;;  %4128 = vst [vmem:[%s5374_s18 + $0xe0] sm:$0xff] %v4064_v8  ;;  %v4093_v17 = vadd.f32 %v7470_v47, %v4017_v48  ;;  %v4019_v53 = vld [vmem:[#allocation3 + $0x1d8] sm:$0xff] }
 0x4b1   : > { %4129 = vst [vmem:[%s5374_s18 + $0xe8] sm:$0xff] %v4065_v58  ;;  %4130 = vst [vmem:[%s5374_s18 + $0xf0] sm:$0xff] %v4066_v38  ;;  %v4095_v25 = vadd.f32 %v7470_v47, %v4019_v53 }
 0x4b2   : > { %4131 = vst [vmem:[%s5374_s18 + $0xf8] sm:$0xff] %v4067_v29  ;;  %4150 = vst [vmem:[%s5374_s18 + $0x190] sm:$0xff] %v4086_v20 }
 0x4b3   : > { %4151 = vst [vmem:[%s5374_s18 + $0x198] sm:$0xff] %v4087_v45  ;;  %4152 = vst [vmem:[%s5374_s18 + $0x1a0] sm:$0xff] %v4088_v15  ;;  %v4020_v8 = vld [vmem:[#allocation3 + $0x1e0] sm:$0xff] }
 0x4b4   : > { %v4021_v5 = vld [vmem:[#allocation3 + $0x1e8] sm:$0xff]  ;;  %4153 = vst [vmem:[%s5374_s18 + $0x1a8] sm:$0xff] %v4089_v37  ;;  %4154 = vst [vmem:[%s5374_s18 + $0x1b0] sm:$0xff] %v4090_v63  ;;  %v4096_v14 = vadd.f32 %v7466_v9, %v4020_v8 }
 0x4b5   : > { %4155 = vst [vmem:[%s5374_s18 + $0x1b8] sm:$0xff] %v4091_v2  ;;  %v4097_v58 = vadd.f32 %v7470_v47, %v4021_v5  ;;  %v4022_v38 = vld [vmem:[#allocation3 + $0x1f0] sm:$0xff]  ;;  %4156 = vst [vmem:[%s5374_s18 + $0x1c0] sm:$0xff] %v4092_v30 }
 0x4b6   : > { %v4023_v29 = vld [vmem:[#allocation3 + $0x1f8] sm:$0xff]  ;;  %4157 = vst [vmem:[%s5374_s18 + $0x1c8] sm:$0xff] %v4093_v17  ;;  %4158 = vst [vmem:[%s5374_s18 + $0x1d0] sm:$0xff] %v4094_v40  ;;  %v4098_v49 = vadd.f32 %v7466_v9, %v4022_v38 }
 0x4b7   : > { %v4099_v19 = vadd.f32 %v7470_v47, %v4023_v29  ;;  %4159 = vst [vmem:[%s5374_s18 + $0x1d8] sm:$0xff] %v4095_v25  ;;  %4160 = vst [vmem:[%s5374_s18 + $0x1e0] sm:$0xff] %v4096_v14 }
 0x4b8   : > { %4161 = vst [vmem:[%s5374_s18 + $0x1e8] sm:$0xff] %v4097_v58  ;;  %4162 = vst [vmem:[%s5374_s18 + $0x1f0] sm:$0xff] %v4098_v49 }
 0x4b9   : > { %4163 = vst [vmem:[%s5374_s18 + $0x1f8] sm:$0xff] %v4099_v19 }
 0x4ba PF: > { %s17_s30 = sadd.s32 1, %s5128_s30   ;;  %s7983_s14 = sld [smem:[#allocation5_spill]] }
 0x4bb   : > { %p14_p1 = scmp.ge.s32.totalorder %s17_s30, 6   ;;  %s7984_s24 = smov %s5108_s25 }
 0x4bc   : > { %s7985_s25 = smov %s5220_s12  ;;  %s7986_s26 = smov %s5120_s28 }
 0x4bd   : > { %s7987_s27 = smov %s5124_s29  ;;  %s7988_s28 = smov %s7991_s8 }
 0x4be   :  { %16 = sbr.rel (!%p14_p1) target bundleno = 6 (0x6), region = 123 }
 0x4c0   : > { %s7989_s29 = smov %s7983_s14 }

</bundles_post_ra>
